<compile_context>
chip_gen: v5e
topology: v5e:2x2
jax: 0.10.0
libtpu: 0.0.40
codegen_flags: <defaults>
</compile_context>

<pallas_src>
import jax
import jax.numpy as jnp
from jax import lax
from jax.experimental import pallas as pl
from jax.experimental.pallas import tpu as pltpu

KS = (4, 16, 64)                    # kernel sizes of the three branches
LPADS = (1, 7, 31)                  # PyTorch 'same' left pads: (k-1)//2
RPADS = (2, 8, 32)                  # PyTorch 'same' right pads: (k-1) - left
K_MAX = KS[-1]                      # 64 taps cover all branches
MAX_L = LPADS[-1]                   # 31 -> single max-padded input slab
BN_EPS = 1e-5
LANE = 128


def bottleneck_kernel(x_ref, w_ref, b_ref, o_ref, p_ref):
    """NB batch elements per grid step.

    x_ref: (NB, C_in, Lp_a)         max-padded, lane-aligned input slab
    w_ref: (3*C_out, K_MAX*C_in)    fused weights (BN scale folded, taps placed)
    b_ref: (3*C_out, 1)             folded conv-bias + BN bias
    o_ref: (NB, C_out, L)
    p_ref: (K_MAX*C_in, NB*L)       VMEM scratch: shared im2col patch matrix
    """
    nb, c_in, _ = x_ref.shape
    c_out = o_ref.shape[1]
    L = o_ref.shape[2]

    # Group taps so each scratch store is a full 8-sublane tile when possible.
    tps = 8 // c_in if (c_in < 8 and 8 % c_in == 0) else 1

    # im2col: p[t*C_in + c, b*L + l] = x[b, c, t + l]   (static loops, VMEM-local)
    for b in range(nb):
        xb = x_ref[b]                               # (C_in, Lp_a)
        col = b * L
        for g in range(0, K_MAX, tps):
            if tps == 1:
                blk = xb[:, g:g + L]
            else:
                blk = jnp.concatenate(
                    [xb[:, t:t + L] for t in range(g, g + tps)], axis=0)
            p_ref[g * c_in:(g + tps) * c_in, col:col + L] = blk

    # One 256-deep matmul shared by all three branches and all NB batch elems:
    # (3*C_out, K*C_in) x (K*C_in, NB*L)
    y = jnp.dot(w_ref[...], p_ref[...], preferred_element_type=jnp.float32)
    y = jnp.maximum(y + b_ref[...], 0.0)            # per-branch bias + ReLU
    comb = y[:c_out] + y[c_out:2 * c_out] + y[2 * c_out:]   # (C_out, NB*L)
    for b in range(nb):
        o_ref[b] = comb[:, b * L:(b + 1) * L].astype(o_ref.dtype)


def bottleneck_pallas(x, fused_params, nb=None):
    """x: (N, C_in, L) float32.  fused_params: (W_big, B_big) from fold_params."""
    N, C_in, L = x.shape
    W_big, B_big = fused_params
    C_out = W_big.shape[0] // 3

    if nb is None:                                  # batch elems per grid step
        nb = 1
        for cand in (8, 4, 2, 1):
            if N % cand == 0:
                nb = cand
                break
    assert N % nb == 0

    # Lane-aligned max-padded slab length (>= L + K_MAX - 1, multiple of 128).
    Lp_a = pl.cdiv(L + K_MAX - 1, LANE) * LANE
    x_pad = jnp.pad(x, ((0, 0), (0, 0), (MAX_L, Lp_a - MAX_L - L)))

    return pl.pallas_call(
        bottleneck_kernel,
        out_shape=jax.ShapeDtypeStruct((N, C_out, L), x.dtype),
        grid_spec=pltpu.PrefetchScalarGridSpec(
            num_scalar_prefetch=0,
            grid=(N // nb,),
            in_specs=[
                pl.BlockSpec((nb, C_in, Lp_a), lambda n: (n, 0, 0)),
                pl.BlockSpec(W_big.shape, lambda n: (0, 0)),
                pl.BlockSpec(B_big.shape, lambda n: (0, 0)),
            ],
            out_specs=pl.BlockSpec((nb, C_out, L), lambda n: (n, 0, 0)),
            scratch_shapes=[pltpu.VMEM((K_MAX * C_in, nb * L), jnp.float32)],
        ),
        compiler_params=pltpu.CompilerParams(
            dimension_semantics=("parallel",)),
    )(x_pad, W_big, B_big)


def init_raw_params(key, c_in, c_out):
    """Deterministic synthetic params for the 3 (Conv1d + BN) branches."""
    raw = []
    for k in KS:
        key, k1, k2, k3, k4, k5, k6 = jax.random.split(key, 7)
        w = jax.random.normal(k1, (c_out, c_in, k), jnp.float32) * 0.1
        b = jax.random.normal(k2, (c_out,), jnp.float32) * 0.1
        gamma = 1.0 + 0.1 * jax.random.normal(k3, (c_out,), jnp.float32)
        beta = 0.1 * jax.random.normal(k4, (c_out,), jnp.float32)
        mean = 0.1 * jax.random.normal(k5, (c_out,), jnp.float32)
        var = jax.random.uniform(k6, (c_out,), jnp.float32, 0.5, 1.5)
        raw.append((w, b, gamma, beta, mean, var))
    return raw


def fold_params(raw):
    """Fold BN scale into weights and pack all branches into one weight matrix.

    Returns:
      W_big: (3*C_out, K_MAX*C_in)  column index = t*C_in + c, branch b's taps
                                    placed at tap offsets [MAX_L - lp_b, ... + k_b)
      B_big: (3*C_out, 1)           folded conv-bias + BN bias per branch
    """
    blocks, biases = [], []
    for (w, b, gamma, beta, mean, var), lp in zip(raw, LPADS):
        c_out, c_in, k = w.shape
        scale = gamma / jnp.sqrt(var + BN_EPS)                 # (C_out,)
        bias = (b - mean) * scale + beta                       # (C_out,)
        w_scaled = w * scale[:, None, None]                    # BN scale -> weights
        w_t = jnp.transpose(w_scaled, (0, 2, 1))               # (C_out, K, C_in)
        off = MAX_L - lp                                       # tap offset in slab
        w_full = jnp.zeros((c_out, K_MAX, c_in), w.dtype)
        w_full = w_full.at[:, off:off + k, :].set(w_t)
        blocks.append(w_full.reshape(c_out, K_MAX * c_in))
        biases.append(bias[:, None])
    W_big = jnp.concatenate(blocks, axis=0)
    B_big = jnp.concatenate(biases, axis=0)
    return W_big, B_big


def bottleneck_reference(x, raw):
    """Pure-JAX reference matching PyTorch forward (eval-mode BN)."""
    outs = []
    for (w, b, gamma, beta, mean, var), lp, rp in zip(raw, LPADS, RPADS):
        y = lax.conv_general_dilated(
            x, w, window_strides=(1,), padding=[(lp, rp)],
            dimension_numbers=('NCH', 'OIH', 'NCH'))
        y = y + b[None, :, None]
        y = (y - mean[None, :, None]) / jnp.sqrt(var[None, :, None] + BN_EPS)
        y = y * gamma[None, :, None] + beta[None, :, None]
        outs.append(jnp.maximum(y, 0.0))
    return outs[0] + outs[1] + outs[2]


if __name__ == "__main__":
    key = jax.random.PRNGKey(0)
    k_x, k_p = jax.random.split(key)

    N, C_in, C_out, L = 2, 4, 8, 128
    x = jax.random.normal(k_x, (N, C_in, L), jnp.float32)

    raw = init_raw_params(k_p, C_in, C_out)
    fused = fold_params(raw)

    out = bottleneck_pallas(x, fused)
    out = jax.block_until_ready(out)

    ref = jax.block_until_ready(bottleneck_reference(x, raw))
    assert out.shape == (N, C_out, L), out.shape
    assert jnp.allclose(out, ref, rtol=1e-3, atol=1e-3), \
        float(jnp.max(jnp.abs(out - ref)))

    print("KERNEL_OK")
</pallas_src>

<mosaic_0001>
module attributes {stable_mosaic.version = 11 : i64} {
  func.func @bottleneck_kernel(%arg0: i32, %arg1: memref<2x4x256xf32, #tpu.memory_space<vmem>>, %arg2: memref<24x256xf32, #tpu.memory_space<vmem>>, %arg3: memref<24x1xf32, #tpu.memory_space<vmem>>, %arg4: memref<2x8x128xf32, #tpu.memory_space<vmem>>, %arg5: memref<256x256xf32, #tpu.memory_space<vmem>>) attributes {dimension_semantics = [#tpu.dimension_semantics<parallel>], iteration_bounds = array<i64: 1>, scalar_prefetch = 0 : i64, scratch_operands = 1 : i64, tpu.core_type = #tpu.core_type<tc>, window_params = [{transform_indices = @transform_0, window_bounds = array<i64: 2, 4, 256>}, {pipeline_mode = #tpu.pipeline_mode<synchronous>, transform_indices = @transform_1, window_bounds = array<i64: 24, 256>}, {pipeline_mode = #tpu.pipeline_mode<synchronous>, transform_indices = @transform_2, window_bounds = array<i64: 24, 1>}, {transform_indices = @transform_3, window_bounds = array<i64: 2, 8, 128>}]} {
    %c0 = arith.constant 0 : index
    %c0_0 = arith.constant 0 : index
    %c0_1 = arith.constant 0 : index
    %0 = vector.load %arg1[%c0, %c0_0, %c0_1] : memref<2x4x256xf32, #tpu.memory_space<vmem>>, vector<1x4x256xf32>
    %1 = vector.shape_cast %0 : vector<1x4x256xf32> to vector<4x256xf32>
    %2 = vector.extract_strided_slice %1 {offsets = [0, 0], sizes = [4, 128], strides = [1, 1]} : vector<4x256xf32> to vector<4x128xf32>
    %3 = vector.extract_strided_slice %1 {offsets = [0, 1], sizes = [4, 128], strides = [1, 1]} : vector<4x256xf32> to vector<4x128xf32>
    %4 = tpu.concatenate %2, %3 in 0 : vector<4x128xf32>, vector<4x128xf32> -> vector<8x128xf32>
    %c0_2 = arith.constant 0 : index
    %c0_3 = arith.constant 0 : index
    %5 = vector.load %arg5[%c0_2, %c0_3] : memref<256x256xf32, #tpu.memory_space<vmem>>, vector<8x128xf32>
    tpu.vector_store %arg5[%c0_2, %c0_3], %4 {strides = array<i32>} : memref<256x256xf32, #tpu.memory_space<vmem>>, vector<8x128xf32>,
    %6 = vector.extract_strided_slice %1 {offsets = [0, 2], sizes = [4, 128], strides = [1, 1]} : vector<4x256xf32> to vector<4x128xf32>
    %7 = vector.extract_strided_slice %1 {offsets = [0, 3], sizes = [4, 128], strides = [1, 1]} : vector<4x256xf32> to vector<4x128xf32>
    %8 = tpu.concatenate %6, %7 in 0 : vector<4x128xf32>, vector<4x128xf32> -> vector<8x128xf32>
    %c8 = arith.constant 8 : index
    %c0_4 = arith.constant 0 : index
    %9 = vector.load %arg5[%c8, %c0_4] : memref<256x256xf32, #tpu.memory_space<vmem>>, vector<8x128xf32>
    tpu.vector_store %arg5[%c8, %c0_4], %8 {strides = array<i32>} : memref<256x256xf32, #tpu.memory_space<vmem>>, vector<8x128xf32>,
    %10 = vector.extract_strided_slice %1 {offsets = [0, 4], sizes = [4, 128], strides = [1, 1]} : vector<4x256xf32> to vector<4x128xf32>
    %11 = vector.extract_strided_slice %1 {offsets = [0, 5], sizes = [4, 128], strides = [1, 1]} : vector<4x256xf32> to vector<4x128xf32>
    %12 = tpu.concatenate %10, %11 in 0 : vector<4x128xf32>, vector<4x128xf32> -> vector<8x128xf32>
    %c16 = arith.constant 16 : index
    %c0_5 = arith.constant 0 : index
    %13 = vector.load %arg5[%c16, %c0_5] : memref<256x256xf32, #tpu.memory_space<vmem>>, vector<8x128xf32>
    tpu.vector_store %arg5[%c16, %c0_5], %12 {strides = array<i32>} : memref<256x256xf32, #tpu.memory_space<vmem>>, vector<8x128xf32>,
    %14 = vector.extract_strided_slice %1 {offsets = [0, 6], sizes = [4, 128], strides = [1, 1]} : vector<4x256xf32> to vector<4x128xf32>
    %15 = vector.extract_strided_slice %1 {offsets = [0, 7], sizes = [4, 128], strides = [1, 1]} : vector<4x256xf32> to vector<4x128xf32>
    %16 = tpu.concatenate %14, %15 in 0 : vector<4x128xf32>, vector<4x128xf32> -> vector<8x128xf32>
    %c24 = arith.constant 24 : index
    %c0_6 = arith.constant 0 : index
    %17 = vector.load %arg5[%c24, %c0_6] : memref<256x256xf32, #tpu.memory_space<vmem>>, vector<8x128xf32>
    tpu.vector_store %arg5[%c24, %c0_6], %16 {strides = array<i32>} : memref<256x256xf32, #tpu.memory_space<vmem>>, vector<8x128xf32>,
    %18 = vector.extract_strided_slice %1 {offsets = [0, 8], sizes = [4, 128], strides = [1, 1]} : vector<4x256xf32> to vector<4x128xf32>
    %19 = vector.extract_strided_slice %1 {offsets = [0, 9], sizes = [4, 128], strides = [1, 1]} : vector<4x256xf32> to vector<4x128xf32>
    %20 = tpu.concatenate %18, %19 in 0 : vector<4x128xf32>, vector<4x128xf32> -> vector<8x128xf32>
    %c32 = arith.constant 32 : index
    %c0_7 = arith.constant 0 : index
    %21 = vector.load %arg5[%c32, %c0_7] : memref<256x256xf32, #tpu.memory_space<vmem>>, vector<8x128xf32>
    tpu.vector_store %arg5[%c32, %c0_7], %20 {strides = array<i32>} : memref<256x256xf32, #tpu.memory_space<vmem>>, vector<8x128xf32>,
    %22 = vector.extract_strided_slice %1 {offsets = [0, 10], sizes = [4, 128], strides = [1, 1]} : vector<4x256xf32> to vector<4x128xf32>
    %23 = vector.extract_strided_slice %1 {offsets = [0, 11], sizes = [4, 128], strides = [1, 1]} : vector<4x256xf32> to vector<4x128xf32>
    %24 = tpu.concatenate %22, %23 in 0 : vector<4x128xf32>, vector<4x128xf32> -> vector<8x128xf32>
    %c40 = arith.constant 40 : index
    %c0_8 = arith.constant 0 : index
    %25 = vector.load %arg5[%c40, %c0_8] : memref<256x256xf32, #tpu.memory_space<vmem>>, vector<8x128xf32>
    tpu.vector_store %arg5[%c40, %c0_8], %24 {strides = array<i32>} : memref<256x256xf32, #tpu.memory_space<vmem>>, vector<8x128xf32>,
    %26 = vector.extract_strided_slice %1 {offsets = [0, 12], sizes = [4, 128], strides = [1, 1]} : vector<4x256xf32> to vector<4x128xf32>
    %27 = vector.extract_strided_slice %1 {offsets = [0, 13], sizes = [4, 128], strides = [1, 1]} : vector<4x256xf32> to vector<4x128xf32>
    %28 = tpu.concatenate %26, %27 in 0 : vector<4x128xf32>, vector<4x128xf32> -> vector<8x128xf32>
    %c48 = arith.constant 48 : index
    %c0_9 = arith.constant 0 : index
    %29 = vector.load %arg5[%c48, %c0_9] : memref<256x256xf32, #tpu.memory_space<vmem>>, vector<8x128xf32>
    tpu.vector_store %arg5[%c48, %c0_9], %28 {strides = array<i32>} : memref<256x256xf32, #tpu.memory_space<vmem>>, vector<8x128xf32>,
    %30 = vector.extract_strided_slice %1 {offsets = [0, 14], sizes = [4, 128], strides = [1, 1]} : vector<4x256xf32> to vector<4x128xf32>
    %31 = vector.extract_strided_slice %1 {offsets = [0, 15], sizes = [4, 128], strides = [1, 1]} : vector<4x256xf32> to vector<4x128xf32>
    %32 = tpu.concatenate %30, %31 in 0 : vector<4x128xf32>, vector<4x128xf32> -> vector<8x128xf32>
    %c56 = arith.constant 56 : index
    %c0_10 = arith.constant 0 : index
    %33 = vector.load %arg5[%c56, %c0_10] : memref<256x256xf32, #tpu.memory_space<vmem>>, vector<8x128xf32>
    tpu.vector_store %arg5[%c56, %c0_10], %32 {strides = array<i32>} : memref<256x256xf32, #tpu.memory_space<vmem>>, vector<8x128xf32>,
    %34 = vector.extract_strided_slice %1 {offsets = [0, 16], sizes = [4, 128], strides = [1, 1]} : vector<4x256xf32> to vector<4x128xf32>
    %35 = vector.extract_strided_slice %1 {offsets = [0, 17], sizes = [4, 128], strides = [1, 1]} : vector<4x256xf32> to vector<4x128xf32>
    %36 = tpu.concatenate %34, %35 in 0 : vector<4x128xf32>, vector<4x128xf32> -> vector<8x128xf32>
    %c64 = arith.constant 64 : index
    %c0_11 = arith.constant 0 : index
    %37 = vector.load %arg5[%c64, %c0_11] : memref<256x256xf32, #tpu.memory_space<vmem>>, vector<8x128xf32>
    tpu.vector_store %arg5[%c64, %c0_11], %36 {strides = array<i32>} : memref<256x256xf32, #tpu.memory_space<vmem>>, vector<8x128xf32>,
    %38 = vector.extract_strided_slice %1 {offsets = [0, 18], sizes = [4, 128], strides = [1, 1]} : vector<4x256xf32> to vector<4x128xf32>
    %39 = vector.extract_strided_slice %1 {offsets = [0, 19], sizes = [4, 128], strides = [1, 1]} : vector<4x256xf32> to vector<4x128xf32>
    %40 = tpu.concatenate %38, %39 in 0 : vector<4x128xf32>, vector<4x128xf32> -> vector<8x128xf32>
    %c72 = arith.constant 72 : index
    %c0_12 = arith.constant 0 : index
    %41 = vector.load %arg5[%c72, %c0_12] : memref<256x256xf32, #tpu.memory_space<vmem>>, vector<8x128xf32>
    tpu.vector_store %arg5[%c72, %c0_12], %40 {strides = array<i32>} : memref<256x256xf32, #tpu.memory_space<vmem>>, vector<8x128xf32>,
    %42 = vector.extract_strided_slice %1 {offsets = [0, 20], sizes = [4, 128], strides = [1, 1]} : vector<4x256xf32> to vector<4x128xf32>
    %43 = vector.extract_strided_slice %1 {offsets = [0, 21], sizes = [4, 128], strides = [1, 1]} : vector<4x256xf32> to vector<4x128xf32>
    %44 = tpu.concatenate %42, %43 in 0 : vector<4x128xf32>, vector<4x128xf32> -> vector<8x128xf32>
    %c80 = arith.constant 80 : index
    %c0_13 = arith.constant 0 : index
    %45 = vector.load %arg5[%c80, %c0_13] : memref<256x256xf32, #tpu.memory_space<vmem>>, vector<8x128xf32>
    tpu.vector_store %arg5[%c80, %c0_13], %44 {strides = array<i32>} : memref<256x256xf32, #tpu.memory_space<vmem>>, vector<8x128xf32>,
    %46 = vector.extract_strided_slice %1 {offsets = [0, 22], sizes = [4, 128], strides = [1, 1]} : vector<4x256xf32> to vector<4x128xf32>
    %47 = vector.extract_strided_slice %1 {offsets = [0, 23], sizes = [4, 128], strides = [1, 1]} : vector<4x256xf32> to vector<4x128xf32>
    %48 = tpu.concatenate %46, %47 in 0 : vector<4x128xf32>, vector<4x128xf32> -> vector<8x128xf32>
    %c88 = arith.constant 88 : index
    %c0_14 = arith.constant 0 : index
    %49 = vector.load %arg5[%c88, %c0_14] : memref<256x256xf32, #tpu.memory_space<vmem>>, vector<8x128xf32>
    tpu.vector_store %arg5[%c88, %c0_14], %48 {strides = array<i32>} : memref<256x256xf32, #tpu.memory_space<vmem>>, vector<8x128xf32>,
    %50 = vector.extract_strided_slice %1 {offsets = [0, 24], sizes = [4, 128], strides = [1, 1]} : vector<4x256xf32> to vector<4x128xf32>
    %51 = vector.extract_strided_slice %1 {offsets = [0, 25], sizes = [4, 128], strides = [1, 1]} : vector<4x256xf32> to vector<4x128xf32>
    %52 = tpu.concatenate %50, %51 in 0 : vector<4x128xf32>, vector<4x128xf32> -> vector<8x128xf32>
    %c96 = arith.constant 96 : index
    %c0_15 = arith.constant 0 : index
    %53 = vector.load %arg5[%c96, %c0_15] : memref<256x256xf32, #tpu.memory_space<vmem>>, vector<8x128xf32>
    tpu.vector_store %arg5[%c96, %c0_15], %52 {strides = array<i32>} : memref<256x256xf32, #tpu.memory_space<vmem>>, vector<8x128xf32>,
    %54 = vector.extract_strided_slice %1 {offsets = [0, 26], sizes = [4, 128], strides = [1, 1]} : vector<4x256xf32> to vector<4x128xf32>
    %55 = vector.extract_strided_slice %1 {offsets = [0, 27], sizes = [4, 128], strides = [1, 1]} : vector<4x256xf32> to vector<4x128xf32>
    %56 = tpu.concatenate %54, %55 in 0 : vector<4x128xf32>, vector<4x128xf32> -> vector<8x128xf32>
    %c104 = arith.constant 104 : index
    %c0_16 = arith.constant 0 : index
    %57 = vector.load %arg5[%c104, %c0_16] : memref<256x256xf32, #tpu.memory_space<vmem>>, vector<8x128xf32>
    tpu.vector_store %arg5[%c104, %c0_16], %56 {strides = array<i32>} : memref<256x256xf32, #tpu.memory_space<vmem>>, vector<8x128xf32>,
    %58 = vector.extract_strided_slice %1 {offsets = [0, 28], sizes = [4, 128], strides = [1, 1]} : vector<4x256xf32> to vector<4x128xf32>
    %59 = vector.extract_strided_slice %1 {offsets = [0, 29], sizes = [4, 128], strides = [1, 1]} : vector<4x256xf32> to vector<4x128xf32>
    %60 = tpu.concatenate %58, %59 in 0 : vector<4x128xf32>, vector<4x128xf32> -> vector<8x128xf32>
    %c112 = arith.constant 112 : index
    %c0_17 = arith.constant 0 : index
    %61 = vector.load %arg5[%c112, %c0_17] : memref<256x256xf32, #tpu.memory_space<vmem>>, vector<8x128xf32>
    tpu.vector_store %arg5[%c112, %c0_17], %60 {strides = array<i32>} : memref<256x256xf32, #tpu.memory_space<vmem>>, vector<8x128xf32>,
    %62 = vector.extract_strided_slice %1 {offsets = [0, 30], sizes = [4, 128], strides = [1, 1]} : vector<4x256xf32> to vector<4x128xf32>
    %63 = vector.extract_strided_slice %1 {offsets = [0, 31], sizes = [4, 128], strides = [1, 1]} : vector<4x256xf32> to vector<4x128xf32>
    %64 = tpu.concatenate %62, %63 in 0 : vector<4x128xf32>, vector<4x128xf32> -> vector<8x128xf32>
    %c120 = arith.constant 120 : index
    %c0_18 = arith.constant 0 : index
    %65 = vector.load %arg5[%c120, %c0_18] : memref<256x256xf32, #tpu.memory_space<vmem>>, vector<8x128xf32>
    tpu.vector_store %arg5[%c120, %c0_18], %64 {strides = array<i32>} : memref<256x256xf32, #tpu.memory_space<vmem>>, vector<8x128xf32>,
    %66 = vector.extract_strided_slice %1 {offsets = [0, 32], sizes = [4, 128], strides = [1, 1]} : vector<4x256xf32> to vector<4x128xf32>
    %67 = vector.extract_strided_slice %1 {offsets = [0, 33], sizes = [4, 128], strides = [1, 1]} : vector<4x256xf32> to vector<4x128xf32>
    %68 = tpu.concatenate %66, %67 in 0 : vector<4x128xf32>, vector<4x128xf32> -> vector<8x128xf32>
    %c128 = arith.constant 128 : index
    %c0_19 = arith.constant 0 : index
    %69 = vector.load %arg5[%c128, %c0_19] : memref<256x256xf32, #tpu.memory_space<vmem>>, vector<8x128xf32>
    tpu.vector_store %arg5[%c128, %c0_19], %68 {strides = array<i32>} : memref<256x256xf32, #tpu.memory_space<vmem>>, vector<8x128xf32>,
    %70 = vector.extract_strided_slice %1 {offsets = [0, 34], sizes = [4, 128], strides = [1, 1]} : vector<4x256xf32> to vector<4x128xf32>
    %71 = vector.extract_strided_slice %1 {offsets = [0, 35], sizes = [4, 128], strides = [1, 1]} : vector<4x256xf32> to vector<4x128xf32>
    %72 = tpu.concatenate %70, %71 in 0 : vector<4x128xf32>, vector<4x128xf32> -> vector<8x128xf32>
    %c136 = arith.constant 136 : index
    %c0_20 = arith.constant 0 : index
    %73 = vector.load %arg5[%c136, %c0_20] : memref<256x256xf32, #tpu.memory_space<vmem>>, vector<8x128xf32>
    tpu.vector_store %arg5[%c136, %c0_20], %72 {strides = array<i32>} : memref<256x256xf32, #tpu.memory_space<vmem>>, vector<8x128xf32>,
    %74 = vector.extract_strided_slice %1 {offsets = [0, 36], sizes = [4, 128], strides = [1, 1]} : vector<4x256xf32> to vector<4x128xf32>
    %75 = vector.extract_strided_slice %1 {offsets = [0, 37], sizes = [4, 128], strides = [1, 1]} : vector<4x256xf32> to vector<4x128xf32>
    %76 = tpu.concatenate %74, %75 in 0 : vector<4x128xf32>, vector<4x128xf32> -> vector<8x128xf32>
    %c144 = arith.constant 144 : index
    %c0_21 = arith.constant 0 : index
    %77 = vector.load %arg5[%c144, %c0_21] : memref<256x256xf32, #tpu.memory_space<vmem>>, vector<8x128xf32>
    tpu.vector_store %arg5[%c144, %c0_21], %76 {strides = array<i32>} : memref<256x256xf32, #tpu.memory_space<vmem>>, vector<8x128xf32>,
    %78 = vector.extract_strided_slice %1 {offsets = [0, 38], sizes = [4, 128], strides = [1, 1]} : vector<4x256xf32> to vector<4x128xf32>
    %79 = vector.extract_strided_slice %1 {offsets = [0, 39], sizes = [4, 128], strides = [1, 1]} : vector<4x256xf32> to vector<4x128xf32>
    %80 = tpu.concatenate %78, %79 in 0 : vector<4x128xf32>, vector<4x128xf32> -> vector<8x128xf32>
    %c152 = arith.constant 152 : index
    %c0_22 = arith.constant 0 : index
    %81 = vector.load %arg5[%c152, %c0_22] : memref<256x256xf32, #tpu.memory_space<vmem>>, vector<8x128xf32>
    tpu.vector_store %arg5[%c152, %c0_22], %80 {strides = array<i32>} : memref<256x256xf32, #tpu.memory_space<vmem>>, vector<8x128xf32>,
    %82 = vector.extract_strided_slice %1 {offsets = [0, 40], sizes = [4, 128], strides = [1, 1]} : vector<4x256xf32> to vector<4x128xf32>
    %83 = vector.extract_strided_slice %1 {offsets = [0, 41], sizes = [4, 128], strides = [1, 1]} : vector<4x256xf32> to vector<4x128xf32>
    %84 = tpu.concatenate %82, %83 in 0 : vector<4x128xf32>, vector<4x128xf32> -> vector<8x128xf32>
    %c160 = arith.constant 160 : index
    %c0_23 = arith.constant 0 : index
    %85 = vector.load %arg5[%c160, %c0_23] : memref<256x256xf32, #tpu.memory_space<vmem>>, vector<8x128xf32>
    tpu.vector_store %arg5[%c160, %c0_23], %84 {strides = array<i32>} : memref<256x256xf32, #tpu.memory_space<vmem>>, vector<8x128xf32>,
    %86 = vector.extract_strided_slice %1 {offsets = [0, 42], sizes = [4, 128], strides = [1, 1]} : vector<4x256xf32> to vector<4x128xf32>
    %87 = vector.extract_strided_slice %1 {offsets = [0, 43], sizes = [4, 128], strides = [1, 1]} : vector<4x256xf32> to vector<4x128xf32>
    %88 = tpu.concatenate %86, %87 in 0 : vector<4x128xf32>, vector<4x128xf32> -> vector<8x128xf32>
    %c168 = arith.constant 168 : index
    %c0_24 = arith.constant 0 : index
    %89 = vector.load %arg5[%c168, %c0_24] : memref<256x256xf32, #tpu.memory_space<vmem>>, vector<8x128xf32>
    tpu.vector_store %arg5[%c168, %c0_24], %88 {strides = array<i32>} : memref<256x256xf32, #tpu.memory_space<vmem>>, vector<8x128xf32>,
    %90 = vector.extract_strided_slice %1 {offsets = [0, 44], sizes = [4, 128], strides = [1, 1]} : vector<4x256xf32> to vector<4x128xf32>
    %91 = vector.extract_strided_slice %1 {offsets = [0, 45], sizes = [4, 128], strides = [1, 1]} : vector<4x256xf32> to vector<4x128xf32>
    %92 = tpu.concatenate %90, %91 in 0 : vector<4x128xf32>, vector<4x128xf32> -> vector<8x128xf32>
    %c176 = arith.constant 176 : index
    %c0_25 = arith.constant 0 : index
    %93 = vector.load %arg5[%c176, %c0_25] : memref<256x256xf32, #tpu.memory_space<vmem>>, vector<8x128xf32>
    tpu.vector_store %arg5[%c176, %c0_25], %92 {strides = array<i32>} : memref<256x256xf32, #tpu.memory_space<vmem>>, vector<8x128xf32>,
    %94 = vector.extract_strided_slice %1 {offsets = [0, 46], sizes = [4, 128], strides = [1, 1]} : vector<4x256xf32> to vector<4x128xf32>
    %95 = vector.extract_strided_slice %1 {offsets = [0, 47], sizes = [4, 128], strides = [1, 1]} : vector<4x256xf32> to vector<4x128xf32>
    %96 = tpu.concatenate %94, %95 in 0 : vector<4x128xf32>, vector<4x128xf32> -> vector<8x128xf32>
    %c184 = arith.constant 184 : index
    %c0_26 = arith.constant 0 : index
    %97 = vector.load %arg5[%c184, %c0_26] : memref<256x256xf32, #tpu.memory_space<vmem>>, vector<8x128xf32>
    tpu.vector_store %arg5[%c184, %c0_26], %96 {strides = array<i32>} : memref<256x256xf32, #tpu.memory_space<vmem>>, vector<8x128xf32>,
    %98 = vector.extract_strided_slice %1 {offsets = [0, 48], sizes = [4, 128], strides = [1, 1]} : vector<4x256xf32> to vector<4x128xf32>
    %99 = vector.extract_strided_slice %1 {offsets = [0, 49], sizes = [4, 128], strides = [1, 1]} : vector<4x256xf32> to vector<4x128xf32>
    %100 = tpu.concatenate %98, %99 in 0 : vector<4x128xf32>, vector<4x128xf32> -> vector<8x128xf32>
    %c192 = arith.constant 192 : index
    %c0_27 = arith.constant 0 : index
    %101 = vector.load %arg5[%c192, %c0_27] : memref<256x256xf32, #tpu.memory_space<vmem>>, vector<8x128xf32>
    tpu.vector_store %arg5[%c192, %c0_27], %100 {strides = array<i32>} : memref<256x256xf32, #tpu.memory_space<vmem>>, vector<8x128xf32>,
    %102 = vector.extract_strided_slice %1 {offsets = [0, 50], sizes = [4, 128], strides = [1, 1]} : vector<4x256xf32> to vector<4x128xf32>
    %103 = vector.extract_strided_slice %1 {offsets = [0, 51], sizes = [4, 128], strides = [1, 1]} : vector<4x256xf32> to vector<4x128xf32>
    %104 = tpu.concatenate %102, %103 in 0 : vector<4x128xf32>, vector<4x128xf32> -> vector<8x128xf32>
    %c200 = arith.constant 200 : index
    %c0_28 = arith.constant 0 : index
    %105 = vector.load %arg5[%c200, %c0_28] : memref<256x256xf32, #tpu.memory_space<vmem>>, vector<8x128xf32>
    tpu.vector_store %arg5[%c200, %c0_28], %104 {strides = array<i32>} : memref<256x256xf32, #tpu.memory_space<vmem>>, vector<8x128xf32>,
    %106 = vector.extract_strided_slice %1 {offsets = [0, 52], sizes = [4, 128], strides = [1, 1]} : vector<4x256xf32> to vector<4x128xf32>
    %107 = vector.extract_strided_slice %1 {offsets = [0, 53], sizes = [4, 128], strides = [1, 1]} : vector<4x256xf32> to vector<4x128xf32>
    %108 = tpu.concatenate %106, %107 in 0 : vector<4x128xf32>, vector<4x128xf32> -> vector<8x128xf32>
    %c208 = arith.constant 208 : index
    %c0_29 = arith.constant 0 : index
    %109 = vector.load %arg5[%c208, %c0_29] : memref<256x256xf32, #tpu.memory_space<vmem>>, vector<8x128xf32>
    tpu.vector_store %arg5[%c208, %c0_29], %108 {strides = array<i32>} : memref<256x256xf32, #tpu.memory_space<vmem>>, vector<8x128xf32>,
    %110 = vector.extract_strided_slice %1 {offsets = [0, 54], sizes = [4, 128], strides = [1, 1]} : vector<4x256xf32> to vector<4x128xf32>
    %111 = vector.extract_strided_slice %1 {offsets = [0, 55], sizes = [4, 128], strides = [1, 1]} : vector<4x256xf32> to vector<4x128xf32>
    %112 = tpu.concatenate %110, %111 in 0 : vector<4x128xf32>, vector<4x128xf32> -> vector<8x128xf32>
    %c216 = arith.constant 216 : index
    %c0_30 = arith.constant 0 : index
    %113 = vector.load %arg5[%c216, %c0_30] : memref<256x256xf32, #tpu.memory_space<vmem>>, vector<8x128xf32>
    tpu.vector_store %arg5[%c216, %c0_30], %112 {strides = array<i32>} : memref<256x256xf32, #tpu.memory_space<vmem>>, vector<8x128xf32>,
    %114 = vector.extract_strided_slice %1 {offsets = [0, 56], sizes = [4, 128], strides = [1, 1]} : vector<4x256xf32> to vector<4x128xf32>
    %115 = vector.extract_strided_slice %1 {offsets = [0, 57], sizes = [4, 128], strides = [1, 1]} : vector<4x256xf32> to vector<4x128xf32>
    %116 = tpu.concatenate %114, %115 in 0 : vector<4x128xf32>, vector<4x128xf32> -> vector<8x128xf32>
    %c224 = arith.constant 224 : index
    %c0_31 = arith.constant 0 : index
    %117 = vector.load %arg5[%c224, %c0_31] : memref<256x256xf32, #tpu.memory_space<vmem>>, vector<8x128xf32>
    tpu.vector_store %arg5[%c224, %c0_31], %116 {strides = array<i32>} : memref<256x256xf32, #tpu.memory_space<vmem>>, vector<8x128xf32>,
    %118 = vector.extract_strided_slice %1 {offsets = [0, 58], sizes = [4, 128], strides = [1, 1]} : vector<4x256xf32> to vector<4x128xf32>
    %119 = vector.extract_strided_slice %1 {offsets = [0, 59], sizes = [4, 128], strides = [1, 1]} : vector<4x256xf32> to vector<4x128xf32>
    %120 = tpu.concatenate %118, %119 in 0 : vector<4x128xf32>, vector<4x128xf32> -> vector<8x128xf32>
    %c232 = arith.constant 232 : index
    %c0_32 = arith.constant 0 : index
    %121 = vector.load %arg5[%c232, %c0_32] : memref<256x256xf32, #tpu.memory_space<vmem>>, vector<8x128xf32>
    tpu.vector_store %arg5[%c232, %c0_32], %120 {strides = array<i32>} : memref<256x256xf32, #tpu.memory_space<vmem>>, vector<8x128xf32>,
    %122 = vector.extract_strided_slice %1 {offsets = [0, 60], sizes = [4, 128], strides = [1, 1]} : vector<4x256xf32> to vector<4x128xf32>
    %123 = vector.extract_strided_slice %1 {offsets = [0, 61], sizes = [4, 128], strides = [1, 1]} : vector<4x256xf32> to vector<4x128xf32>
    %124 = tpu.concatenate %122, %123 in 0 : vector<4x128xf32>, vector<4x128xf32> -> vector<8x128xf32>
    %c240 = arith.constant 240 : index
    %c0_33 = arith.constant 0 : index
    %125 = vector.load %arg5[%c240, %c0_33] : memref<256x256xf32, #tpu.memory_space<vmem>>, vector<8x128xf32>
    tpu.vector_store %arg5[%c240, %c0_33], %124 {strides = array<i32>} : memref<256x256xf32, #tpu.memory_space<vmem>>, vector<8x128xf32>,
    %126 = vector.extract_strided_slice %1 {offsets = [0, 62], sizes = [4, 128], strides = [1, 1]} : vector<4x256xf32> to vector<4x128xf32>
    %127 = vector.extract_strided_slice %1 {offsets = [0, 63], sizes = [4, 128], strides = [1, 1]} : vector<4x256xf32> to vector<4x128xf32>
    %128 = tpu.concatenate %126, %127 in 0 : vector<4x128xf32>, vector<4x128xf32> -> vector<8x128xf32>
    %c248 = arith.constant 248 : index
    %c0_34 = arith.constant 0 : index
    %129 = vector.load %arg5[%c248, %c0_34] : memref<256x256xf32, #tpu.memory_space<vmem>>, vector<8x128xf32>
    tpu.vector_store %arg5[%c248, %c0_34], %128 {strides = array<i32>} : memref<256x256xf32, #tpu.memory_space<vmem>>, vector<8x128xf32>,
    %c1 = arith.constant 1 : index
    %c0_35 = arith.constant 0 : index
    %c0_36 = arith.constant 0 : index
    %130 = vector.load %arg1[%c1, %c0_35, %c0_36] : memref<2x4x256xf32, #tpu.memory_space<vmem>>, vector<1x4x256xf32>
    %131 = vector.shape_cast %130 : vector<1x4x256xf32> to vector<4x256xf32>
    %132 = vector.extract_strided_slice %131 {offsets = [0, 0], sizes = [4, 128], strides = [1, 1]} : vector<4x256xf32> to vector<4x128xf32>
    %133 = vector.extract_strided_slice %131 {offsets = [0, 1], sizes = [4, 128], strides = [1, 1]} : vector<4x256xf32> to vector<4x128xf32>
    %134 = tpu.concatenate %132, %133 in 0 : vector<4x128xf32>, vector<4x128xf32> -> vector<8x128xf32>
    %c0_37 = arith.constant 0 : index
    %c128_38 = arith.constant 128 : index
    %135 = vector.load %arg5[%c0_37, %c128_38] : memref<256x256xf32, #tpu.memory_space<vmem>>, vector<8x128xf32>
    tpu.vector_store %arg5[%c0_37, %c128_38], %134 {strides = array<i32>} : memref<256x256xf32, #tpu.memory_space<vmem>>, vector<8x128xf32>,
    %136 = vector.extract_strided_slice %131 {offsets = [0, 2], sizes = [4, 128], strides = [1, 1]} : vector<4x256xf32> to vector<4x128xf32>
    %137 = vector.extract_strided_slice %131 {offsets = [0, 3], sizes = [4, 128], strides = [1, 1]} : vector<4x256xf32> to vector<4x128xf32>
    %138 = tpu.concatenate %136, %137 in 0 : vector<4x128xf32>, vector<4x128xf32> -> vector<8x128xf32>
    %c8_39 = arith.constant 8 : index
    %c128_40 = arith.constant 128 : index
    %139 = vector.load %arg5[%c8_39, %c128_40] : memref<256x256xf32, #tpu.memory_space<vmem>>, vector<8x128xf32>
    tpu.vector_store %arg5[%c8_39, %c128_40], %138 {strides = array<i32>} : memref<256x256xf32, #tpu.memory_space<vmem>>, vector<8x128xf32>,
    %140 = vector.extract_strided_slice %131 {offsets = [0, 4], sizes = [4, 128], strides = [1, 1]} : vector<4x256xf32> to vector<4x128xf32>
    %141 = vector.extract_strided_slice %131 {offsets = [0, 5], sizes = [4, 128], strides = [1, 1]} : vector<4x256xf32> to vector<4x128xf32>
    %142 = tpu.concatenate %140, %141 in 0 : vector<4x128xf32>, vector<4x128xf32> -> vector<8x128xf32>
    %c16_41 = arith.constant 16 : index
    %c128_42 = arith.constant 128 : index
    %143 = vector.load %arg5[%c16_41, %c128_42] : memref<256x256xf32, #tpu.memory_space<vmem>>, vector<8x128xf32>
    tpu.vector_store %arg5[%c16_41, %c128_42], %142 {strides = array<i32>} : memref<256x256xf32, #tpu.memory_space<vmem>>, vector<8x128xf32>,
    %144 = vector.extract_strided_slice %131 {offsets = [0, 6], sizes = [4, 128], strides = [1, 1]} : vector<4x256xf32> to vector<4x128xf32>
    %145 = vector.extract_strided_slice %131 {offsets = [0, 7], sizes = [4, 128], strides = [1, 1]} : vector<4x256xf32> to vector<4x128xf32>
    %146 = tpu.concatenate %144, %145 in 0 : vector<4x128xf32>, vector<4x128xf32> -> vector<8x128xf32>
    %c24_43 = arith.constant 24 : index
    %c128_44 = arith.constant 128 : index
    %147 = vector.load %arg5[%c24_43, %c128_44] : memref<256x256xf32, #tpu.memory_space<vmem>>, vector<8x128xf32>
    tpu.vector_store %arg5[%c24_43, %c128_44], %146 {strides = array<i32>} : memref<256x256xf32, #tpu.memory_space<vmem>>, vector<8x128xf32>,
    %148 = vector.extract_strided_slice %131 {offsets = [0, 8], sizes = [4, 128], strides = [1, 1]} : vector<4x256xf32> to vector<4x128xf32>
    %149 = vector.extract_strided_slice %131 {offsets = [0, 9], sizes = [4, 128], strides = [1, 1]} : vector<4x256xf32> to vector<4x128xf32>
    %150 = tpu.concatenate %148, %149 in 0 : vector<4x128xf32>, vector<4x128xf32> -> vector<8x128xf32>
    %c32_45 = arith.constant 32 : index
    %c128_46 = arith.constant 128 : index
    %151 = vector.load %arg5[%c32_45, %c128_46] : memref<256x256xf32, #tpu.memory_space<vmem>>, vector<8x128xf32>
    tpu.vector_store %arg5[%c32_45, %c128_46], %150 {strides = array<i32>} : memref<256x256xf32, #tpu.memory_space<vmem>>, vector<8x128xf32>,
    %152 = vector.extract_strided_slice %131 {offsets = [0, 10], sizes = [4, 128], strides = [1, 1]} : vector<4x256xf32> to vector<4x128xf32>
    %153 = vector.extract_strided_slice %131 {offsets = [0, 11], sizes = [4, 128], strides = [1, 1]} : vector<4x256xf32> to vector<4x128xf32>
    %154 = tpu.concatenate %152, %153 in 0 : vector<4x128xf32>, vector<4x128xf32> -> vector<8x128xf32>
    %c40_47 = arith.constant 40 : index
    %c128_48 = arith.constant 128 : index
    %155 = vector.load %arg5[%c40_47, %c128_48] : memref<256x256xf32, #tpu.memory_space<vmem>>, vector<8x128xf32>
    tpu.vector_store %arg5[%c40_47, %c128_48], %154 {strides = array<i32>} : memref<256x256xf32, #tpu.memory_space<vmem>>, vector<8x128xf32>,
    %156 = vector.extract_strided_slice %131 {offsets = [0, 12], sizes = [4, 128], strides = [1, 1]} : vector<4x256xf32> to vector<4x128xf32>
    %157 = vector.extract_strided_slice %131 {offsets = [0, 13], sizes = [4, 128], strides = [1, 1]} : vector<4x256xf32> to vector<4x128xf32>
    %158 = tpu.concatenate %156, %157 in 0 : vector<4x128xf32>, vector<4x128xf32> -> vector<8x128xf32>
    %c48_49 = arith.constant 48 : index
    %c128_50 = arith.constant 128 : index
    %159 = vector.load %arg5[%c48_49, %c128_50] : memref<256x256xf32, #tpu.memory_space<vmem>>, vector<8x128xf32>
    tpu.vector_store %arg5[%c48_49, %c128_50], %158 {strides = array<i32>} : memref<256x256xf32, #tpu.memory_space<vmem>>, vector<8x128xf32>,
    %160 = vector.extract_strided_slice %131 {offsets = [0, 14], sizes = [4, 128], strides = [1, 1]} : vector<4x256xf32> to vector<4x128xf32>
    %161 = vector.extract_strided_slice %131 {offsets = [0, 15], sizes = [4, 128], strides = [1, 1]} : vector<4x256xf32> to vector<4x128xf32>
    %162 = tpu.concatenate %160, %161 in 0 : vector<4x128xf32>, vector<4x128xf32> -> vector<8x128xf32>
    %c56_51 = arith.constant 56 : index
    %c128_52 = arith.constant 128 : index
    %163 = vector.load %arg5[%c56_51, %c128_52] : memref<256x256xf32, #tpu.memory_space<vmem>>, vector<8x128xf32>
    tpu.vector_store %arg5[%c56_51, %c128_52], %162 {strides = array<i32>} : memref<256x256xf32, #tpu.memory_space<vmem>>, vector<8x128xf32>,
    %164 = vector.extract_strided_slice %131 {offsets = [0, 16], sizes = [4, 128], strides = [1, 1]} : vector<4x256xf32> to vector<4x128xf32>
    %165 = vector.extract_strided_slice %131 {offsets = [0, 17], sizes = [4, 128], strides = [1, 1]} : vector<4x256xf32> to vector<4x128xf32>
    %166 = tpu.concatenate %164, %165 in 0 : vector<4x128xf32>, vector<4x128xf32> -> vector<8x128xf32>
    %c64_53 = arith.constant 64 : index
    %c128_54 = arith.constant 128 : index
    %167 = vector.load %arg5[%c64_53, %c128_54] : memref<256x256xf32, #tpu.memory_space<vmem>>, vector<8x128xf32>
    tpu.vector_store %arg5[%c64_53, %c128_54], %166 {strides = array<i32>} : memref<256x256xf32, #tpu.memory_space<vmem>>, vector<8x128xf32>,
    %168 = vector.extract_strided_slice %131 {offsets = [0, 18], sizes = [4, 128], strides = [1, 1]} : vector<4x256xf32> to vector<4x128xf32>
    %169 = vector.extract_strided_slice %131 {offsets = [0, 19], sizes = [4, 128], strides = [1, 1]} : vector<4x256xf32> to vector<4x128xf32>
    %170 = tpu.concatenate %168, %169 in 0 : vector<4x128xf32>, vector<4x128xf32> -> vector<8x128xf32>
    %c72_55 = arith.constant 72 : index
    %c128_56 = arith.constant 128 : index
    %171 = vector.load %arg5[%c72_55, %c128_56] : memref<256x256xf32, #tpu.memory_space<vmem>>, vector<8x128xf32>
    tpu.vector_store %arg5[%c72_55, %c128_56], %170 {strides = array<i32>} : memref<256x256xf32, #tpu.memory_space<vmem>>, vector<8x128xf32>,
    %172 = vector.extract_strided_slice %131 {offsets = [0, 20], sizes = [4, 128], strides = [1, 1]} : vector<4x256xf32> to vector<4x128xf32>
    %173 = vector.extract_strided_slice %131 {offsets = [0, 21], sizes = [4, 128], strides = [1, 1]} : vector<4x256xf32> to vector<4x128xf32>
    %174 = tpu.concatenate %172, %173 in 0 : vector<4x128xf32>, vector<4x128xf32> -> vector<8x128xf32>
    %c80_57 = arith.constant 80 : index
    %c128_58 = arith.constant 128 : index
    %175 = vector.load %arg5[%c80_57, %c128_58] : memref<256x256xf32, #tpu.memory_space<vmem>>, vector<8x128xf32>
    tpu.vector_store %arg5[%c80_57, %c128_58], %174 {strides = array<i32>} : memref<256x256xf32, #tpu.memory_space<vmem>>, vector<8x128xf32>,
    %176 = vector.extract_strided_slice %131 {offsets = [0, 22], sizes = [4, 128], strides = [1, 1]} : vector<4x256xf32> to vector<4x128xf32>
    %177 = vector.extract_strided_slice %131 {offsets = [0, 23], sizes = [4, 128], strides = [1, 1]} : vector<4x256xf32> to vector<4x128xf32>
    %178 = tpu.concatenate %176, %177 in 0 : vector<4x128xf32>, vector<4x128xf32> -> vector<8x128xf32>
    %c88_59 = arith.constant 88 : index
    %c128_60 = arith.constant 128 : index
    %179 = vector.load %arg5[%c88_59, %c128_60] : memref<256x256xf32, #tpu.memory_space<vmem>>, vector<8x128xf32>
    tpu.vector_store %arg5[%c88_59, %c128_60], %178 {strides = array<i32>} : memref<256x256xf32, #tpu.memory_space<vmem>>, vector<8x128xf32>,
    %180 = vector.extract_strided_slice %131 {offsets = [0, 24], sizes = [4, 128], strides = [1, 1]} : vector<4x256xf32> to vector<4x128xf32>
    %181 = vector.extract_strided_slice %131 {offsets = [0, 25], sizes = [4, 128], strides = [1, 1]} : vector<4x256xf32> to vector<4x128xf32>
    %182 = tpu.concatenate %180, %181 in 0 : vector<4x128xf32>, vector<4x128xf32> -> vector<8x128xf32>
    %c96_61 = arith.constant 96 : index
    %c128_62 = arith.constant 128 : index
    %183 = vector.load %arg5[%c96_61, %c128_62] : memref<256x256xf32, #tpu.memory_space<vmem>>, vector<8x128xf32>
    tpu.vector_store %arg5[%c96_61, %c128_62], %182 {strides = array<i32>} : memref<256x256xf32, #tpu.memory_space<vmem>>, vector<8x128xf32>,
    %184 = vector.extract_strided_slice %131 {offsets = [0, 26], sizes = [4, 128], strides = [1, 1]} : vector<4x256xf32> to vector<4x128xf32>
    %185 = vector.extract_strided_slice %131 {offsets = [0, 27], sizes = [4, 128], strides = [1, 1]} : vector<4x256xf32> to vector<4x128xf32>
    %186 = tpu.concatenate %184, %185 in 0 : vector<4x128xf32>, vector<4x128xf32> -> vector<8x128xf32>
    %c104_63 = arith.constant 104 : index
    %c128_64 = arith.constant 128 : index
    %187 = vector.load %arg5[%c104_63, %c128_64] : memref<256x256xf32, #tpu.memory_space<vmem>>, vector<8x128xf32>
    tpu.vector_store %arg5[%c104_63, %c128_64], %186 {strides = array<i32>} : memref<256x256xf32, #tpu.memory_space<vmem>>, vector<8x128xf32>,
    %188 = vector.extract_strided_slice %131 {offsets = [0, 28], sizes = [4, 128], strides = [1, 1]} : vector<4x256xf32> to vector<4x128xf32>
    %189 = vector.extract_strided_slice %131 {offsets = [0, 29], sizes = [4, 128], strides = [1, 1]} : vector<4x256xf32> to vector<4x128xf32>
    %190 = tpu.concatenate %188, %189 in 0 : vector<4x128xf32>, vector<4x128xf32> -> vector<8x128xf32>
    %c112_65 = arith.constant 112 : index
    %c128_66 = arith.constant 128 : index
    %191 = vector.load %arg5[%c112_65, %c128_66] : memref<256x256xf32, #tpu.memory_space<vmem>>, vector<8x128xf32>
    tpu.vector_store %arg5[%c112_65, %c128_66], %190 {strides = array<i32>} : memref<256x256xf32, #tpu.memory_space<vmem>>, vector<8x128xf32>,
    %192 = vector.extract_strided_slice %131 {offsets = [0, 30], sizes = [4, 128], strides = [1, 1]} : vector<4x256xf32> to vector<4x128xf32>
    %193 = vector.extract_strided_slice %131 {offsets = [0, 31], sizes = [4, 128], strides = [1, 1]} : vector<4x256xf32> to vector<4x128xf32>
    %194 = tpu.concatenate %192, %193 in 0 : vector<4x128xf32>, vector<4x128xf32> -> vector<8x128xf32>
    %c120_67 = arith.constant 120 : index
    %c128_68 = arith.constant 128 : index
    %195 = vector.load %arg5[%c120_67, %c128_68] : memref<256x256xf32, #tpu.memory_space<vmem>>, vector<8x128xf32>
    tpu.vector_store %arg5[%c120_67, %c128_68], %194 {strides = array<i32>} : memref<256x256xf32, #tpu.memory_space<vmem>>, vector<8x128xf32>,
    %196 = vector.extract_strided_slice %131 {offsets = [0, 32], sizes = [4, 128], strides = [1, 1]} : vector<4x256xf32> to vector<4x128xf32>
    %197 = vector.extract_strided_slice %131 {offsets = [0, 33], sizes = [4, 128], strides = [1, 1]} : vector<4x256xf32> to vector<4x128xf32>
    %198 = tpu.concatenate %196, %197 in 0 : vector<4x128xf32>, vector<4x128xf32> -> vector<8x128xf32>
    %c128_69 = arith.constant 128 : index
    %c128_70 = arith.constant 128 : index
    %199 = vector.load %arg5[%c128_69, %c128_70] : memref<256x256xf32, #tpu.memory_space<vmem>>, vector<8x128xf32>
    tpu.vector_store %arg5[%c128_69, %c128_70], %198 {strides = array<i32>} : memref<256x256xf32, #tpu.memory_space<vmem>>, vector<8x128xf32>,
    %200 = vector.extract_strided_slice %131 {offsets = [0, 34], sizes = [4, 128], strides = [1, 1]} : vector<4x256xf32> to vector<4x128xf32>
    %201 = vector.extract_strided_slice %131 {offsets = [0, 35], sizes = [4, 128], strides = [1, 1]} : vector<4x256xf32> to vector<4x128xf32>
    %202 = tpu.concatenate %200, %201 in 0 : vector<4x128xf32>, vector<4x128xf32> -> vector<8x128xf32>
    %c136_71 = arith.constant 136 : index
    %c128_72 = arith.constant 128 : index
    %203 = vector.load %arg5[%c136_71, %c128_72] : memref<256x256xf32, #tpu.memory_space<vmem>>, vector<8x128xf32>
    tpu.vector_store %arg5[%c136_71, %c128_72], %202 {strides = array<i32>} : memref<256x256xf32, #tpu.memory_space<vmem>>, vector<8x128xf32>,
    %204 = vector.extract_strided_slice %131 {offsets = [0, 36], sizes = [4, 128], strides = [1, 1]} : vector<4x256xf32> to vector<4x128xf32>
    %205 = vector.extract_strided_slice %131 {offsets = [0, 37], sizes = [4, 128], strides = [1, 1]} : vector<4x256xf32> to vector<4x128xf32>
    %206 = tpu.concatenate %204, %205 in 0 : vector<4x128xf32>, vector<4x128xf32> -> vector<8x128xf32>
    %c144_73 = arith.constant 144 : index
    %c128_74 = arith.constant 128 : index
    %207 = vector.load %arg5[%c144_73, %c128_74] : memref<256x256xf32, #tpu.memory_space<vmem>>, vector<8x128xf32>
    tpu.vector_store %arg5[%c144_73, %c128_74], %206 {strides = array<i32>} : memref<256x256xf32, #tpu.memory_space<vmem>>, vector<8x128xf32>,
    %208 = vector.extract_strided_slice %131 {offsets = [0, 38], sizes = [4, 128], strides = [1, 1]} : vector<4x256xf32> to vector<4x128xf32>
    %209 = vector.extract_strided_slice %131 {offsets = [0, 39], sizes = [4, 128], strides = [1, 1]} : vector<4x256xf32> to vector<4x128xf32>
    %210 = tpu.concatenate %208, %209 in 0 : vector<4x128xf32>, vector<4x128xf32> -> vector<8x128xf32>
    %c152_75 = arith.constant 152 : index
    %c128_76 = arith.constant 128 : index
    %211 = vector.load %arg5[%c152_75, %c128_76] : memref<256x256xf32, #tpu.memory_space<vmem>>, vector<8x128xf32>
    tpu.vector_store %arg5[%c152_75, %c128_76], %210 {strides = array<i32>} : memref<256x256xf32, #tpu.memory_space<vmem>>, vector<8x128xf32>,
    %212 = vector.extract_strided_slice %131 {offsets = [0, 40], sizes = [4, 128], strides = [1, 1]} : vector<4x256xf32> to vector<4x128xf32>
    %213 = vector.extract_strided_slice %131 {offsets = [0, 41], sizes = [4, 128], strides = [1, 1]} : vector<4x256xf32> to vector<4x128xf32>
    %214 = tpu.concatenate %212, %213 in 0 : vector<4x128xf32>, vector<4x128xf32> -> vector<8x128xf32>
    %c160_77 = arith.constant 160 : index
    %c128_78 = arith.constant 128 : index
    %215 = vector.load %arg5[%c160_77, %c128_78] : memref<256x256xf32, #tpu.memory_space<vmem>>, vector<8x128xf32>
    tpu.vector_store %arg5[%c160_77, %c128_78], %214 {strides = array<i32>} : memref<256x256xf32, #tpu.memory_space<vmem>>, vector<8x128xf32>,
    %216 = vector.extract_strided_slice %131 {offsets = [0, 42], sizes = [4, 128], strides = [1, 1]} : vector<4x256xf32> to vector<4x128xf32>
    %217 = vector.extract_strided_slice %131 {offsets = [0, 43], sizes = [4, 128], strides = [1, 1]} : vector<4x256xf32> to vector<4x128xf32>
    %218 = tpu.concatenate %216, %217 in 0 : vector<4x128xf32>, vector<4x128xf32> -> vector<8x128xf32>
    %c168_79 = arith.constant 168 : index
    %c128_80 = arith.constant 128 : index
    %219 = vector.load %arg5[%c168_79, %c128_80] : memref<256x256xf32, #tpu.memory_space<vmem>>, vector<8x128xf32>
    tpu.vector_store %arg5[%c168_79, %c128_80], %218 {strides = array<i32>} : memref<256x256xf32, #tpu.memory_space<vmem>>, vector<8x128xf32>,
    %220 = vector.extract_strided_slice %131 {offsets = [0, 44], sizes = [4, 128], strides = [1, 1]} : vector<4x256xf32> to vector<4x128xf32>
    %221 = vector.extract_strided_slice %131 {offsets = [0, 45], sizes = [4, 128], strides = [1, 1]} : vector<4x256xf32> to vector<4x128xf32>
    %222 = tpu.concatenate %220, %221 in 0 : vector<4x128xf32>, vector<4x128xf32> -> vector<8x128xf32>
    %c176_81 = arith.constant 176 : index
    %c128_82 = arith.constant 128 : index
    %223 = vector.load %arg5[%c176_81, %c128_82] : memref<256x256xf32, #tpu.memory_space<vmem>>, vector<8x128xf32>
    tpu.vector_store %arg5[%c176_81, %c128_82], %222 {strides = array<i32>} : memref<256x256xf32, #tpu.memory_space<vmem>>, vector<8x128xf32>,
    %224 = vector.extract_strided_slice %131 {offsets = [0, 46], sizes = [4, 128], strides = [1, 1]} : vector<4x256xf32> to vector<4x128xf32>
    %225 = vector.extract_strided_slice %131 {offsets = [0, 47], sizes = [4, 128], strides = [1, 1]} : vector<4x256xf32> to vector<4x128xf32>
    %226 = tpu.concatenate %224, %225 in 0 : vector<4x128xf32>, vector<4x128xf32> -> vector<8x128xf32>
    %c184_83 = arith.constant 184 : index
    %c128_84 = arith.constant 128 : index
    %227 = vector.load %arg5[%c184_83, %c128_84] : memref<256x256xf32, #tpu.memory_space<vmem>>, vector<8x128xf32>
    tpu.vector_store %arg5[%c184_83, %c128_84], %226 {strides = array<i32>} : memref<256x256xf32, #tpu.memory_space<vmem>>, vector<8x128xf32>,
    %228 = vector.extract_strided_slice %131 {offsets = [0, 48], sizes = [4, 128], strides = [1, 1]} : vector<4x256xf32> to vector<4x128xf32>
    %229 = vector.extract_strided_slice %131 {offsets = [0, 49], sizes = [4, 128], strides = [1, 1]} : vector<4x256xf32> to vector<4x128xf32>
    %230 = tpu.concatenate %228, %229 in 0 : vector<4x128xf32>, vector<4x128xf32> -> vector<8x128xf32>
    %c192_85 = arith.constant 192 : index
    %c128_86 = arith.constant 128 : index
    %231 = vector.load %arg5[%c192_85, %c128_86] : memref<256x256xf32, #tpu.memory_space<vmem>>, vector<8x128xf32>
    tpu.vector_store %arg5[%c192_85, %c128_86], %230 {strides = array<i32>} : memref<256x256xf32, #tpu.memory_space<vmem>>, vector<8x128xf32>,
    %232 = vector.extract_strided_slice %131 {offsets = [0, 50], sizes = [4, 128], strides = [1, 1]} : vector<4x256xf32> to vector<4x128xf32>
    %233 = vector.extract_strided_slice %131 {offsets = [0, 51], sizes = [4, 128], strides = [1, 1]} : vector<4x256xf32> to vector<4x128xf32>
    %234 = tpu.concatenate %232, %233 in 0 : vector<4x128xf32>, vector<4x128xf32> -> vector<8x128xf32>
    %c200_87 = arith.constant 200 : index
    %c128_88 = arith.constant 128 : index
    %235 = vector.load %arg5[%c200_87, %c128_88] : memref<256x256xf32, #tpu.memory_space<vmem>>, vector<8x128xf32>
    tpu.vector_store %arg5[%c200_87, %c128_88], %234 {strides = array<i32>} : memref<256x256xf32, #tpu.memory_space<vmem>>, vector<8x128xf32>,
    %236 = vector.extract_strided_slice %131 {offsets = [0, 52], sizes = [4, 128], strides = [1, 1]} : vector<4x256xf32> to vector<4x128xf32>
    %237 = vector.extract_strided_slice %131 {offsets = [0, 53], sizes = [4, 128], strides = [1, 1]} : vector<4x256xf32> to vector<4x128xf32>
    %238 = tpu.concatenate %236, %237 in 0 : vector<4x128xf32>, vector<4x128xf32> -> vector<8x128xf32>
    %c208_89 = arith.constant 208 : index
    %c128_90 = arith.constant 128 : index
    %239 = vector.load %arg5[%c208_89, %c128_90] : memref<256x256xf32, #tpu.memory_space<vmem>>, vector<8x128xf32>
    tpu.vector_store %arg5[%c208_89, %c128_90], %238 {strides = array<i32>} : memref<256x256xf32, #tpu.memory_space<vmem>>, vector<8x128xf32>,
    %240 = vector.extract_strided_slice %131 {offsets = [0, 54], sizes = [4, 128], strides = [1, 1]} : vector<4x256xf32> to vector<4x128xf32>
    %241 = vector.extract_strided_slice %131 {offsets = [0, 55], sizes = [4, 128], strides = [1, 1]} : vector<4x256xf32> to vector<4x128xf32>
    %242 = tpu.concatenate %240, %241 in 0 : vector<4x128xf32>, vector<4x128xf32> -> vector<8x128xf32>
    %c216_91 = arith.constant 216 : index
    %c128_92 = arith.constant 128 : index
    %243 = vector.load %arg5[%c216_91, %c128_92] : memref<256x256xf32, #tpu.memory_space<vmem>>, vector<8x128xf32>
    tpu.vector_store %arg5[%c216_91, %c128_92], %242 {strides = array<i32>} : memref<256x256xf32, #tpu.memory_space<vmem>>, vector<8x128xf32>,
    %244 = vector.extract_strided_slice %131 {offsets = [0, 56], sizes = [4, 128], strides = [1, 1]} : vector<4x256xf32> to vector<4x128xf32>
    %245 = vector.extract_strided_slice %131 {offsets = [0, 57], sizes = [4, 128], strides = [1, 1]} : vector<4x256xf32> to vector<4x128xf32>
    %246 = tpu.concatenate %244, %245 in 0 : vector<4x128xf32>, vector<4x128xf32> -> vector<8x128xf32>
    %c224_93 = arith.constant 224 : index
    %c128_94 = arith.constant 128 : index
    %247 = vector.load %arg5[%c224_93, %c128_94] : memref<256x256xf32, #tpu.memory_space<vmem>>, vector<8x128xf32>
    tpu.vector_store %arg5[%c224_93, %c128_94], %246 {strides = array<i32>} : memref<256x256xf32, #tpu.memory_space<vmem>>, vector<8x128xf32>,
    %248 = vector.extract_strided_slice %131 {offsets = [0, 58], sizes = [4, 128], strides = [1, 1]} : vector<4x256xf32> to vector<4x128xf32>
    %249 = vector.extract_strided_slice %131 {offsets = [0, 59], sizes = [4, 128], strides = [1, 1]} : vector<4x256xf32> to vector<4x128xf32>
    %250 = tpu.concatenate %248, %249 in 0 : vector<4x128xf32>, vector<4x128xf32> -> vector<8x128xf32>
    %c232_95 = arith.constant 232 : index
    %c128_96 = arith.constant 128 : index
    %251 = vector.load %arg5[%c232_95, %c128_96] : memref<256x256xf32, #tpu.memory_space<vmem>>, vector<8x128xf32>
    tpu.vector_store %arg5[%c232_95, %c128_96], %250 {strides = array<i32>} : memref<256x256xf32, #tpu.memory_space<vmem>>, vector<8x128xf32>,
    %252 = vector.extract_strided_slice %131 {offsets = [0, 60], sizes = [4, 128], strides = [1, 1]} : vector<4x256xf32> to vector<4x128xf32>
    %253 = vector.extract_strided_slice %131 {offsets = [0, 61], sizes = [4, 128], strides = [1, 1]} : vector<4x256xf32> to vector<4x128xf32>
    %254 = tpu.concatenate %252, %253 in 0 : vector<4x128xf32>, vector<4x128xf32> -> vector<8x128xf32>
    %c240_97 = arith.constant 240 : index
    %c128_98 = arith.constant 128 : index
    %255 = vector.load %arg5[%c240_97, %c128_98] : memref<256x256xf32, #tpu.memory_space<vmem>>, vector<8x128xf32>
    tpu.vector_store %arg5[%c240_97, %c128_98], %254 {strides = array<i32>} : memref<256x256xf32, #tpu.memory_space<vmem>>, vector<8x128xf32>,
    %256 = vector.extract_strided_slice %131 {offsets = [0, 62], sizes = [4, 128], strides = [1, 1]} : vector<4x256xf32> to vector<4x128xf32>
    %257 = vector.extract_strided_slice %131 {offsets = [0, 63], sizes = [4, 128], strides = [1, 1]} : vector<4x256xf32> to vector<4x128xf32>
    %258 = tpu.concatenate %256, %257 in 0 : vector<4x128xf32>, vector<4x128xf32> -> vector<8x128xf32>
    %c248_99 = arith.constant 248 : index
    %c128_100 = arith.constant 128 : index
    %259 = vector.load %arg5[%c248_99, %c128_100] : memref<256x256xf32, #tpu.memory_space<vmem>>, vector<8x128xf32>
    tpu.vector_store %arg5[%c248_99, %c128_100], %258 {strides = array<i32>} : memref<256x256xf32, #tpu.memory_space<vmem>>, vector<8x128xf32>,
    %c0_101 = arith.constant 0 : index
    %c0_102 = arith.constant 0 : index
    %260 = vector.load %arg2[%c0_101, %c0_102] : memref<24x256xf32, #tpu.memory_space<vmem>>, vector<24x256xf32>
    %c0_103 = arith.constant 0 : index
    %c0_104 = arith.constant 0 : index
    %261 = vector.load %arg5[%c0_103, %c0_104] : memref<256x256xf32, #tpu.memory_space<vmem>>, vector<256x256xf32>
    %cst = arith.constant dense<0.000000e+00> : vector<24x256xf32>
    %262 = tpu.matmul %260, %261, %cst {dimension_numbers = #tpu.dot_dimension_numbers<[1], [0], [0], [1], [0, 0, 1, 1], [], []>} : vector<24x256xf32>, vector<256x256xf32>, vector<24x256xf32> -> vector<24x256xf32>
    %c0_105 = arith.constant 0 : index
    %c0_106 = arith.constant 0 : index
    %263 = vector.load %arg3[%c0_105, %c0_106] : memref<24x1xf32, #tpu.memory_space<vmem>>, vector<24x1xf32>
    %264 = vector.broadcast %263 : vector<24x1xf32> to vector<24x256xf32>
    %265 = arith.addf %262, %264 : vector<24x256xf32>
    %cst_107 = arith.constant 0.000000e+00 : f32
    %266 = vector.broadcast %cst_107 : f32 to vector<24x256xf32>
    %267 = arith.maximumf %265, %266 : vector<24x256xf32>
    %268 = vector.extract_strided_slice %267 {offsets = [0, 0], sizes = [8, 256], strides = [1, 1]} : vector<24x256xf32> to vector<8x256xf32>
    %269 = vector.extract_strided_slice %267 {offsets = [8, 0], sizes = [8, 256], strides = [1, 1]} : vector<24x256xf32> to vector<8x256xf32>
    %270 = arith.addf %268, %269 : vector<8x256xf32>
    %271 = vector.extract_strided_slice %267 {offsets = [16, 0], sizes = [8, 256], strides = [1, 1]} : vector<24x256xf32> to vector<8x256xf32>
    %272 = arith.addf %270, %271 : vector<8x256xf32>
    %273 = vector.extract_strided_slice %272 {offsets = [0, 0], sizes = [8, 128], strides = [1, 1]} : vector<8x256xf32> to vector<8x128xf32>
    %c0_108 = arith.constant 0 : index
    %c0_109 = arith.constant 0 : index
    %c0_110 = arith.constant 0 : index
    %274 = vector.load %arg4[%c0_108, %c0_109, %c0_110] : memref<2x8x128xf32, #tpu.memory_space<vmem>>, vector<1x8x128xf32>
    %275 = vector.shape_cast %274 : vector<1x8x128xf32> to vector<8x128xf32>
    %276 = vector.shape_cast %273 : vector<8x128xf32> to vector<1x8x128xf32>
    tpu.vector_store %arg4[%c0_108, %c0_109, %c0_110], %276 {strides = array<i32>} : memref<2x8x128xf32, #tpu.memory_space<vmem>>, vector<1x8x128xf32>,
    %277 = vector.extract_strided_slice %272 {offsets = [0, 128], sizes = [8, 128], strides = [1, 1]} : vector<8x256xf32> to vector<8x128xf32>
    %c1_111 = arith.constant 1 : index
    %c0_112 = arith.constant 0 : index
    %c0_113 = arith.constant 0 : index
    %278 = vector.load %arg4[%c1_111, %c0_112, %c0_113] : memref<2x8x128xf32, #tpu.memory_space<vmem>>, vector<1x8x128xf32>
    %279 = vector.shape_cast %278 : vector<1x8x128xf32> to vector<8x128xf32>
    %280 = vector.shape_cast %277 : vector<8x128xf32> to vector<1x8x128xf32>
    tpu.vector_store %arg4[%c1_111, %c0_112, %c0_113], %280 {strides = array<i32>} : memref<2x8x128xf32, #tpu.memory_space<vmem>>, vector<1x8x128xf32>,
    return
  }
  func.func @transform_0(%arg0: i32) -> (i32, i32, i32) {
    %c0_i32 = arith.constant 0 : i32
    %c0_i32_0 = arith.constant 0 : i32
    %c0_i32_1 = arith.constant 0 : i32
    return %arg0, %c0_i32, %c0_i32_0 : i32, i32, i32
  }
  func.func @transform_1(%arg0: i32) -> (i32, i32) {
    %c0_i32 = arith.constant 0 : i32
    %c0_i32_0 = arith.constant 0 : i32
    %c0_i32_1 = arith.constant 0 : i32
    return %c0_i32, %c0_i32_0 : i32, i32
  }
  func.func @transform_2(%arg0: i32) -> (i32, i32) {
    %c0_i32 = arith.constant 0 : i32
    %c0_i32_0 = arith.constant 0 : i32
    %c0_i32_1 = arith.constant 0 : i32
    return %c0_i32, %c0_i32_0 : i32, i32
  }
  func.func @transform_3(%arg0: i32) -> (i32, i32, i32) {
    %c0_i32 = arith.constant 0 : i32
    %c0_i32_0 = arith.constant 0 : i32
    %c0_i32_1 = arith.constant 0 : i32
    return %arg0, %c0_i32, %c0_i32_0 : i32, i32, i32
  }
}

</mosaic_0001>

<bundles_post_ra>
// kernel: tpu_custom_call.1
= control target key start
LH: loop header
LB: loop body
LE: loop exit
PB: predicated region body
PF: predicated region fallthrough
CT: control target
= control target key end

     0   :  { %8 = vsyncpa [#allocation4], 0  ;;  %s3985_s0 = inlined_call_operand.vmem [shape: f32[2,4,256], index: 0, kind: input, shape index: {}]   ;;  %s3986_s1 = inlined_call_operand.hbm [shape: f32[24,256], index: 1, kind: input, shape index: {}]   ;;  %s3987_s2 = inlined_call_operand.vmem [shape: f32[24,1], index: 2, kind: input, shape index: {}]   ;;  %s3988_s3 = inlined_call_operand.hbm [shape: f32[2,8,128], index: 3, kind: output, shape index: {}]  }
   0x1   :  { %9 = vsyncpa [#allocation5], 0  ;;  %s16_s14 = sshll.u32 %s3986_s1, 4  ;;  %s2716_s15 = smov [#allocation3]   ;;  %s17_s14 = int_to_ptr.hbm [resolvable:$true] %s16_s14 }
   0x2   :  { %s18_s16 = sshll.u32 %s2716_s15, 4  ;;  %s2717_s17 = smov 256   ;;  %s19_s16 = int_to_ptr.vmem [resolvable:$true] %s18_s16 }
   0x3   :  { %s2718_s18 = smov 16  }
   0x4   :  { %24 = dma.hbm_to_vmem [thread:$0]  %s17_s14, 768, %s19_s16, [#allocation4], %s2717_s17, %s2717_s17, %s2718_s18  }
   0x5   :  { %2712 = dma.done.wait [#allocation4], 768  }
   0x6   :  { %2713 = vsyncadd [#allocation4], 4294966528  ;;  %v2781_v0 = vld [vmem:[%s3985_s0] sm:$0xff]  ;;  %s2719_s1 = smov 127   ;;  %vm41_vm0 = vcmask 1039360   ;;  %vm44_vm1 = vcmask 1043456  }
   0x7   :  { %34 = vst [vmem:[#allocation1 + $0x1] ss:$2 sm:$0xff] %v2781_v0  ;;  %s2720_s21 = smov 122   ;;  %s2721_s22 = smov 124   ;;  %vm463_vm2 = vcmask 801792   ;;  %vm435_vm3 = vcmask 818176  }
   0x8   :  { %s2722_s23 = smov 126   ;;  %s2723_s24 = smov 120   ;;  %vm407_vm4 = vcmask 834560   ;;  %vm379_vm5 = vcmask 850944   ;;  %vm351_vm6 = vcmask 867328   ;;  %vm323_vm7 = vcmask 883712  }
   0x9   :  { %s2724_s25 = smov 116   ;;  %s2725_s26 = smov 118   ;;  %vm295_vm8 = vcmask 900096   ;;  %vm267_vm9 = vcmask 916480   ;;  %vm4000_vm10 = vcmask 932864   ;;  %vm3998_vm11 = vcmask 949248  }
   0xa   :  { %s2726_s27 = smov 114   ;;  %s2727_s28 = smov 110   ;;  %vm3989_vm12 = vcmask 965632   ;;  %vm3997_vm13 = vcmask 982016   ;;  %vm3996_vm14 = vcmask 998400   ;;  %vm3995_vm15 = vcmask 1014784  }
   0xb   :  { %s2728_s29 = smov 112   ;;  %s2729_s30 = smov 104  }
   0xc   :  { %s2730_s4 = smov 106   ;;  %s2731_s5 = smov 108  }
   0xd   :  { %s2732_s6 = smov 102   ;;  %s2733_s7 = smov 98  }
   0xe   :  { %v35_v1 = vld.sshfl [vmem:[#allocation1] sm:$0xff pattern:$0x75316420]  ;;  %v36_v2 = vld.sshfl [vmem:[#allocation1 + $0x8] sm:$0xff pattern:$0x75316420] }
   0xf   :  { %v2031_v3 = vpack.i.bf16 %v36_v2, %v35_v1  ;;  %47 = vst [vmem:[#allocation1] ss:$2 sm:$0xff] %v2781_v0  ;;  %s2734_s8 = smov 100   ;;  %s3991_s9 = smov 96  }
  0x10   :  { %s3990_s10 = smov 92   ;;  %s2737_s11 = smov 94  }
  0x11   :  { %2032 = vrot.lane.b32.xlu0 %v2031_v3, %s2719_s1  ;;  %s3992_s12 = smov 86   ;;  %s2739_s13 = smov 88  }
  0x12   :  { %s2740_s14 = smov 90   ;;  %s2741_s15 = smov 84  }
  0x13   :  { %s2742_s16 = smov 82   ;;  %s2744_s19 = smov 74  }
  0x14   :  { %s2745_s20 = smov 76   ;;  %s2746_s17 = smov 78  }
  0x15   :  { %s2747_s18 = smov 72  }
  0x16   :  { %v2786_v4 = vld.sshfl [vmem:[#allocation1] sm:$0xff pattern:$0x75316420]  ;;  %v2788_v5 = vld.sshfl [vmem:[#allocation1 + $0x8] sm:$0xff pattern:$0x75316420] }
  0x17   :  { %53 = vst [vmem:[#allocation1 + $0x1] ss:$2 sm:$0xff] %v2781_v0 }
  0x1e   :  { %v54_v6 = vld.sshfl [vmem:[#allocation1] sm:$0xff pattern:$0x75316420]  ;;  %v55_v7 = vld.sshfl [vmem:[#allocation1 + $0x8] sm:$0xff pattern:$0x75316420] }
  0x1f   :  { %75 = vst [vmem:[#allocation1] ss:$2 sm:$0xff] %v2781_v0  ;;  %v2036_v8 = vpack.i.bf16 %v55_v7, %v54_v6 }
  0x21   :  { %2037 = vrot.lane.b32.xlu0 %v2036_v8, %s2719_s1 }
  0x26   :  { %v2793_v9 = vld.sshfl [vmem:[#allocation1] sm:$0xff pattern:$0x75316420]  ;;  %v2795_v10 = vld.sshfl [vmem:[#allocation1 + $0x8] sm:$0xff pattern:$0x75316420] }
  0x27   :  { %81 = vst [vmem:[#allocation1 + $0x1] ss:$2 sm:$0xff] %v2781_v0 }
  0x2e   :  { %v82_v11 = vld.sshfl [vmem:[#allocation1] sm:$0xff pattern:$0x75316420]  ;;  %v83_v12 = vld.sshfl [vmem:[#allocation1 + $0x8] sm:$0xff pattern:$0x75316420] }
  0x2f   :  { %v2041_v13 = vpack.i.bf16 %v83_v12, %v82_v11  ;;  %103 = vst [vmem:[#allocation1] ss:$2 sm:$0xff] %v2781_v0 }
  0x31   :  { %2042 = vrot.lane.b32.xlu1 %v2041_v13, %s2719_s1 }
  0x36   :  { %v104_v14 = vld.sshfl [vmem:[#allocation1] sm:$0xff pattern:$0x75316420]  ;;  %v105_v15 = vld.sshfl [vmem:[#allocation1 + $0x8] sm:$0xff pattern:$0x75316420] }
  0x37   :  { %109 = vst [vmem:[#allocation1 + $0x1] ss:$2 sm:$0xff] %v2781_v0 }
  0x3e   :  { %v110_v16 = vld.sshfl [vmem:[#allocation1] sm:$0xff pattern:$0x75316420]  ;;  %v111_v17 = vld.sshfl [vmem:[#allocation1 + $0x8] sm:$0xff pattern:$0x75316420] }
  0x3f   :  { %131 = vst [vmem:[#allocation1] ss:$2 sm:$0xff] %v2781_v0  ;;  %v2046_v18 = vpack.i.bf16 %v111_v17, %v110_v16 }
  0x41   :  { %2047 = vrot.lane.b32.xlu2 %v2046_v18, %s2719_s1 }
  0x46   :  { %v2803_v19 = vld.sshfl [vmem:[#allocation1] sm:$0xff pattern:$0x75316420]  ;;  %v2805_v20 = vld.sshfl [vmem:[#allocation1 + $0x8] sm:$0xff pattern:$0x75316420] }
  0x47   :  { %137 = vst [vmem:[#allocation1 + $0x1] ss:$2 sm:$0xff] %v2781_v0 }
  0x4e   :  { %v138_v21 = vld.sshfl [vmem:[#allocation1] sm:$0xff pattern:$0x75316420]  ;;  %v139_v22 = vld.sshfl [vmem:[#allocation1 + $0x8] sm:$0xff pattern:$0x75316420] }
  0x4f   :  { %v2051_v23 = vpack.i.bf16 %v139_v22, %v138_v21  ;;  %159 = vst [vmem:[#allocation1] ss:$2 sm:$0xff] %v2781_v0 }
  0x51   :  { %2052 = vrot.lane.b32.xlu1 %v2051_v23, %s2719_s1 }
  0x56   :  { %v2810_v24 = vld.sshfl [vmem:[#allocation1] sm:$0xff pattern:$0x75316420]  ;;  %v2812_v25 = vld.sshfl [vmem:[#allocation1 + $0x8] sm:$0xff pattern:$0x75316420] }
  0x57   :  { %165 = vst [vmem:[#allocation1 + $0x1] ss:$2 sm:$0xff] %v2781_v0 }
  0x5e   :  { %v166_v26 = vld.sshfl [vmem:[#allocation1] sm:$0xff pattern:$0x75316420]  ;;  %v167_v27 = vld.sshfl [vmem:[#allocation1 + $0x8] sm:$0xff pattern:$0x75316420] }
  0x5f   :  { %v2056_v28 = vpack.i.bf16 %v167_v27, %v166_v26  ;;  %187 = vst [vmem:[#allocation1] ss:$2 sm:$0xff] %v2781_v0 }
  0x61   :  { %2057 = vrot.lane.b32.xlu0 %v2056_v28, %s2719_s1 }
  0x66   :  { %v2817_v29 = vld.sshfl [vmem:[#allocation1] sm:$0xff pattern:$0x75316420]  ;;  %v2819_v30 = vld.sshfl [vmem:[#allocation1 + $0x8] sm:$0xff pattern:$0x75316420] }
  0x67   :  { %193 = vst [vmem:[#allocation1 + $0x1] ss:$2 sm:$0xff] %v2781_v0 }
  0x6e   :  { %v194_v31 = vld.sshfl [vmem:[#allocation1] sm:$0xff pattern:$0x75316420]  ;;  %v195_v32 = vld.sshfl [vmem:[#allocation1 + $0x8] sm:$0xff pattern:$0x75316420] }
  0x6f   :  { %215 = vst [vmem:[#allocation1] ss:$2 sm:$0xff] %v2781_v0  ;;  %v2061_v33 = vpack.i.bf16 %v195_v32, %v194_v31 }
  0x71   :  { %2062 = vrot.lane.b32.xlu2 %v2061_v33, %s2719_s1 }
  0x76   :  { %v2824_v34 = vld.sshfl [vmem:[#allocation1] sm:$0xff pattern:$0x75316420]  ;;  %v2826_v35 = vld.sshfl [vmem:[#allocation1 + $0x8] sm:$0xff pattern:$0x75316420] }
  0x77   :  { %221 = vst [vmem:[#allocation1 + $0x1] ss:$2 sm:$0xff] %v2781_v0 }
  0x7e   :  { %v222_v36 = vld.sshfl [vmem:[#allocation1] sm:$0xff pattern:$0x75316420]  ;;  %v223_v37 = vld.sshfl [vmem:[#allocation1 + $0x8] sm:$0xff pattern:$0x75316420] }
  0x7f   :  { %v2066_v38 = vpack.i.bf16 %v223_v37, %v222_v36  ;;  %243 = vst [vmem:[#allocation1] ss:$2 sm:$0xff] %v2781_v0 }
  0x81   :  { %2067 = vrot.lane.b32.xlu1 %v2066_v38, %s2719_s1 }
  0x83   :  { %v2849_v56 = vpop.permute.xlu0 %2032 }
  0x86   :  { %v2831_v39 = vld.sshfl [vmem:[#allocation1] sm:$0xff pattern:$0x75316420]  ;;  %v2833_v40 = vld.sshfl [vmem:[#allocation1 + $0x8] sm:$0xff pattern:$0x75316420] }
  0x87   :  { %249 = vst [vmem:[#allocation1 + $0x1] ss:$2 sm:$0xff] %v2781_v0 }
  0x8e   :  { %v250_v41 = vld.sshfl [vmem:[#allocation1] sm:$0xff pattern:$0x75316420]  ;;  %v251_v42 = vld.sshfl [vmem:[#allocation1 + $0x8] sm:$0xff pattern:$0x75316420] }
  0x8f   :  { %v2071_v43 = vpack.i.bf16 %v251_v42, %v250_v41  ;;  %271 = vst [vmem:[#allocation1] ss:$2 sm:$0xff] %v2781_v0 }
  0x91   :  { %2072 = vrot.lane.b32.xlu0 %v2071_v43, %s2719_s1 }
  0x93   :  { %v2038_v2 = vpop.permute.xlu0 %2037 }
  0x94   :  { %v2040_v7 = vunpack.i.h.bf16 %v2038_v2  ;;  %v2039_v8 = vunpack.i.l.bf16 %v2038_v2 }
  0x96   :  { %v2838_v44 = vld.sshfl [vmem:[#allocation1] sm:$0xff pattern:$0x75316420]  ;;  %v2840_v45 = vld.sshfl [vmem:[#allocation1 + $0x8] sm:$0xff pattern:$0x75316420]  ;;  %v60_v12 = vsel %vm41_vm0, %v2039_v8, %v2040_v7  ;;  %v64_v13 = vsel %vm44_vm1, %v2788_v5, %v2040_v7 }
  0x97   :  { %277 = vst [vmem:[#allocation1 + $0x1] ss:$2 sm:$0xff] %v2781_v0 }
  0x9b   :  { %v2048_v46 = vpop.permute.xlu2 %2047 }
  0x9c   :  { %v2050_v47 = vunpack.i.h.bf16 %v2048_v46  ;;  %v2049_v48 = vunpack.i.l.bf16 %v2048_v46 }
  0x9e   :  { %v116_v49 = vsel %vm41_vm0, %v2049_v48, %v2050_v47  ;;  %v120_v50 = vsel %vm44_vm1, %v105_v15, %v2050_v47  ;;  %v278_v51 = vld.sshfl [vmem:[#allocation1] sm:$0xff pattern:$0x75316420]  ;;  %v279_v52 = vld.sshfl [vmem:[#allocation1 + $0x8] sm:$0xff pattern:$0x75316420] }
  0x9f   :  { %v119_v53 = vsel %vm44_vm1, %v104_v14, %v116_v49  ;;  %v2081_v54 = vpack.i.bf16 %v279_v52, %v278_v51  ;;  %299 = vst [vmem:[#allocation1] ss:$2 sm:$0xff] %v2781_v0  ;;  %v63_v14 = vsel %vm44_vm1, %v2786_v4, %v60_v12 }
  0xa0   :  { %v2096_v55 = vpack.i.bf16 %v120_v50, %v119_v53  ;;  %v2076_v15 = vpack.i.bf16 %v64_v13, %v63_v14 }
  0xa1   :  { %2082 = vrot.lane.b32.xlu2 %v2081_v54, %s2719_s1 }
  0xa2   :  { %2097 = vrot.lane.b32.xlu0 %v2096_v55, %s2720_s21  ;;  %2077 = vrot.lane.b32.xlu1 %v2076_v15, %s2722_s23 }
  0xa3   :  { %v2043_v57 = vpop.permute.xlu1 %2042 }
  0xa4   :  { %v2045_v60 = vunpack.i.h.bf16 %v2043_v57  ;;  %v2044_v61 = vunpack.i.l.bf16 %v2043_v57 }
  0xa6   :  { %v2851_v58 = vld.sshfl [vmem:[#allocation1] sm:$0xff pattern:$0x75316420]  ;;  %v2853_v59 = vld.sshfl [vmem:[#allocation1 + $0x8] sm:$0xff pattern:$0x75316420]  ;;  %v88_v62 = vsel %vm41_vm0, %v2044_v61, %v2045_v60  ;;  %v92_v6 = vsel %vm44_vm1, %v2795_v10, %v2045_v60 }
  0xa7   :  { %305 = vst [vmem:[#allocation1 + $0x1] ss:$2 sm:$0xff] %v2781_v0  ;;  %v91_v3 = vsel %vm44_vm1, %v2793_v9, %v88_v62 }
  0xa8   :  { %v2086_v11 = vpack.i.bf16 %v92_v6, %v91_v3 }
  0xaa   :  { %2087 = vrot.lane.b32.xlu2 %v2086_v11, %s2721_s22 }
  0xae   :  { %v306_v63 = vld.sshfl [vmem:[#allocation1] sm:$0xff pattern:$0x75316420]  ;;  %v307_v1 = vld.sshfl [vmem:[#allocation1 + $0x8] sm:$0xff pattern:$0x75316420] }
  0xaf   :  { %327 = vst [vmem:[#allocation1] ss:$2 sm:$0xff] %v2781_v0  ;;  %v2091_v43 = vpack.i.bf16 %v307_v1, %v306_v63 }
  0xb1   :  { %2092 = vrot.lane.b32.xlu1 %v2091_v43, %s2719_s1 }
  0xb6   :  { %v2868_v16 = vld.sshfl [vmem:[#allocation1] sm:$0xff pattern:$0x75316420]  ;;  %v2870_v9 = vld.sshfl [vmem:[#allocation1 + $0x8] sm:$0xff pattern:$0x75316420] }
  0xb7   :  { %333 = vst [vmem:[#allocation1 + $0x1] ss:$2 sm:$0xff] %v2781_v0 }
  0xbe   :  { %v334_v10 = vld.sshfl [vmem:[#allocation1] sm:$0xff pattern:$0x75316420]  ;;  %v335_v17 = vld.sshfl [vmem:[#allocation1 + $0x8] sm:$0xff pattern:$0x75316420] }
  0xbf   :  { %v2101_v18 = vpack.i.bf16 %v335_v17, %v334_v10  ;;  %355 = vst [vmem:[#allocation1] ss:$2 sm:$0xff] %v2781_v0 }
  0xc1   :  { %2102 = vrot.lane.b32.xlu0 %v2101_v18, %s2719_s1 }
  0xc3   :  { %v2053_v5 = vpop.permute.xlu1 %2052 }
  0xc4   :  { %v2055_v21 = vunpack.i.h.bf16 %v2053_v5  ;;  %v2054_v4 = vunpack.i.l.bf16 %v2053_v5 }
  0xc6   :  { %v2876_v22 = vld.sshfl [vmem:[#allocation1] sm:$0xff pattern:$0x75316420]  ;;  %v2878_v23 = vld.sshfl [vmem:[#allocation1 + $0x8] sm:$0xff pattern:$0x75316420]  ;;  %v144_v26 = vsel %vm41_vm0, %v2054_v4, %v2055_v21  ;;  %v148_v27 = vsel %vm44_vm1, %v2805_v20, %v2055_v21 }
  0xc7   :  { %361 = vst [vmem:[#allocation1 + $0x1] ss:$2 sm:$0xff] %v2781_v0  ;;  %v147_v28 = vsel %vm44_vm1, %v2803_v19, %v144_v26 }
  0xc8   :  { %v2106_v31 = vpack.i.bf16 %v148_v27, %v147_v28 }
  0xca   :  { %2107 = vrot.lane.b32.xlu2 %v2106_v31, %s2723_s24 }
  0xcb   :  { %v2063_v32 = vpop.permute.xlu2 %2062 }
  0xcc   :  { %v2065_v33 = vunpack.i.h.bf16 %v2063_v32  ;;  %v2064_v36 = vunpack.i.l.bf16 %v2063_v32 }
  0xce   :  { %v362_v37 = vld.sshfl [vmem:[#allocation1] sm:$0xff pattern:$0x75316420]  ;;  %v363_v38 = vld.sshfl [vmem:[#allocation1 + $0x8] sm:$0xff pattern:$0x75316420]  ;;  %v200_v41 = vsel %vm41_vm0, %v2064_v36, %v2065_v33  ;;  %v204_v42 = vsel %vm44_vm1, %v2819_v30, %v2065_v33 }
  0xcf   :  { %383 = vst [vmem:[#allocation1] ss:$2 sm:$0xff] %v2781_v0  ;;  %v203_v20 = vsel %vm44_vm1, %v2817_v29, %v200_v41  ;;  %v2111_v46 = vpack.i.bf16 %v363_v38, %v362_v37 }
  0xd0   :  { %v2126_v19 = vpack.i.bf16 %v204_v42, %v203_v20 }
  0xd2   :  { %2127 = vrot.lane.b32.xlu0 %v2126_v19, %s2724_s25  ;;  %2112 = vrot.lane.b32.xlu2 %v2111_v46, %s2719_s1 }
  0xd3   :  { %v2058_v47 = vpop.permute.xlu0 %2057 }
  0xd4   :  { %v2060_v48 = vunpack.i.h.bf16 %v2058_v47  ;;  %v2059_v49 = vunpack.i.l.bf16 %v2058_v47 }
  0xd6   :  { %v2896_v50 = vld.sshfl [vmem:[#allocation1] sm:$0xff pattern:$0x75316420]  ;;  %v2898_v30 = vld.sshfl [vmem:[#allocation1 + $0x8] sm:$0xff pattern:$0x75316420]  ;;  %v172_v51 = vsel %vm41_vm0, %v2059_v49, %v2060_v48  ;;  %v176_v29 = vsel %vm44_vm1, %v2812_v25, %v2060_v48 }
  0xd7   :  { %389 = vst [vmem:[#allocation1 + $0x1] ss:$2 sm:$0xff] %v2781_v0  ;;  %v175_v52 = vsel %vm44_vm1, %v2810_v24, %v172_v51 }
  0xd8   :  { %v2116_v53 = vpack.i.bf16 %v176_v29, %v175_v52 }
  0xda   :  { %2117 = vrot.lane.b32.xlu1 %v2116_v53, %s2725_s26 }
  0xde   :  { %v390_v54 = vld.sshfl [vmem:[#allocation1] sm:$0xff pattern:$0x75316420]  ;;  %v391_v55 = vld.sshfl [vmem:[#allocation1 + $0x8] sm:$0xff pattern:$0x75316420] }
  0xdf   :  { %411 = vst [vmem:[#allocation1] ss:$2 sm:$0xff] %v2781_v0  ;;  %v2121_v57 = vpack.i.bf16 %v391_v55, %v390_v54 }
  0xe2   :  { %2122 = vrot.lane.b32.xlu1 %v2121_v57, %s2719_s1 }
  0xe6   :  { %v2909_v60 = vld.sshfl [vmem:[#allocation1] sm:$0xff pattern:$0x75316420]  ;;  %v2911_v61 = vld.sshfl [vmem:[#allocation1 + $0x8] sm:$0xff pattern:$0x75316420] }
  0xe7   :  { %417 = vst [vmem:[#allocation1 + $0x1] ss:$2 sm:$0xff] %v2781_v0 }
  0xee   :  { %v418_v25 = vld.sshfl [vmem:[#allocation1] sm:$0xff pattern:$0x75316420]  ;;  %v419_v62 = vld.sshfl [vmem:[#allocation1 + $0x8] sm:$0xff pattern:$0x75316420] }
  0xef   :  { %v2131_v24 = vpack.i.bf16 %v419_v62, %v418_v25  ;;  %439 = vst [vmem:[#allocation1] ss:$2 sm:$0xff] %v2781_v0 }
  0xf1   :  { %2132 = vrot.lane.b32.xlu0 %v2131_v24, %s2719_s1 }
  0xf3   :  { %v2068_v63 = vpop.permute.xlu1 %2067 }
  0xf4   :  { %v2070_v1 = vunpack.i.h.bf16 %v2068_v63  ;;  %v2069_v2 = vunpack.i.l.bf16 %v2068_v63 }
  0xf6   :  { %v228_v3 = vsel %vm41_vm0, %v2069_v2, %v2070_v1  ;;  %v232_v6 = vsel %vm44_vm1, %v2826_v35, %v2070_v1  ;;  %v2919_v7 = vld.sshfl [vmem:[#allocation1] sm:$0xff pattern:$0x75316420]  ;;  %v2921_v8 = vld.sshfl [vmem:[#allocation1 + $0x8] sm:$0xff pattern:$0x75316420] }
  0xf7   :  { %v231_v11 = vsel %vm44_vm1, %v2824_v34, %v228_v3  ;;  %445 = vst [vmem:[#allocation1 + $0x1] ss:$2 sm:$0xff] %v2781_v0 }
  0xf8   :  { %v2136_v12 = vpack.i.bf16 %v232_v6, %v231_v11 }
  0xfa   :  { %2137 = vrot.lane.b32.xlu2 %v2136_v12, %s2726_s27 }
  0xfb   :  { %v2083_v13 = vpop.permute.xlu2 %2082 }
  0xfc   :  { %v2085_v14 = vunpack.i.h.bf16 %v2083_v13  ;;  %v2084_v15 = vunpack.i.l.bf16 %v2083_v13 }
  0xfe   :  { %v446_v10 = vld.sshfl [vmem:[#allocation1] sm:$0xff pattern:$0x75316420]  ;;  %v447_v17 = vld.sshfl [vmem:[#allocation1 + $0x8] sm:$0xff pattern:$0x75316420]  ;;  %v284_v35 = vsel %vm41_vm0, %v2084_v15, %v2085_v14  ;;  %v288_v18 = vsel %vm44_vm1, %v2840_v45, %v2085_v14 }
  0xff   :  { %v2141_v5 = vpack.i.bf16 %v447_v17, %v446_v10  ;;  %467 = vst [vmem:[#allocation1] ss:$2 sm:$0xff] %v2781_v0  ;;  %v287_v34 = vsel %vm44_vm1, %v2838_v44, %v284_v35 }
 0x100   :  { %v2156_v21 = vpack.i.bf16 %v288_v18, %v287_v34 }
 0x102   :  { %2142 = vrot.lane.b32.xlu2 %v2141_v5, %s2719_s1  ;;  %2157 = vrot.lane.b32.xlu0 %v2156_v21, %s2727_s28 }
 0x103   :  { %v2073_v4 = vpop.permute.xlu0 %2072 }
 0x104   :  { %v2075_v26 = vunpack.i.h.bf16 %v2073_v4  ;;  %v2074_v27 = vunpack.i.l.bf16 %v2073_v4 }
 0x106   :  { %v2935_v28 = vld.sshfl [vmem:[#allocation1] sm:$0xff pattern:$0x75316420]  ;;  %v2937_v31 = vld.sshfl [vmem:[#allocation1 + $0x8] sm:$0xff pattern:$0x75316420]  ;;  %v256_v45 = vsel %vm41_vm0, %v2074_v27, %v2075_v26  ;;  %v260_v32 = vsel %vm44_vm1, %v2833_v40, %v2075_v26  ;;  %v2953_v40 = vpop.permute.xlu2 %2087 }
 0x107   :  { %473 = vst [vmem:[#allocation1 + $0x1] ss:$2 sm:$0xff] %v2781_v0  ;;  %v259_v44 = vsel %vm44_vm1, %v2831_v39, %v256_v45 }
 0x108   :  { %v2146_v33 = vpack.i.bf16 %v260_v32, %v259_v44 }
 0x10a   :  { %2147 = vrot.lane.b32.xlu1 %v2146_v33, %s2728_s29 }
 0x10e   :  { %v474_v36 = vld.sshfl [vmem:[#allocation1] sm:$0xff pattern:$0x75316420]  ;;  %v475_v37 = vld.sshfl [vmem:[#allocation1 + $0x8] sm:$0xff pattern:$0x75316420] }
 0x10f   :  { %495 = vst [vmem:[#allocation1] ss:$2 sm:$0xff] %v2781_v0  ;;  %v2151_v38 = vpack.i.bf16 %v475_v37, %v474_v36 }
 0x112   :  { %2152 = vrot.lane.b32.xlu1 %v2151_v38, %s2719_s1 }
 0x114   :  { %v2964_v48 = vpop.permute.xlu0 %2097  ;;  %v2984_v11 = vpop.permute.xlu1 %2077 }
 0x116   :  { %v2948_v41 = vld.sshfl [vmem:[#allocation1] sm:$0xff pattern:$0x75316420]  ;;  %v2950_v42 = vld.sshfl [vmem:[#allocation1 + $0x8] sm:$0xff pattern:$0x75316420] }
 0x117   :  { %501 = vst [vmem:[#allocation1 + $0x1] ss:$2 sm:$0xff] %v2781_v0 }
 0x11e   :  { %v502_v39 = vld.sshfl [vmem:[#allocation1] sm:$0xff pattern:$0x75316420]  ;;  %v503_v20 = vld.sshfl [vmem:[#allocation1 + $0x8] sm:$0xff pattern:$0x75316420] }
 0x11f   :  { %v2161_v19 = vpack.i.bf16 %v503_v20, %v502_v39  ;;  %523 = vst [vmem:[#allocation1] ss:$2 sm:$0xff] %v2781_v0 }
 0x121   :  { %2162 = vrot.lane.b32.xlu0 %v2161_v19, %s2719_s1 }
 0x124   :  { %v2957_v43 = vpop.permute.xlu2 %2107 }
 0x126   :  { %v2959_v46 = vld.sshfl [vmem:[#allocation1] sm:$0xff pattern:$0x75316420]  ;;  %v2961_v47 = vld.sshfl [vmem:[#allocation1 + $0x8] sm:$0xff pattern:$0x75316420] }
 0x127   :  { %529 = vst [vmem:[#allocation1 + $0x1] ss:$2 sm:$0xff] %v2781_v0 }
 0x12c   :  { %v2113_v49 = vpop.permute.xlu2 %2112 }
 0x12d   :  { %v2115_v52 = vunpack.i.h.bf16 %v2113_v49  ;;  %v2114_v53 = vunpack.i.l.bf16 %v2113_v49 }
 0x12e   :  { %v530_v51 = vld.sshfl [vmem:[#allocation1] sm:$0xff pattern:$0x75316420]  ;;  %v531_v29 = vld.sshfl [vmem:[#allocation1 + $0x8] sm:$0xff pattern:$0x75316420] }
 0x12f   :  { %551 = vst [vmem:[#allocation1] ss:$2 sm:$0xff] %v2781_v0  ;;  %v368_v54 = vsel %vm41_vm0, %v2114_v53, %v2115_v52  ;;  %v372_v55 = vsel %vm44_vm1, %v2878_v23, %v2115_v52  ;;  %v2171_v45 = vpack.i.bf16 %v531_v29, %v530_v51 }
 0x130   :  { %v371_v57 = vsel %vm44_vm1, %v2876_v22, %v368_v54 }
 0x131   :  { %v2186_v25 = vpack.i.bf16 %v372_v55, %v371_v57 }
 0x133   :  { %v2103_v62 = vpop.permute.xlu0 %2102  ;;  %2187 = vrot.lane.b32.xlu0 %v2186_v25, %s2729_s30 }
 0x134   :  { %v2105_v24 = vunpack.i.h.bf16 %v2103_v62  ;;  %v2104_v63 = vunpack.i.l.bf16 %v2103_v62 }
 0x136   :  { %v340_v1 = vsel %vm41_vm0, %v2104_v63, %v2105_v24  ;;  %v344_v2 = vsel %vm44_vm1, %v2870_v9, %v2105_v24  ;;  %v2976_v3 = vld.sshfl [vmem:[#allocation1] sm:$0xff pattern:$0x75316420]  ;;  %v2978_v6 = vld.sshfl [vmem:[#allocation1 + $0x8] sm:$0xff pattern:$0x75316420] }
 0x137   :  { %v343_v23 = vsel %vm44_vm1, %v2868_v16, %v340_v1  ;;  %557 = vst [vmem:[#allocation1 + $0x1] ss:$2 sm:$0xff] %v2781_v0  ;;  %v2093_v16 = vpop.permute.xlu1 %2092 }
 0x138   :  { %v2176_v22 = vpack.i.bf16 %v344_v2, %v343_v23  ;;  %v2095_v10 = vunpack.i.h.bf16 %v2093_v16  ;;  %v2094_v17 = vunpack.i.l.bf16 %v2093_v16 }
 0x13a   :  { %2177 = vrot.lane.b32.xlu1 %v2176_v22, %s2730_s4  ;;  %v312_v35 = vsel %vm41_vm0, %v2094_v17, %v2095_v10  ;;  %v316_v5 = vsel %vm44_vm1, %v2853_v59, %v2095_v10 }
 0x13b   :  { %v315_v18 = vsel %vm44_vm1, %v2851_v58, %v312_v35 }
 0x13c   :  { %v2166_v34 = vpack.i.bf16 %v316_v5, %v315_v18 }
 0x13e   :  { %v558_v12 = vld.sshfl [vmem:[#allocation1] sm:$0xff pattern:$0x75316420]  ;;  %v559_v13 = vld.sshfl [vmem:[#allocation1 + $0x8] sm:$0xff pattern:$0x75316420]  ;;  %2167 = vrot.lane.b32.xlu2 %v2166_v34, %s2731_s5 }
 0x13f   :  { %579 = vst [vmem:[#allocation1] ss:$2 sm:$0xff] %v2781_v0  ;;  %v2181_v9 = vpack.i.bf16 %v559_v13, %v558_v12 }
 0x142   :  { %2182 = vrot.lane.b32.xlu1 %v2181_v9, %s2719_s1 }
 0x144   :  { %v3011_v37 = vpop.permute.xlu0 %2127 }
 0x146   :  { %v2988_v14 = vld.sshfl [vmem:[#allocation1] sm:$0xff pattern:$0x75316420]  ;;  %v2990_v15 = vld.sshfl [vmem:[#allocation1 + $0x8] sm:$0xff pattern:$0x75316420]  ;;  %2172 = vrot.lane.b32.xlu2 %v2171_v45, %s2719_s1 }
 0x147   :  { %585 = vst [vmem:[#allocation1 + $0x1] ss:$2 sm:$0xff] %v2781_v0 }
 0x14c   :  { %v2999_v26 = vpop.permute.xlu1 %2117 }
 0x14e   :  { %v586_v21 = vld.sshfl [vmem:[#allocation1] sm:$0xff pattern:$0x75316420]  ;;  %v587_v4 = vld.sshfl [vmem:[#allocation1 + $0x8] sm:$0xff pattern:$0x75316420] }
 0x14f   :  { %v2191_v27 = vpack.i.bf16 %v587_v4, %v586_v21  ;;  %607 = vst [vmem:[#allocation1] ss:$2 sm:$0xff] %v2781_v0 }
 0x151   :  { %2192 = vrot.lane.b32.xlu0 %v2191_v27, %s2719_s1 }
 0x154   :  { %v3003_v32 = vpop.permute.xlu2 %2137  ;;  %v2123_v44 = vpop.permute.xlu1 %2122 }
 0x155   :  { %v2125_v33 = vunpack.i.h.bf16 %v2123_v44  ;;  %v2124_v36 = vunpack.i.l.bf16 %v2123_v44 }
 0x156   :  { %v3006_v58 = vld.sshfl [vmem:[#allocation1] sm:$0xff pattern:$0x75316420]  ;;  %v3008_v59 = vld.sshfl [vmem:[#allocation1 + $0x8] sm:$0xff pattern:$0x75316420] }
 0x157   :  { %613 = vst [vmem:[#allocation1 + $0x1] ss:$2 sm:$0xff] %v2781_v0  ;;  %v396_v38 = vsel %vm41_vm0, %v2124_v36, %v2125_v33  ;;  %v400_v39 = vsel %vm44_vm1, %v2898_v30, %v2125_v33 }
 0x158   :  { %v399_v20 = vsel %vm44_vm1, %v2896_v50, %v396_v38 }
 0x159   :  { %v2196_v19 = vpack.i.bf16 %v400_v39, %v399_v20 }
 0x15b   :  { %2197 = vrot.lane.b32.xlu2 %v2196_v19, %s2732_s6 }
 0x15c   :  { %v2143_v49 = vpop.permute.xlu2 %2142 }
 0x15d   :  { %v2145_v51 = vunpack.i.h.bf16 %v2143_v49  ;;  %v2144_v29 = vunpack.i.l.bf16 %v2143_v49 }
 0x15e   :  { %v614_v52 = vld.sshfl [vmem:[#allocation1] sm:$0xff pattern:$0x75316420]  ;;  %v615_v53 = vld.sshfl [vmem:[#allocation1 + $0x8] sm:$0xff pattern:$0x75316420] }
 0x15f   :  { %635 = vst [vmem:[#allocation1] ss:$2 sm:$0xff] %v2781_v0  ;;  %v452_v54 = vsel %vm41_vm0, %v2144_v29, %v2145_v51  ;;  %v456_v55 = vsel %vm44_vm1, %v2921_v8, %v2145_v51  ;;  %v2201_v57 = vpack.i.bf16 %v615_v53, %v614_v52 }
 0x160   :  { %v455_v30 = vsel %vm44_vm1, %v2919_v7, %v452_v54 }
 0x161   :  { %v2216_v50 = vpack.i.bf16 %v456_v55, %v455_v30 }
 0x163   :  { %v2133_v25 = vpop.permute.xlu0 %2132  ;;  %2217 = vrot.lane.b32.xlu0 %v2216_v50, %s2733_s7  ;;  %2202 = vrot.lane.b32.xlu2 %v2201_v57, %s2719_s1 }
 0x164   :  { %v2135_v62 = vunpack.i.h.bf16 %v2133_v25  ;;  %v2134_v24 = vunpack.i.l.bf16 %v2133_v25 }
 0x166   :  { %v424_v63 = vsel %vm41_vm0, %v2134_v24, %v2135_v62  ;;  %v428_v1 = vsel %vm44_vm1, %v2911_v61, %v2135_v62  ;;  %v3030_v2 = vld.sshfl [vmem:[#allocation1] sm:$0xff pattern:$0x75316420]  ;;  %v3032_v8 = vld.sshfl [vmem:[#allocation1 + $0x8] sm:$0xff pattern:$0x75316420] }
 0x167   :  { %v427_v7 = vsel %vm44_vm1, %v2909_v60, %v424_v63  ;;  %641 = vst [vmem:[#allocation1 + $0x1] ss:$2 sm:$0xff] %v2781_v0 }
 0x168   :  { %v2206_v23 = vpack.i.bf16 %v428_v1, %v427_v7 }
 0x16a   :  { %2207 = vrot.lane.b32.xlu1 %v2206_v23, %s2734_s8 }
 0x16e   :  { %v642_v22 = vld.sshfl [vmem:[#allocation1] sm:$0xff pattern:$0x75316420]  ;;  %v643_v12 = vld.sshfl [vmem:[#allocation1 + $0x8] sm:$0xff pattern:$0x75316420] }
 0x16f   :  { %663 = vst [vmem:[#allocation1] ss:$2 sm:$0xff] %v2781_v0  ;;  %v2211_v13 = vpack.i.bf16 %v643_v12, %v642_v22 }
 0x172   :  { %2212 = vrot.lane.b32.xlu1 %v2211_v13, %s2719_s1 }
 0x174   :  { %v3062_v39 = vpop.permute.xlu0 %2157 }
 0x176   :  { %v3040_v61 = vld.sshfl [vmem:[#allocation1] sm:$0xff pattern:$0x75316420]  ;;  %v3042_v9 = vld.sshfl [vmem:[#allocation1 + $0x8] sm:$0xff pattern:$0x75316420] }
 0x177   :  { %669 = vst [vmem:[#allocation1 + $0x1] ss:$2 sm:$0xff] %v2781_v0 }
 0x17c   :  { %v3053_v34 = vpop.permute.xlu1 %2147 }
 0x17e   :  { %v670_v60 = vld.sshfl [vmem:[#allocation1] sm:$0xff pattern:$0x75316420]  ;;  %v671_v16 = vld.sshfl [vmem:[#allocation1 + $0x8] sm:$0xff pattern:$0x75316420] }
 0x17f   :  { %v2221_v10 = vpack.i.bf16 %v671_v16, %v670_v60  ;;  %691 = vst [vmem:[#allocation1] ss:$2 sm:$0xff] %v2781_v0 }
 0x181   :  { %2222 = vrot.lane.b32.xlu0 %v2221_v10, %s2719_s1 }
 0x184   :  { %v2153_v27 = vpop.permute.xlu1 %2152 }
 0x185   :  { %v2155_v33 = vunpack.i.h.bf16 %v2153_v27  ;;  %v2154_v36 = vunpack.i.l.bf16 %v2153_v27 }
 0x186   :  { %v3047_v17 = vld.sshfl [vmem:[#allocation1] sm:$0xff pattern:$0x75316420]  ;;  %v3049_v35 = vld.sshfl [vmem:[#allocation1 + $0x8] sm:$0xff pattern:$0x75316420] }
 0x187   :  { %697 = vst [vmem:[#allocation1 + $0x1] ss:$2 sm:$0xff] %v2781_v0  ;;  %v480_v38 = vsel %vm41_vm0, %v2154_v36, %v2155_v33  ;;  %v484_v19 = vsel %vm44_vm1, %v2937_v31, %v2155_v33 }
 0x188   :  { %v483_v20 = vsel %vm44_vm1, %v2935_v28, %v480_v38 }
 0x189   :  { %v2226_v52 = vpack.i.bf16 %v484_v19, %v483_v20 }
 0x18b   :  { %2227 = vrot.lane.b32.xlu2 %v2226_v52, %s3991_s9  ;;  %s2749_s9 = smov 68  }
 0x18e   :  { %v698_v18 = vld.sshfl [vmem:[#allocation1] sm:$0xff pattern:$0x75316420]  ;;  %v699_v5 = vld.sshfl [vmem:[#allocation1 + $0x8] sm:$0xff pattern:$0x75316420] }
 0x18f   :  { %719 = vst [vmem:[#allocation1] ss:$2 sm:$0xff] %v2781_v0 }
 0x193   :  { %v2163_v53 = vpop.permute.xlu0 %2162 }
 0x194   :  { %v2165_v30 = vunpack.i.h.bf16 %v2163_v53  ;;  %v2164_v28 = vunpack.i.l.bf16 %v2163_v53 }
 0x196   :  { %v3055_v21 = vld.sshfl [vmem:[#allocation1] sm:$0xff pattern:$0x75316420]  ;;  %v3057_v4 = vld.sshfl [vmem:[#allocation1 + $0x8] sm:$0xff pattern:$0x75316420]  ;;  %v508_v24 = vsel %vm41_vm0, %v2164_v28, %v2165_v30  ;;  %v512_v23 = vsel %vm44_vm1, %v2950_v42, %v2165_v30 }
 0x197   :  { %725 = vst [vmem:[#allocation1 + $0x1] ss:$2 sm:$0xff] %v2781_v0  ;;  %v511_v7 = vsel %vm44_vm1, %v2948_v41, %v508_v24  ;;  %v2231_v41 = vpack.i.bf16 %v699_v5, %v698_v18 }
 0x198   :  { %v3072_v29 = vpop.permute.xlu2 %2167  ;;  %v2236_v60 = vpack.i.bf16 %v512_v23, %v511_v7 }
 0x199   :  { %2232 = vrot.lane.b32.xlu2 %v2231_v41, %s2719_s1 }
 0x19a   :  { %2237 = vrot.lane.b32.xlu1 %v2236_v60, %s2737_s11 }
 0x19e   :  { %v726_v45 = vld.sshfl [vmem:[#allocation1] sm:$0xff pattern:$0x75316420]  ;;  %v727_v44 = vld.sshfl [vmem:[#allocation1 + $0x8] sm:$0xff pattern:$0x75316420] }
 0x19f   :  { %747 = vst [vmem:[#allocation1] ss:$2 sm:$0xff] %v2781_v0  ;;  %v2241_v38 = vpack.i.bf16 %v727_v44, %v726_v45 }
 0x1a0   :  { %v2173_v50 = vpop.permute.xlu2 %2172 }
 0x1a1   :  { %v2175_v31 = vunpack.i.h.bf16 %v2173_v50  ;;  %v2174_v57 = vunpack.i.l.bf16 %v2173_v50 }
 0x1a2   :  { %2242 = vrot.lane.b32.xlu1 %v2241_v38, %s2719_s1 }
 0x1a3   :  { %v536_v25 = vsel %vm41_vm0, %v2174_v57, %v2175_v31  ;;  %v540_v62 = vsel %vm44_vm1, %v2961_v47, %v2175_v31 }
 0x1a4   :  { %v539_v63 = vsel %vm44_vm1, %v2959_v46, %v536_v25 }
 0x1a5   :  { %v2246_v1 = vpack.i.bf16 %v540_v62, %v539_v63  ;;  %v3097_v46 = vpop.permute.xlu0 %2187 }
 0x1a6   :  { %v3068_v49 = vld.sshfl [vmem:[#allocation1] sm:$0xff pattern:$0x75316420]  ;;  %v3070_v51 = vld.sshfl [vmem:[#allocation1 + $0x8] sm:$0xff pattern:$0x75316420] }
 0x1a7   :  { %753 = vst [vmem:[#allocation1 + $0x1] ss:$2 sm:$0xff] %v2781_v0  ;;  %2247 = vrot.lane.b32.xlu0 %v2246_v1, %s3990_s10  ;;  %s2748_s10 = smov 70  }
 0x1ac   :  { %v3092_v47 = vpop.permute.xlu1 %2177 }
 0x1ae   :  { %v754_v54 = vld.sshfl [vmem:[#allocation1] sm:$0xff pattern:$0x75316420]  ;;  %v755_v55 = vld.sshfl [vmem:[#allocation1 + $0x8] sm:$0xff pattern:$0x75316420] }
 0x1af   :  { %775 = vst [vmem:[#allocation1] ss:$2 sm:$0xff] %v2781_v0  ;;  %v2251_v42 = vpack.i.bf16 %v755_v55, %v754_v54 }
 0x1b1   :  { %2252 = vrot.lane.b32.xlu0 %v2251_v42, %s2719_s1 }
 0x1b4   :  { %v2183_v20 = vpop.permute.xlu1 %2182 }
 0x1b5   :  { %v3094_v13 = vpop.permute.xlu2 %2197  ;;  %v2185_v19 = vunpack.i.h.bf16 %v2183_v20  ;;  %v2184_v52 = vunpack.i.l.bf16 %v2183_v20  ;;  %v2180_v20 = vunpack.i.h.bf16 %v3092_v47 }
 0x1b6   :  { %v3088_v22 = vld.sshfl [vmem:[#allocation1] sm:$0xff pattern:$0x75316420]  ;;  %v3090_v12 = vld.sshfl [vmem:[#allocation1 + $0x8] sm:$0xff pattern:$0x75316420]  ;;  %v2200_v42 = vunpack.i.h.bf16 %v3094_v13 }
 0x1b7   :  { %781 = vst [vmem:[#allocation1 + $0x1] ss:$2 sm:$0xff] %v2781_v0  ;;  %v564_v45 = vsel %vm41_vm0, %v2184_v52, %v2185_v19  ;;  %v568_v62 = vsel %vm44_vm1, %v2978_v6, %v2185_v19 }
 0x1b8   :  { %v567_v25 = vsel %vm44_vm1, %v2976_v3, %v564_v45  ;;  %v2149_v45 = vunpack.i.l.bf16 %v3053_v34 }
 0x1b9   :  { %v2256_v24 = vpack.i.bf16 %v568_v62, %v567_v25  ;;  %v2140_v25 = vunpack.i.h.bf16 %v3003_v32 }
 0x1bb   :  { %2257 = vrot.lane.b32.xlu2 %v2256_v24, %s2740_s14  ;;  %v2139_v24 = vunpack.i.l.bf16 %v3003_v32 }
 0x1bd   :  { %v2203_v27 = vpop.permute.xlu2 %2202 }
 0x1be   :  { %v782_v16 = vld.sshfl [vmem:[#allocation1] sm:$0xff pattern:$0x75316420]  ;;  %v783_v10 = vld.sshfl [vmem:[#allocation1 + $0x8] sm:$0xff pattern:$0x75316420]  ;;  %v2205_v33 = vunpack.i.h.bf16 %v2203_v27  ;;  %v2204_v36 = vunpack.i.l.bf16 %v2203_v27  ;;  %v2199_v27 = vunpack.i.l.bf16 %v3094_v13 }
 0x1bf   :  { %803 = vst [vmem:[#allocation1] ss:$2 sm:$0xff] %v2781_v0 }
 0x1c0   :  { %v620_v53 = vsel %vm41_vm0, %v2204_v36, %v2205_v33  ;;  %v624_v54 = vsel %vm44_vm1, %v3008_v59, %v2205_v33  ;;  %v2189_v33 = vunpack.i.l.bf16 %v3097_v46  ;;  %v408_v13 = vsel %vm407_vm4, %v2199_v27, %v2200_v42 }
 0x1c1   :  { %v623_v5 = vsel %vm44_vm1, %v3006_v58, %v620_v53  ;;  %v2179_v53 = vunpack.i.l.bf16 %v3092_v47  ;;  %v2160_v47 = vunpack.i.h.bf16 %v3062_v39 }
 0x1c2   :  { %v2276_v28 = vpack.i.bf16 %v624_v54, %v623_v5  ;;  %v2169_v54 = vunpack.i.l.bf16 %v3072_v29 }
 0x1c3   :  { %v2193_v18 = vpop.permute.xlu0 %2192 }
 0x1c4   :  { %v2195_v55 = vunpack.i.h.bf16 %v2193_v18  ;;  %v2194_v30 = vunpack.i.l.bf16 %v2193_v18  ;;  %2277 = vrot.lane.b32.xlu0 %v2276_v28, %s3992_s12  ;;  %v352_v28 = vsel %vm351_vm6, %v2179_v53, %v2180_v20  ;;  %s2750_s12 = smov 66  }
 0x1c6   :  { %v592_v50 = vsel %vm41_vm0, %v2194_v30, %v2195_v55  ;;  %v3111_v44 = vld.sshfl [vmem:[#allocation1] sm:$0xff pattern:$0x75316420]  ;;  %v3113_v31 = vld.sshfl [vmem:[#allocation1 + $0x8] sm:$0xff pattern:$0x75316420]  ;;  %v596_v59 = vsel %vm44_vm1, %v2990_v15, %v2195_v55  ;;  %v2261_v15 = vpack.i.bf16 %v783_v10, %v782_v16  ;;  %v2190_v16 = vunpack.i.h.bf16 %v3097_v46 }
 0x1c7   :  { %809 = vst [vmem:[#allocation1 + $0x1] ss:$2 sm:$0xff] %v2781_v0  ;;  %v595_v58 = vsel %vm44_vm1, %v2988_v14, %v592_v50  ;;  %v2170_v46 = vunpack.i.h.bf16 %v3072_v29  ;;  %v2159_v30 = vunpack.i.l.bf16 %v3062_v39  ;;  %v2150_v50 = vunpack.i.h.bf16 %v3053_v34 }
 0x1c8   :  { %v2266_v57 = vpack.i.bf16 %v596_v59, %v595_v58  ;;  %2262 = vrot.lane.b32.xlu2 %v2261_v15, %s2719_s1  ;;  %v380_v55 = vsel %vm379_vm5, %v2189_v33, %v2190_v16  ;;  %v2130_v15 = vunpack.i.h.bf16 %v3011_v37 }
 0x1c9   :  { %v324_v29 = vsel %vm323_vm7, %v2169_v54, %v2170_v46  ;;  %v268_v32 = vsel %vm267_vm9, %v2149_v45, %v2150_v50  ;;  %v3210_v45 = vld [vmem:[%s3985_s0 + $0x8] sm:$0xff]  ;;  %s2743_s0 = smov 80  }
 0x1ca   :  { %2267 = vrot.lane.b32.xlu1 %v2266_v57, %s2739_s13  ;;  %4017 = vst [vmem:[#allocation9_spill] sm:$0xff] %v3210_v45 }
 0x1ce   :  { %v810_v63 = vld.sshfl [vmem:[#allocation1] sm:$0xff pattern:$0x75316420]  ;;  %v811_v1 = vld.sshfl [vmem:[#allocation1 + $0x8] sm:$0xff pattern:$0x75316420] }
 0x1cf   :  { %831 = vst [vmem:[#allocation1] ss:$2 sm:$0xff] %v2781_v0  ;;  %v2271_v14 = vpack.i.bf16 %v811_v1, %v810_v63  ;;  %v296_v63 = vsel %vm295_vm8, %v2159_v30, %v2160_v47 }
 0x1d2   :  { %2272 = vrot.lane.b32.xlu1 %v2271_v14, %s2719_s1 }
 0x1d5   :  { %v2218_v3 = vpop.permute.xlu0 %2217 }
 0x1d6   :  { %v2220_v6 = vunpack.i.h.bf16 %v2218_v3  ;;  %v2219_v7 = vunpack.i.l.bf16 %v2218_v3  ;;  %v3130_v23 = vld.sshfl [vmem:[#allocation1] sm:$0xff pattern:$0x75316420]  ;;  %v3132_v60 = vld.sshfl [vmem:[#allocation1 + $0x8] sm:$0xff pattern:$0x75316420]  ;;  %v2129_v3 = vunpack.i.l.bf16 %v3011_v37  ;;  %v2109_v37 = vunpack.i.l.bf16 %v2957_v43 }
 0x1d7   :  { %837 = vst [vmem:[#allocation1 + $0x1] ss:$2 sm:$0xff] %v2781_v0 }
 0x1d8   :  { %v464_v41 = vsel %vm463_vm2, %v2219_v7, %v2220_v6  ;;  %v2120_v7 = vunpack.i.h.bf16 %v2999_v26  ;;  %v212_v42 = vsel %vm3998_vm11, %v2129_v3, %v2130_v15  ;;  %vm4001_vm11 = vcmask 605184  }
 0x1d9   :  { %1855 = vmatpush.msra.mxu0 %v464_v41  ;;  %v2119_v41 = vunpack.i.l.bf16 %v2999_v26  ;;  %v2099_v26 = vunpack.i.l.bf16 %v2964_v48 }
 0x1db   :  { %v184_v33 = vsel %vm3989_vm12, %v2119_v41, %v2120_v7  ;;  %vm3994_vm12 = vcmask 1031168  }
 0x1dc   :  { %v2208_v10 = vpop.permute.xlu1 %2207 }
 0x1dd   :  { %v2210_v36 = vunpack.i.h.bf16 %v2208_v10  ;;  %v2209_v38 = vunpack.i.l.bf16 %v2208_v10  ;;  %v2100_v10 = vunpack.i.h.bf16 %v2964_v48  ;;  %v2079_v48 = vunpack.i.l.bf16 %v2984_v11 }
 0x1de   :  { %v838_v19 = vld.sshfl [vmem:[#allocation1] sm:$0xff pattern:$0x75316420]  ;;  %v839_v52 = vld.sshfl [vmem:[#allocation1 + $0x8] sm:$0xff pattern:$0x75316420] }
 0x1df   :  { %v436_v18 = vsel %vm435_vm3, %v2209_v38, %v2210_v36  ;;  %v2281_v5 = vpack.i.bf16 %v839_v52, %v838_v19  ;;  %859 = vst [vmem:[#allocation1] ss:$2 sm:$0xff] %v2781_v0  ;;  %v2090_v38 = vunpack.i.h.bf16 %v2953_v40  ;;  %v2035_v19 = vunpack.i.h.bf16 %v2849_v56 }
 0x1e0   :  { %1856 = vmatpush.msra.mxu0 %v436_v18  ;;  %v2080_v52 = vunpack.i.h.bf16 %v2984_v11  ;;  %v128_v18 = vsel %vm3996_vm14, %v2099_v26, %v2100_v10  ;;  %vm3999_vm14 = vcmask 572416  }
 0x1e1   :  { %2282 = vrot.lane.b32.xlu0 %v2281_v5, %s2719_s1 }
 0x1e2   :  { %1857 = vmatpush.msra.mxu0 %v408_v13  ;;  %v2034_v13 = vunpack.i.l.bf16 %v2849_v56  ;;  %v72_v30 = vsel %vm3994_vm12, %v2079_v48, %v2080_v52  ;;  %vm911_vm12 = vcmask 539648  }
 0x1e4   :  { %1858 = vmatpush.msra.mxu0 %v380_v55  ;;  %v2213_v58 = vpop.permute.xlu1 %2212  ;;  %v42_v50 = vsel %vm41_vm0, %v2034_v13, %v2035_v19 }
 0x1e5   :  { %v2215_v59 = vunpack.i.h.bf16 %v2213_v58  ;;  %v2214_v57 = vunpack.i.l.bf16 %v2213_v58 }
 0x1e6   :  { %1859 = vmatpush.msra.mxu0 %v352_v28  ;;  %v3156_v62 = vld.sshfl [vmem:[#allocation1] sm:$0xff pattern:$0x75316420]  ;;  %v3158_v39 = vld.sshfl [vmem:[#allocation1 + $0x8] sm:$0xff pattern:$0x75316420] }
 0x1e7   :  { %865 = vst [vmem:[#allocation1 + $0x1] ss:$2 sm:$0xff] %v2781_v0  ;;  %v648_v34 = vsel %vm41_vm0, %v2214_v57, %v2215_v59  ;;  %v652_v1 = vsel %vm44_vm1, %v3032_v8, %v2215_v59  ;;  %v240_v8 = vsel %vm4000_vm10, %v2139_v24, %v2140_v25  ;;  %v3215_v25 = vpop.permute.xlu2 %2227  ;;  %vm4003_vm10 = vcmask 637952  }
 0x1e8   :  { %1860 = vmatpush.msra.mxu0 %v324_v29  ;;  %v651_v14 = vsel %vm44_vm1, %v3030_v2, %v648_v34  ;;  %v2110_v2 = vunpack.i.h.bf16 %v2957_v43  ;;  %v2089_v43 = vunpack.i.l.bf16 %v2953_v40 }
 0x1e9   :  { %v2286_v6 = vpack.i.bf16 %v652_v1, %v651_v14 }
 0x1ea   :  { %1861 = vmatpush.msra.mxu0 %v296_v63  ;;  %v156_v20 = vsel %vm3997_vm13, %v2109_v37, %v2110_v2  ;;  %v100_v40 = vsel %vm3995_vm15, %v2089_v43, %v2090_v38  ;;  %vm883_vm15 = vcmask 556032   ;;  %vm4004_vm13 = vcmask 588800  }
 0x1eb   :  { %2287 = vrot.lane.b32.xlu2 %v2286_v6, %s2741_s15 }
 0x1ec   :  { %1862 = vmatpush.msra.mxu0 %v268_v32 }
 0x1ee   :  { %1863 = vmatpush.msra.mxu0 %v240_v8  ;;  %v866_v27 = vld.sshfl [vmem:[#allocation1] sm:$0xff pattern:$0x75316420]  ;;  %v867_v16 = vld.sshfl [vmem:[#allocation1 + $0x8] sm:$0xff pattern:$0x75316420] }
 0x1ef   :  { %887 = vst [vmem:[#allocation1] ss:$2 sm:$0xff] %v2781_v0  ;;  %v2291_v36 = vpack.i.bf16 %v867_v16, %v866_v27 }
 0x1f0   :  { %1864 = vmatpush.msra.mxu0 %v212_v42 }
 0x1f2   :  { %1865 = vmatpush.msra.mxu0 %v184_v33 }
 0x1f3   :  { %v2223_v53 = vpop.permute.xlu0 %2222  ;;  %2292 = vrot.lane.b32.xlu2 %v2291_v36, %s2719_s1  ;;  %v2233_v63 = vpop.permute.xlu2 %2232 }
 0x1f4   :  { %v2225_v5 = vunpack.i.h.bf16 %v2223_v53  ;;  %v2224_v46 = vunpack.i.l.bf16 %v2223_v53  ;;  %1866 = vmatpush.msra.mxu0 %v156_v20  ;;  %v2235_v14 = vunpack.i.h.bf16 %v2233_v63  ;;  %v2234_v15 = vunpack.i.l.bf16 %v2233_v63 }
 0x1f6   :  { %v676_v54 = vsel %vm41_vm0, %v2224_v46, %v2225_v5  ;;  %1867 = vmatpush.msra.mxu0 %v128_v18  ;;  %v680_v55 = vsel %vm44_vm1, %v3042_v9, %v2225_v5  ;;  %v3195_v11 = vld.sshfl [vmem:[#allocation1] sm:$0xff pattern:$0x75316420]  ;;  %v3197_v47 = vld.sshfl [vmem:[#allocation1 + $0x8] sm:$0xff pattern:$0x75316420]  ;;  %v45_v9 = vsel %vm44_vm1, %v2781_v0, %v42_v50  ;;  %v704_v3 = vsel %vm41_vm0, %v2234_v15, %v2235_v14 }
 0x1f7   :  { %v679_v56 = vsel %vm44_vm1, %v3040_v61, %v676_v54  ;;  %893 = vst [vmem:[#allocation1 + $0x1] ss:$2 sm:$0xff] %v2781_v0  ;;  %v708_v32 = vsel %vm44_vm1, %v3049_v35, %v2235_v14  ;;  %v707_v6 = vsel %vm44_vm1, %v3047_v17, %v704_v3 }
 0x1f8   :  { %1868 = vmatpush.msra.mxu0 %v100_v40  ;;  %v2296_v28 = vpack.i.bf16 %v680_v55, %v679_v56  ;;  %v2306_v7 = vpack.i.bf16 %v708_v32, %v707_v6 }
 0x1fa   :  { %1869 = vmatpush.msra.mxu0 %v72_v30  ;;  %2297 = vrot.lane.b32.xlu1 %v2296_v28, %s2742_s16 }
 0x1fb   :  { %2307 = vrot.lane.b32.xlu0 %v2306_v7, %s2743_s0 }
 0x1fc   :  { %1870 = vmatpush.msra.mxu0 %v45_v9 }
 0x1fe   :  { %v894_v61 = vld.sshfl [vmem:[#allocation1] sm:$0xff pattern:$0x75316420]  ;;  %v895_v58 = vld.sshfl [vmem:[#allocation1 + $0x8] sm:$0xff pattern:$0x75316420] }
 0x1ff   :  { %v2301_v29 = vpack.i.bf16 %v895_v58, %v894_v61  ;;  %919 = vst [vmem:[#allocation1 + $0x1] ss:$2 sm:$0xff] %v3210_v45 }
 0x202   :  { %2302 = vrot.lane.b32.xlu1 %v2301_v29, %s2719_s1 }
 0x206   :  { %v920_v59 = vld.sshfl [vmem:[#allocation1] sm:$0xff pattern:$0x75316420]  ;;  %v921_v57 = vld.sshfl [vmem:[#allocation1 + $0x8] sm:$0xff pattern:$0x75316420] }
 0x207   :  { %930 = vst [vmem:[#allocation1] ss:$2 sm:$0xff] %v3210_v45  ;;  %v2311_v37 = vpack.i.bf16 %v921_v57, %v920_v59 }
 0x209   :  { %2312 = vrot.lane.b32.xlu0 %v2311_v37, %s2719_s1 }
 0x20c   :  { %v3241_v10 = vpop.permute.xlu1 %2237 }
 0x20e   :  { %v3217_v0 = vld.sshfl [vmem:[#allocation1] sm:$0xff pattern:$0x75316420]  ;;  %v3219_v24 = vld.sshfl [vmem:[#allocation1 + $0x8] sm:$0xff pattern:$0x75316420] }
 0x20f   :  { %936 = vst [vmem:[#allocation1 + $0x1] ss:$2 sm:$0xff] %v3210_v45 }
 0x214   :  { %v2243_v40 = vpop.permute.xlu1 %2242 }
 0x215   :  { %v3236_v35 = vpop.permute.xlu2 %2257  ;;  %v2245_v55 = vunpack.i.h.bf16 %v2243_v40  ;;  %v2244_v30 = vunpack.i.l.bf16 %v2243_v40 }
 0x216   :  { %v937_v34 = vld.sshfl [vmem:[#allocation1] sm:$0xff pattern:$0x75316420]  ;;  %v938_v1 = vld.sshfl [vmem:[#allocation1 + $0x8] sm:$0xff pattern:$0x75316420] }
 0x217   :  { %957 = vst [vmem:[#allocation1] ss:$2 sm:$0xff] %v3210_v45  ;;  %v2321_v2 = vpack.i.bf16 %v938_v1, %v937_v34 }
 0x219   :  { %2322 = vrot.lane.b32.xlu1 %v2321_v2, %s2719_s1  ;;  %v3239_v27 = vpop.permute.xlu0 %2247 }
 0x21e   :  { %v3229_v41 = vld.sshfl [vmem:[#allocation1] sm:$0xff pattern:$0x75316420]  ;;  %v3231_v8 = vld.sshfl [vmem:[#allocation1 + $0x8] sm:$0xff pattern:$0x75316420] }
 0x21f   :  { %963 = vst [vmem:[#allocation1 + $0x1] ss:$2 sm:$0xff] %v3210_v45 }
 0x222   :  { %v2263_v36 = vpop.permute.xlu2 %2262 }
 0x223   :  { %v2265_v38 = vunpack.i.h.bf16 %v2263_v36  ;;  %v2264_v43 = vunpack.i.l.bf16 %v2263_v36  ;;  %v2253_v20 = vpop.permute.xlu0 %2252 }
 0x224   :  { %v2255_v52 = vunpack.i.h.bf16 %v2253_v20  ;;  %v2254_v48 = vunpack.i.l.bf16 %v2253_v20 }
 0x225   :  { %v788_v19 = vsel %vm41_vm0, %v2264_v43, %v2265_v38  ;;  %v792_v53 = vsel %vm44_vm1, %v3090_v12, %v2265_v38 }
 0x226   :  { %v964_v42 = vld.sshfl [vmem:[#allocation1] sm:$0xff pattern:$0x75316420]  ;;  %v965_v17 = vld.sshfl [vmem:[#allocation1 + $0x8] sm:$0xff pattern:$0x75316420]  ;;  %v791_v18 = vsel %vm44_vm1, %v3088_v22, %v788_v19  ;;  %v760_v13 = vsel %vm41_vm0, %v2254_v48, %v2255_v52  ;;  %v764_v46 = vsel %vm44_vm1, %v3070_v51, %v2255_v52  ;;  %v732_v22 = vsel %vm41_vm0, %v2244_v30, %v2245_v55 }
 0x227   :  { %984 = vst [vmem:[#allocation1] ss:$2 sm:$0xff] %v3210_v45  ;;  %v2331_v16 = vpack.i.bf16 %v965_v17, %v964_v42  ;;  %v2336_v5 = vpack.i.bf16 %v792_v53, %v791_v18  ;;  %v763_v54 = vsel %vm44_vm1, %v3068_v49, %v760_v13  ;;  %v736_v51 = vsel %vm44_vm1, %v3057_v4, %v2245_v55 }
 0x228   :  { %v2326_v56 = vpack.i.bf16 %v764_v46, %v763_v54  ;;  %v735_v49 = vsel %vm44_vm1, %v3055_v21, %v732_v22 }
 0x229   :  { %2332 = vrot.lane.b32.xlu0 %v2331_v16, %s2719_s1  ;;  %v2316_v50 = vpack.i.bf16 %v736_v51, %v735_v49 }
 0x22a   :  { %2327 = vrot.lane.b32.xlu1 %v2326_v56, %s2745_s20 }
 0x22b   :  { %2317 = vrot.lane.b32.xlu2 %v2316_v50, %s2746_s17 }
 0x22e   :  { %v3244_v26 = vld.sshfl [vmem:[#allocation1] sm:$0xff pattern:$0x75316420]  ;;  %v3246_v33 = vld.sshfl [vmem:[#allocation1 + $0x8] sm:$0xff pattern:$0x75316420] }
 0x22f   :  { %990 = vst [vmem:[#allocation1 + $0x1] ss:$2 sm:$0xff] %v3210_v45 }
 0x231   :  { %2337 = vrot.lane.b32.xlu0 %v2336_v5, %s2744_s19 }
 0x236   :  { %v991_v12 = vld.sshfl [vmem:[#allocation1] sm:$0xff pattern:$0x75316420]  ;;  %v992_v28 = vld.sshfl [vmem:[#allocation1 + $0x8] sm:$0xff pattern:$0x75316420]  ;;  %v3284_v32 = vpop.permute.xlu0 %2277 }
 0x237   :  { %1011 = vst [vmem:[#allocation1] ss:$2 sm:$0xff] %v3210_v45  ;;  %v2341_v29 = vpack.i.bf16 %v992_v28, %v991_v12 }
 0x239   :  { %2342 = vrot.lane.b32.xlu2 %v2341_v29, %s2719_s1 }
 0x23c   :  { %v3268_v9 = vpop.permute.xlu1 %2267 }
 0x23e   :  { %v3270_v61 = vld.sshfl [vmem:[#allocation1] sm:$0xff pattern:$0x75316420]  ;;  %v3272_v58 = vld.sshfl [vmem:[#allocation1 + $0x8] sm:$0xff pattern:$0x75316420] }
 0x23f   :  { %1017 = vst [vmem:[#allocation1 + $0x1] ss:$2 sm:$0xff] %v3210_v45 }
 0x244   :  { %v2273_v59 = vpop.permute.xlu1 %2272 }
 0x245   :  { %v2275_v4 = vunpack.i.h.bf16 %v2273_v59  ;;  %v2274_v57 = vunpack.i.l.bf16 %v2273_v59  ;;  %v3276_v63 = vpop.permute.xlu2 %2287 }
 0x246   :  { %v1018_v21 = vld.sshfl [vmem:[#allocation1] sm:$0xff pattern:$0x75316420]  ;;  %v1019_v34 = vld.sshfl [vmem:[#allocation1 + $0x8] sm:$0xff pattern:$0x75316420] }
 0x247   :  { %1038 = vst [vmem:[#allocation1] ss:$2 sm:$0xff] %v3210_v45  ;;  %v2351_v1 = vpack.i.bf16 %v1019_v34, %v1018_v21  ;;  %v816_v14 = vsel %vm41_vm0, %v2274_v57, %v2275_v4  ;;  %v820_v15 = vsel %vm44_vm1, %v3113_v31, %v2275_v4 }
 0x248   :  { %v819_v3 = vsel %vm44_vm1, %v3111_v44, %v816_v14 }
 0x249   :  { %2352 = vrot.lane.b32.xlu1 %v2351_v1, %s2719_s1  ;;  %v2346_v6 = vpack.i.bf16 %v820_v15, %v819_v3 }
 0x24b   :  { %2347 = vrot.lane.b32.xlu2 %v2346_v6, %s2747_s18 }
 0x24d   :  { %v2293_v37 = vpop.permute.xlu2 %2292 }
 0x24e   :  { %v3288_v7 = vld.sshfl [vmem:[#allocation1] sm:$0xff pattern:$0x75316420]  ;;  %v3290_v2 = vld.sshfl [vmem:[#allocation1 + $0x8] sm:$0xff pattern:$0x75316420]  ;;  %v2295_v42 = vunpack.i.h.bf16 %v2293_v37  ;;  %v2294_v31 = vunpack.i.l.bf16 %v2293_v37 }
 0x24f   :  { %1044 = vst [vmem:[#allocation1 + $0x1] ss:$2 sm:$0xff] %v3210_v45 }
 0x250   :  { %v872_v52 = vsel %vm41_vm0, %v2294_v31, %v2295_v42  ;;  %v876_v13 = vsel %vm44_vm1, %v3158_v39, %v2295_v42 }
 0x251   :  { %v875_v18 = vsel %vm44_vm1, %v3156_v62, %v872_v52 }
 0x253   :  { %v2283_v17 = vpop.permute.xlu0 %2282 }
 0x254   :  { %v2285_v16 = vunpack.i.h.bf16 %v2283_v17  ;;  %v2284_v44 = vunpack.i.l.bf16 %v2283_v17 }
 0x256   :  { %v1045_v36 = vld.sshfl [vmem:[#allocation1] sm:$0xff pattern:$0x75316420]  ;;  %v1046_v38 = vld.sshfl [vmem:[#allocation1 + $0x8] sm:$0xff pattern:$0x75316420]  ;;  %v844_v43 = vsel %vm41_vm0, %v2284_v44, %v2285_v16  ;;  %v848_v20 = vsel %vm44_vm1, %v3132_v60, %v2285_v16  ;;  %v2366_v60 = vpack.i.bf16 %v876_v13, %v875_v18 }
 0x257   :  { %v2361_v19 = vpack.i.bf16 %v1046_v38, %v1045_v36  ;;  %1065 = vst [vmem:[#allocation1] ss:$2 sm:$0xff] %v3210_v45  ;;  %v847_v48 = vsel %vm44_vm1, %v3130_v23, %v844_v43 }
 0x258   :  { %v2356_v53 = vpack.i.bf16 %v848_v20, %v847_v48 }
 0x259   :  { %2362 = vrot.lane.b32.xlu0 %v2361_v19, %s2719_s1 }
 0x25a   :  { %2357 = vrot.lane.b32.xlu1 %v2356_v53, %s2748_s10 }
 0x25e   :  { %v3306_v5 = vld.sshfl [vmem:[#allocation1] sm:$0xff pattern:$0x75316420]  ;;  %v3308_v46 = vld.sshfl [vmem:[#allocation1 + $0x8] sm:$0xff pattern:$0x75316420] }
 0x25f   :  { %1071 = vst [vmem:[#allocation1 + $0x1] ss:$2 sm:$0xff] %v3210_v45 }
 0x261   :  { %2367 = vrot.lane.b32.xlu0 %v2366_v60, %s2749_s9 }
 0x266   :  { %v1072_v23 = vld.sshfl [vmem:[#allocation1] sm:$0xff pattern:$0x75316420]  ;;  %v1073_v40 = vld.sshfl [vmem:[#allocation1 + $0x8] sm:$0xff pattern:$0x75316420] }
 0x267   :  { %v2371_v54 = vpack.i.bf16 %v1073_v40, %v1072_v23  ;;  %1092 = vst [vmem:[#allocation1] ss:$2 sm:$0xff] %v3210_v45 }
 0x269   :  { %2372 = vrot.lane.b32.xlu2 %v2371_v54, %s2719_s1 }
 0x26c   :  { %v3314_v62 = vpop.permute.xlu1 %2297 }
 0x26d   :  { %v3357_v3 = vpop.permute.xlu0 %2307 }
 0x26e   :  { %v3316_v39 = vld.sshfl [vmem:[#allocation1] sm:$0xff pattern:$0x75316420]  ;;  %v3318_v55 = vld.sshfl [vmem:[#allocation1 + $0x8] sm:$0xff pattern:$0x75316420] }
 0x26f   :  { %4018 = vst [vmem:[#allocation10_spill] sm:$0xff] %v3316_v39 }
 0x270   :  { %1098 = vst [vmem:[#allocation1 + $0x1] ss:$2 sm:$0xff] %v3210_v45 }
 0x274   :  { %v2303_v30 = vpop.permute.xlu1 %2302 }
 0x275   :  { %v2305_v56 = vunpack.i.h.bf16 %v2303_v30  ;;  %v2304_v12 = vunpack.i.l.bf16 %v2303_v30 }
 0x277   :  { %v3321_v28 = vld.sshfl [vmem:[#allocation1] sm:$0xff pattern:$0x75316420]  ;;  %v3323_v22 = vld.sshfl [vmem:[#allocation1 + $0x8] sm:$0xff pattern:$0x75316420]  ;;  %v900_v51 = vsel %vm41_vm0, %v2304_v12, %v2305_v56  ;;  %v904_v49 = vsel %vm44_vm1, %v3197_v47, %v2305_v56 }
 0x278   :  { %1119 = vst [vmem:[#allocation1] ss:$2 sm:$0xff] %v3210_v45  ;;  %v903_v50 = vsel %vm44_vm1, %v3195_v11, %v900_v51 }
 0x279   :  { %v2376_v29 = vpack.i.bf16 %v904_v49, %v903_v50 }
 0x27b   :  { %2377 = vrot.lane.b32.xlu2 %v2376_v29, %s2750_s12  ;;  %v3366_v31 = vpop.permute.xlu0 %2312 }
 0x27c   :  { %4022 = vst [vmem:[#allocation14_spill] sm:$0xff] %v3366_v31 }
 0x27f   :  { %v3332_v59 = vld.sshfl [vmem:[#allocation1] sm:$0xff pattern:$0x75316420]  ;;  %v3334_v4 = vld.sshfl [vmem:[#allocation1 + $0x8] sm:$0xff pattern:$0x75316420] }
 0x280   :  { %4019 = vst [vmem:[#allocation11_spill] sm:$0xff] %v3332_v59 }
 0x281   :  { %1125 = vst [vmem:[#allocation1 + $0x1] ss:$2 sm:$0xff] %v3210_v45 }
 0x285   :  { %v3364_v42 = vpop.permute.xlu2 %2317 }
 0x288   :  { %v3337_v57 = vld.sshfl [vmem:[#allocation1] sm:$0xff pattern:$0x75316420]  ;;  %v3339_v21 = vld.sshfl [vmem:[#allocation1 + $0x8] sm:$0xff pattern:$0x75316420] }
 0x289   :  { %1146 = vst [vmem:[#allocation1] ss:$2 sm:$0xff] %v3210_v45 }
 0x28b   :  { %v2323_v44 = vpop.permute.xlu1 %2322 }
 0x28c   :  { %v2325_v30 = vunpack.i.h.bf16 %v2323_v44  ;;  %v2324_v56 = vunpack.i.l.bf16 %v2323_v44 }
 0x290   :  { %v3342_v47 = vld.sshfl [vmem:[#allocation1] sm:$0xff pattern:$0x75316420]  ;;  %v3344_v34 = vld.sshfl [vmem:[#allocation1 + $0x8] sm:$0xff pattern:$0x75316420] }
 0x291   :  { %1152 = vst [vmem:[#allocation1 + $0x1] ss:$2 sm:$0xff] %v3210_v45 }
 0x293   :  { %v3375_v38 = vpop.permute.xlu2 %2342 }
 0x294   :  { %v2345_v49 = vunpack.i.h.bf16 %v3375_v38  ;;  %v2344_v50 = vunpack.i.l.bf16 %v3375_v38 }
 0x296   :  { %v997_v44 = vsel %vm41_vm0, %v2344_v50, %v2345_v49 }
 0x298   :  { %v3347_v11 = vld.sshfl [vmem:[#allocation1] sm:$0xff pattern:$0x75316420]  ;;  %v3349_v1 = vld.sshfl [vmem:[#allocation1 + $0x8] sm:$0xff pattern:$0x75316420] }
 0x299   :  { %1173 = vst [vmem:[#allocation1] ss:$2 sm:$0xff] %v3210_v45 }
 0x29b   :  { %v2333_v43 = vpop.permute.xlu0 %2332 }
 0x29c   :  { %v3380_v19 = vpop.permute.xlu1 %2327  ;;  %v2335_v29 = vunpack.i.h.bf16 %v2333_v43  ;;  %v2334_v31 = vunpack.i.l.bf16 %v2333_v43 }
 0x2a0   :  { %v3352_v14 = vld.sshfl [vmem:[#allocation1] sm:$0xff pattern:$0x75316420]  ;;  %v3354_v15 = vld.sshfl [vmem:[#allocation1 + $0x8] sm:$0xff pattern:$0x75316420] }
 0x2a1   :  { %4020 = vst [vmem:[#allocation12_spill] sm:$0xff] %v3352_v14  ;;  %v2381_v14 = vpack.i.bf16 %v3323_v22, %v3321_v28  ;;  %v947_v22 = vsel %vm44_vm1, %v3219_v24, %v2325_v30  ;;  %v1000_v24 = vsel %vm44_vm1, %v3244_v26, %v997_v44  ;;  %v2319_v26 = vunpack.i.l.bf16 %v3364_v42 }
 0x2a2   :  { %4021 = vst [vmem:[#allocation13_spill] sm:$0xff] %v3354_v15 }
 0x2a3   :  { %1179 = vst [vmem:[#allocation1 + $0x1] ss:$2 sm:$0xff] %v3210_v45  ;;  %v3388_v18 = vpop.permute.xlu0 %2337  ;;  %2382 = vrot.lane.b32.xlu1 %v2381_v14, %s2719_s1  ;;  %v1001_v14 = vsel %vm44_vm1, %v3246_v33, %v2345_v49 }
 0x2a4   :  { %v2340_v39 = vunpack.i.h.bf16 %v3388_v18  ;;  %v2339_v28 = vunpack.i.l.bf16 %v3388_v18  ;;  %v2320_v18 = vunpack.i.h.bf16 %v3364_v42  ;;  %v2411_v33 = vpack.i.bf16 %v1001_v14, %v1000_v24 }
 0x2a5   :  { %v3386_v53 = vpop.permute.xlu2 %2347  ;;  %v2240_v24 = vunpack.i.h.bf16 %v3241_v10 }
 0x2a6   :  { %v2350_v43 = vunpack.i.h.bf16 %v3386_v53  ;;  %v744_v42 = vsel %vm4003_vm10, %v2319_v26, %v2320_v18  ;;  %vm4006_vm10 = vcmask 687104  }
 0x2aa   :  { %v3359_v6 = vld.sshfl [vmem:[#allocation1] sm:$0xff pattern:$0x75316420]  ;;  %v3361_v37 = vld.sshfl [vmem:[#allocation1 + $0x8] sm:$0xff pattern:$0x75316420] }
 0x2ab   :  { %1200 = vst [vmem:[#allocation1] ss:$2 sm:$0xff] %v3210_v45 }
 0x2b2   :  { %v3368_v17 = vld.sshfl [vmem:[#allocation1] sm:$0xff pattern:$0x75316420]  ;;  %v3370_v16 = vld.sshfl [vmem:[#allocation1 + $0x8] sm:$0xff pattern:$0x75316420] }
 0x2b3   :  { %4023 = vst [vmem:[#allocation15_spill] sm:$0xff] %v3368_v17 }
 0x2b4   :  { %4024 = vst [vmem:[#allocation16_spill] sm:$0xff] %v3370_v16 }
 0x2b5   :  { %1206 = vst [vmem:[#allocation1 + $0x1] ss:$2 sm:$0xff] %v3210_v45 }
 0x2bb   :  { %v3395_v23 = vpop.permute.xlu1 %2352 }
 0x2bc   :  { %v3373_v36 = vld.sshfl [vmem:[#allocation1] sm:$0xff pattern:$0x75316420]  ;;  %v3377_v20 = vld.sshfl [vmem:[#allocation1 + $0x8] sm:$0xff pattern:$0x75316420] }
 0x2bd   :  { %4025 = vst [vmem:[#allocation17_spill] sm:$0xff] %v3377_v20 }
 0x2be   :  { %1227 = vst [vmem:[#allocation1] ss:$2 sm:$0xff] %v3210_v45 }
 0x2c3   :  { %v3398_v40 = vpop.permute.xlu2 %2372 }
 0x2c5   :  { %v3382_v52 = vld.sshfl [vmem:[#allocation1] sm:$0xff pattern:$0x75316420]  ;;  %v3384_v48 = vld.sshfl [vmem:[#allocation1 + $0x8] sm:$0xff pattern:$0x75316420] }
 0x2c6   :  { %4026 = vst [vmem:[#allocation18_spill] sm:$0xff] %v3382_v52  ;;  %v943_v52 = vsel %vm41_vm0, %v2324_v56, %v2325_v30  ;;  %v2349_v56 = vunpack.i.l.bf16 %v3386_v53 }
 0x2c7   :  { %4027 = vst [vmem:[#allocation19_spill] sm:$0xff] %v3384_v48 }
 0x2c8   :  { %1233 = vst [vmem:[#allocation1 + $0x1] ss:$2 sm:$0xff] %v3210_v45  ;;  %v828_v53 = vsel %vm4004_vm13, %v2349_v56, %v2350_v43  ;;  %v2290_v43 = vunpack.i.h.bf16 %v3276_v63  ;;  %v2280_v56 = vunpack.i.h.bf16 %v3284_v32  ;;  %vm4008_vm13 = vcmask 703488  }
 0x2cb   :  { %v3400_v54 = vpop.permute.xlu0 %2362 }
 0x2cc   :  { %v2358_v17 = vpop.permute.xlu1 %2357 }
 0x2cd   :  { %v2360_v38 = vunpack.i.h.bf16 %v2358_v17  ;;  %v2359_v15 = vunpack.i.l.bf16 %v2358_v17 }
 0x2cf   :  { %v3391_v13 = vld.sshfl [vmem:[#allocation1] sm:$0xff pattern:$0x75316420]  ;;  %v3393_v60 = vld.sshfl [vmem:[#allocation1 + $0x8] sm:$0xff pattern:$0x75316420] }
 0x2d0   :  { %4028 = vst [vmem:[#allocation20_spill] sm:$0xff] %v3391_v13 }
 0x2d1   :  { %4029 = vst [vmem:[#allocation21_spill] sm:$0xff] %v3393_v60 }
 0x2d2   :  { %1254 = vst [vmem:[#allocation1] ss:$2 sm:$0xff] %v3210_v45 }
 0x2d3   :  { %v2368_v16 = vpop.permute.xlu0 %2367 }
 0x2d4   :  { %v2370_v48 = vunpack.i.h.bf16 %v2368_v16  ;;  %v2369_v13 = vunpack.i.l.bf16 %v2368_v16  ;;  %v2386_v16 = vpack.i.bf16 %v3339_v21, %v3337_v57  ;;  %v856_v57 = vsel %vm3999_vm14, %v2359_v15, %v2360_v38 }
 0x2d5   :  { %v2378_v60 = vpop.permute.xlu2 %2377  ;;  %v974_v21 = vsel %vm44_vm1, %v3231_v8, %v2335_v29  ;;  %v2329_v15 = vunpack.i.l.bf16 %v3380_v19  ;;  %vm4002_vm14 = vcmask 621568  }
 0x2d6   :  { %v2379_v20 = vunpack.i.l.bf16 %v2378_v60  ;;  %v884_v50 = vsel %vm883_vm15, %v2369_v13, %v2370_v48  ;;  %2387 = vrot.lane.b32.xlu0 %v2386_v16, %s2719_s1  ;;  %v2375_v48 = vunpack.i.h.bf16 %v3398_v40  ;;  %v800_v13 = vsel %vm4001_vm11, %v2339_v28, %v2340_v39 }
 0x2d7   :  { %vm4005_vm11 = vcmask 654336   ;;  %v2300_v39 = vunpack.i.h.bf16 %v3314_v62 }
 0x2d8   :  { %v1082_v38 = vsel %vm44_vm1, %v3308_v46, %v2375_v48 }
 0x2d9   :  { %v3402_v12 = vld.sshfl [vmem:[#allocation1] sm:$0xff pattern:$0x75316420]  ;;  %v3404_v51 = vld.sshfl [vmem:[#allocation1 + $0x8] sm:$0xff pattern:$0x75316420] }
 0x2da   :  { %4030 = vst [vmem:[#allocation22_spill] sm:$0xff] %v3402_v12  ;;  %v970_v12 = vsel %vm41_vm0, %v2334_v31, %v2335_v29 }
 0x2db   :  { %4031 = vst [vmem:[#allocation23_spill] sm:$0xff] %v3404_v51  ;;  %v2380_v51 = vunpack.i.h.bf16 %v2378_v60  ;;  %v946_v60 = vsel %vm44_vm1, %v3217_v0, %v943_v52  ;;  %v973_v0 = vsel %vm44_vm1, %v3229_v41, %v970_v12  ;;  %v2330_v52 = vunpack.i.h.bf16 %v3380_v19 }
 0x2dc   :  { %1260 = vst [vmem:[#allocation1 + $0x1] ss:$2 sm:$0xff] %v3210_v45  ;;  %v2374_v41 = vunpack.i.l.bf16 %v3398_v40  ;;  %v2401_v8 = vpack.i.bf16 %v974_v21, %v973_v0  ;;  %v2310_v19 = vunpack.i.h.bf16 %v3357_v3  ;;  %v2309_v40 = vunpack.i.l.bf16 %v3357_v3 }
 0x2dd   :  { %v912_v31 = vsel %vm911_vm12, %v2379_v20, %v2380_v51  ;;  %v2391_v20 = vpack.i.bf16 %v947_v22, %v946_v60  ;;  %v772_v12 = vsel %vm4002_vm14, %v2329_v15, %v2330_v52  ;;  %v2396_v51 = vpack.i.bf16 %v3349_v1, %v3347_v11 }
 0x2de   :  { %1881 = vmatpush.msra.mxu1 %v912_v31  ;;  %v1078_v30 = vsel %vm41_vm0, %v2374_v41, %v2375_v48  ;;  %2402 = vrot.lane.b32.xlu1 %v2401_v8, %s2721_s22  ;;  %v2299_v3 = vunpack.i.l.bf16 %v3314_v62  ;;  %vm4007_vm14 = vcmask 670720   ;;  %v2365_v11 = vunpack.i.h.bf16 %v3400_v54  ;;  %s4053_s22 = smov 92  }
 0x2df   :  { %2392 = vrot.lane.b32.xlu2 %v2391_v20, %s2722_s23  ;;  %2412 = vrot.lane.b32.xlu0 %v2411_v33, %s2720_s21  ;;  %v2364_v1 = vunpack.i.l.bf16 %v3400_v54  ;;  %v1081_v44 = vsel %vm44_vm1, %v3306_v5, %v1078_v30  ;;  %v2289_v62 = vunpack.i.l.bf16 %v3276_v63  ;;  %v716_v16 = vsel %vm4005_vm11, %v2309_v40, %v2310_v19  ;;  %s4052_s21 = smov 96  }
 0x2e0   :  { %1882 = vmatpush.msra.mxu1 %v884_v50  ;;  %v2406_v54 = vpack.i.bf16 %v3361_v37, %v3359_v6  ;;  %v2279_v5 = vunpack.i.l.bf16 %v3284_v32  ;;  %v688_v31 = vsel %vm4007_vm14, %v2299_v3, %v2300_v39  ;;  %v2426_v46 = vpack.i.bf16 %v1082_v38, %v1081_v44 }
 0x2e1   :  { %v1051_v50 = vsel %vm41_vm0, %v2364_v1, %v2365_v11  ;;  %v2270_v63 = vunpack.i.h.bf16 %v3268_v9  ;;  %v2269_v60 = vunpack.i.l.bf16 %v3268_v9  ;;  %v660_v28 = vsel %vm4006_vm10, %v2289_v62, %v2290_v43 }
 0x2e2   :  { %1883 = vmatpush.msra.mxu1 %v856_v57  ;;  %v2260_v6 = vunpack.i.h.bf16 %v3236_v35  ;;  %vm603_vm11 = vcmask 719872   ;;  %v2259_v32 = vunpack.i.l.bf16 %v3236_v35  ;;  %v632_v37 = vsel %vm4008_vm13, %v2279_v5, %v2280_v56 }
 0x2e3   :  { %v3422_v59 = vld.sshfl [vmem:[#allocation1] sm:$0xff pattern:$0x75316420]  ;;  %v3424_v17 = vld.sshfl [vmem:[#allocation1 + $0x8] sm:$0xff pattern:$0x75316420]  ;;  %v1054_v9 = vsel %vm44_vm1, %v3288_v7, %v1051_v50  ;;  %v1055_v0 = vsel %vm44_vm1, %v3290_v2, %v2365_v11  ;;  %v2250_v21 = vunpack.i.h.bf16 %v3239_v27  ;;  %v2249_v20 = vunpack.i.l.bf16 %v3239_v27 }
 0x2e4   :  { %1281 = vst [vmem:[#allocation1] ss:$2 sm:$0xff] %v3210_v45  ;;  %1884 = vmatpush.msra.mxu1 %v828_v53  ;;  %vm4009_vm10 = vcmask 736256   ;;  %v604_v52 = vsel %vm603_vm11, %v2269_v60, %v2270_v63  ;;  %vm547_vm14 = vcmask 752640   ;;  %v2421_v35 = vpack.i.bf16 %v1055_v0, %v1054_v9 }
 0x2e5   :  { %v2239_v7 = vunpack.i.l.bf16 %v3241_v10  ;;  %v576_v14 = vsel %vm4009_vm10, %v2259_v32, %v2260_v6  ;;  %vm519_vm13 = vcmask 769024   ;;  %v548_v2 = vsel %vm547_vm14, %v2249_v20, %v2250_v21 }
 0x2e6   :  { %1885 = vmatpush.msra.mxu1 %v800_v13  ;;  %2407 = vrot.lane.b32.xlu1 %v2406_v54, %s2719_s1  ;;  %v2230_v27 = vunpack.i.h.bf16 %v3215_v25  ;;  %v2229_v41 = vunpack.i.l.bf16 %v3215_v25  ;;  %vm491_vm10 = vcmask 785408   ;;  %v2354_v11 = vunpack.i.l.bf16 %v3395_v23 }
 0x2e7   :  { %2397 = vrot.lane.b32.xlu2 %v2396_v51, %s2719_s1  ;;  %2427 = vrot.lane.b32.xlu0 %v2426_v46, %s2724_s25  ;;  %v520_v10 = vsel %vm519_vm13, %v2239_v7, %v2240_v24 }
 0x2e8   :  { %1886 = vmatpush.msra.mxu1 %v772_v12  ;;  %v492_v53 = vsel %vm491_vm10, %v2229_v41, %v2230_v27  ;;  %v4034_v27 = vld [vmem:[#allocation11_spill] sm:$0xff] }
 0x2ea   :  { %1887 = vmatpush.msra.mxu1 %v744_v42  ;;  %v2355_v42 = vunpack.i.h.bf16 %v3395_v23 }
 0x2eb   :  { %v3457_v49 = vld.sshfl [vmem:[#allocation1] sm:$0xff pattern:$0x75316420]  ;;  %v3459_v29 = vld.sshfl [vmem:[#allocation1 + $0x8] sm:$0xff pattern:$0x75316420] }
 0x2ec   :  { %1287 = vst [vmem:[#allocation1 + $0x1] ss:$2 sm:$0xff] %v3210_v45  ;;  %1888 = vmatpush.msra.mxu1 %v716_v16  ;;  %v1024_v38 = vsel %vm41_vm0, %v2354_v11, %v2355_v42  ;;  %v1028_v16 = vsel %vm44_vm1, %v3272_v58, %v2355_v42 }
 0x2ed   :  { %v1027_v62 = vsel %vm44_vm1, %v3270_v61, %v1024_v38 }
 0x2ee   :  { %1889 = vmatpush.msra.mxu1 %v688_v31  ;;  %2422 = vrot.lane.b32.xlu1 %v2421_v35, %s2725_s26  ;;  %v2416_v54 = vpack.i.bf16 %v1028_v16, %v1027_v62 }
 0x2f0   :  { %1890 = vmatpush.msra.mxu1 %v660_v28  ;;  %2417 = vrot.lane.b32.xlu2 %v2416_v54, %s2723_s24 }
 0x2f2   :  { %1891 = vmatpush.msra.mxu1 %v632_v37 }
 0x2f3   :  { %v1288_v22 = vld.sshfl [vmem:[#allocation1] sm:$0xff pattern:$0x75316420]  ;;  %v3486_v57 = vld.sshfl [vmem:[#allocation1 + $0x8] sm:$0xff pattern:$0x75316420] }
 0x2f4   :  { %1308 = vst [vmem:[#allocation1] ss:$2 sm:$0xff] %v3210_v45  ;;  %1892 = vmatpush.msra.mxu1 %v604_v52 }
 0x2f6   :  { %1893 = vmatpush.msra.mxu1 %v576_v14  ;;  %v4033_v14 = vld [vmem:[#allocation10_spill] sm:$0xff] }
 0x2f8   :  { %1894 = vmatpush.msra.mxu1 %v548_v2 }
 0x2fa   :  { %1895 = vmatpush.msra.mxu1 %v520_v10 }
 0x2fb   :  { %v3505_v15 = vld.sshfl [vmem:[#allocation1] sm:$0xff pattern:$0x75316420]  ;;  %v3507_v48 = vld.sshfl [vmem:[#allocation1 + $0x8] sm:$0xff pattern:$0x75316420] }
 0x2fc   :  { %1314 = vst [vmem:[#allocation1 + $0x1] ss:$2 sm:$0xff] %v3210_v45  ;;  %1896 = vmatpush.msra.mxu1 %v492_v53 }
 0x303   :  { %v1316_v8 = vld.sshfl [vmem:[#allocation1 + $0x8] sm:$0xff pattern:$0x75316420]  ;;  %v1315_v18 = vld.sshfl [vmem:[#allocation1] sm:$0xff pattern:$0x75316420] }
 0x304   :  { %1335 = vst [vmem:[#allocation1] ss:$2 sm:$0xff] %v3210_v45  ;;  %v2441_v30 = vpack.i.bf16 %v1288_v22, %v1316_v8  ;;  %v2436_v43 = vpack.i.bf16 %v1315_v18, %v3373_v36 }
 0x306   :  { %2442 = vrot.lane.b32.xlu1 %v2441_v30, %s2719_s1  ;;  %2437 = vrot.lane.b32.xlu0 %v2436_v43, %s2719_s1 }
 0x30b   :  { %v3516_v26 = vld.sshfl [vmem:[#allocation1] sm:$0xff pattern:$0x75316420]  ;;  %v3518_v13 = vld.sshfl [vmem:[#allocation1 + $0x8] sm:$0xff pattern:$0x75316420] }
 0x30c   :  { %1341 = vst [vmem:[#allocation1 + $0x1] ss:$2 sm:$0xff] %v3210_v45 }
 0x313   :  { %v3521_v33 = vld.sshfl [vmem:[#allocation1] sm:$0xff pattern:$0x75316420]  ;;  %v3523_v25 = vld.sshfl [vmem:[#allocation1 + $0x8] sm:$0xff pattern:$0x75316420] }
 0x314   :  { %1362 = vst [vmem:[#allocation1] ss:$2 sm:$0xff] %v3210_v45 }
 0x315   :  { %v2383_v9 = vpop.permute.xlu1 %2382 }
 0x316   :  { %v2385_v0 = vunpack.i.h.bf16 %v2383_v9  ;;  %v2384_v21 = vunpack.i.l.bf16 %v2383_v9 }
 0x318   :  { %v1105_v35 = vsel %vm41_vm0, %v2384_v21, %v2385_v0 }
 0x319   :  { %v1108_v2 = vsel %vm44_vm1, %v4033_v14, %v1105_v35 }
 0x31b   :  { %v3526_v19 = vld.sshfl [vmem:[#allocation1] sm:$0xff pattern:$0x75316420]  ;;  %v3528_v40 = vld.sshfl [vmem:[#allocation1 + $0x8] sm:$0xff pattern:$0x75316420] }
 0x31c   :  { %1368 = vst [vmem:[#allocation1 + $0x1] ss:$2 sm:$0xff] %v3210_v45 }
 0x323   :  { %v3531_v12 = vld.sshfl [vmem:[#allocation1] sm:$0xff pattern:$0x75316420]  ;;  %v3533_v51 = vld.sshfl [vmem:[#allocation1 + $0x8] sm:$0xff pattern:$0x75316420] }
 0x324   :  { %1389 = vst [vmem:[#allocation1] ss:$2 sm:$0xff] %v3210_v45 }
 0x32b   :  { %v3537_v39 = vld.sshfl [vmem:[#allocation1] sm:$0xff pattern:$0x75316420]  ;;  %v3539_v3 = vld.sshfl [vmem:[#allocation1 + $0x8] sm:$0xff pattern:$0x75316420] }
 0x32c   :  { %1395 = vst [vmem:[#allocation1 + $0x1] ss:$2 sm:$0xff] %v3210_v45 }
 0x333   :  { %v3544_v1 = vld.sshfl [vmem:[#allocation1] sm:$0xff pattern:$0x75316420]  ;;  %v3546_v44 = vld.sshfl [vmem:[#allocation1 + $0x8] sm:$0xff pattern:$0x75316420] }
 0x334   :  { %1416 = vst [vmem:[#allocation1] ss:$2 sm:$0xff] %v3210_v45 }
 0x339   :  { %v3562_v5 = vpop.permute.xlu2 %2392 }
 0x33a   :  { %4032 = vst [vmem:[#allocation24_spill] sm:$0xff] %v3562_v5 }
 0x33b   :  { %v3555_v56 = vld.sshfl [vmem:[#allocation1] sm:$0xff pattern:$0x75316420]  ;;  %v3557_v23 = vld.sshfl [vmem:[#allocation1 + $0x8] sm:$0xff pattern:$0x75316420] }
 0x33c   :  { %1422 = vst [vmem:[#allocation1 + $0x1] ss:$2 sm:$0xff] %v3210_v45 }
 0x341   :  { %v2398_v61 = vpop.permute.xlu2 %2397 }
 0x342   :  { %v2400_v58 = vunpack.i.h.bf16 %v2398_v61  ;;  %v2399_v46 = vunpack.i.l.bf16 %v2398_v61 }
 0x343   :  { %v3564_v36 = vld.sshfl [vmem:[#allocation1] sm:$0xff pattern:$0x75316420]  ;;  %v3566_v31 = vld.sshfl [vmem:[#allocation1 + $0x8] sm:$0xff pattern:$0x75316420] }
 0x344   :  { %1443 = vst [vmem:[#allocation1] ss:$2 sm:$0xff] %v3210_v45  ;;  %v1159_v60 = vsel %vm41_vm0, %v2399_v46, %v2400_v58  ;;  %v1163_v28 = vsel %vm44_vm1, %v3344_v34, %v2400_v58 }
 0x345   :  { %v1162_v22 = vsel %vm44_vm1, %v3342_v47, %v1159_v60  ;;  %v1109_v47 = vsel %vm44_vm1, %v3318_v55, %v2385_v0  ;;  %v4036_v60 = vld [vmem:[#allocation12_spill] sm:$0xff] }
 0x346   :  { %v2451_v6 = vpack.i.bf16 %v1163_v28, %v1162_v22  ;;  %v2431_v10 = vpack.i.bf16 %v1109_v47, %v1108_v2  ;;  %v4037_v22 = vld [vmem:[#allocation13_spill] sm:$0xff] }
 0x348   :  { %2452 = vrot.lane.b32.xlu0 %v2451_v6, %s2727_s28  ;;  %v2388_v20 = vpop.permute.xlu0 %2387  ;;  %2432 = vrot.lane.b32.xlu2 %v2431_v10, %s2726_s27 }
 0x349   :  { %v2390_v52 = vunpack.i.h.bf16 %v2388_v20  ;;  %v2389_v34 = vunpack.i.l.bf16 %v2388_v20 }
 0x34b   :  { %v3569_v50 = vld.sshfl [vmem:[#allocation1] sm:$0xff pattern:$0x75316420]  ;;  %v3571_v63 = vld.sshfl [vmem:[#allocation1 + $0x8] sm:$0xff pattern:$0x75316420]  ;;  %v1132_v24 = vsel %vm41_vm0, %v2389_v34, %v2390_v52  ;;  %v1136_v7 = vsel %vm44_vm1, %v3334_v4, %v2390_v52 }
 0x34c   :  { %1449 = vst [vmem:[#allocation1 + $0x1] ss:$2 sm:$0xff] %v3210_v45  ;;  %v1135_v41 = vsel %vm44_vm1, %v4034_v27, %v1132_v24 }
 0x34d   :  { %v2446_v18 = vpack.i.bf16 %v1136_v7, %v1135_v41 }
 0x34f   :  { %2447 = vrot.lane.b32.xlu1 %v2446_v18, %s2728_s29 }
 0x350   :  { %v3607_v30 = vpop.permute.xlu1 %2402 }
 0x351   :  { %4035 = vst [vmem:[#allocation10_spill] sm:$0xff] %v3607_v30 }
 0x353   :  { %v3580_v32 = vld.sshfl [vmem:[#allocation1] sm:$0xff pattern:$0x75316420]  ;;  %v3582_v37 = vld.sshfl [vmem:[#allocation1 + $0x8] sm:$0xff pattern:$0x75316420] }
 0x354   :  { %1470 = vst [vmem:[#allocation1] ss:$2 sm:$0xff] %v3210_v45 }
 0x358   :  { %v2408_v38 = vpop.permute.xlu1 %2407 }
 0x359   :  { %v2410_v16 = vunpack.i.h.bf16 %v2408_v38  ;;  %v2409_v54 = vunpack.i.l.bf16 %v2408_v38 }
 0x35b   :  { %v3595_v53 = vld.sshfl [vmem:[#allocation1] sm:$0xff pattern:$0x75316420]  ;;  %v3597_v8 = vld.sshfl [vmem:[#allocation1 + $0x8] sm:$0xff pattern:$0x75316420]  ;;  %v1186_v61 = vsel %vm41_vm0, %v2409_v54, %v2410_v16  ;;  %v1190_v6 = vsel %vm44_vm1, %v4037_v22, %v2410_v16 }
 0x35c   :  { %1476 = vst [vmem:[#allocation1 + $0x1] ss:$2 sm:$0xff] %v3210_v45  ;;  %v1189_v28 = vsel %vm44_vm1, %v4036_v60, %v1186_v61 }
 0x35d   :  { %v2456_v9 = vpack.i.bf16 %v1190_v6, %v1189_v28 }
 0x35f   :  { %2457 = vrot.lane.b32.xlu2 %v2456_v9, %s2731_s5  ;;  %s1978_s5 = sshll.u32 %s3988_s3, 4  ;;  %s1979_s5 = int_to_ptr.hbm [resolvable:$true] %s1978_s5 }
 0x363   :  { %v3602_v55 = vld.sshfl [vmem:[#allocation1] sm:$0xff pattern:$0x75316420]  ;;  %v3604_v4 = vld.sshfl [vmem:[#allocation1 + $0x8] sm:$0xff pattern:$0x75316420] }
 0x364   :  { %1497 = vst [vmem:[#allocation1] ss:$2 sm:$0xff] %v3210_v45 }
 0x36b   :  { %v3609_v42 = vld.sshfl [vmem:[#allocation1] sm:$0xff pattern:$0x75316420]  ;;  %v3611_v11 = vld.sshfl [vmem:[#allocation1 + $0x8] sm:$0xff pattern:$0x75316420] }
 0x36c   :  { %1503 = vst [vmem:[#allocation1 + $0x1] ss:$2 sm:$0xff] %v3210_v45 }
 0x373   :  { %v1504_v43 = vld.sshfl [vmem:[#allocation1] sm:$0xff pattern:$0x75316420]  ;;  %v1505_v62 = vld.sshfl [vmem:[#allocation1 + $0x8] sm:$0xff pattern:$0x75316420] }
 0x374   :  { %1524 = vst [vmem:[#allocation1] ss:$2 sm:$0xff] %v3210_v45  ;;  %v2461_v18 = vpack.i.bf16 %v1505_v62, %v1504_v43 }
 0x376   :  { %2462 = vrot.lane.b32.xlu2 %v2461_v18, %s2719_s1 }
 0x37b   :  { %v3616_v58 = vld.sshfl [vmem:[#allocation1] sm:$0xff pattern:$0x75316420]  ;;  %v3618_v46 = vld.sshfl [vmem:[#allocation1 + $0x8] sm:$0xff pattern:$0x75316420] }
 0x37c   :  { %1530 = vst [vmem:[#allocation1 + $0x1] ss:$2 sm:$0xff] %v3210_v45 }
 0x383   :  { %v1531_v0 = vld.sshfl [vmem:[#allocation1] sm:$0xff pattern:$0x75316420]  ;;  %v1532_v21 = vld.sshfl [vmem:[#allocation1 + $0x8] sm:$0xff pattern:$0x75316420] }
 0x384   :  { %v2466_v20 = vpack.i.bf16 %v1532_v21, %v1531_v0  ;;  %1551 = vst [vmem:[#allocation1] ss:$2 sm:$0xff] %v3210_v45 }
 0x386   :  { %2467 = vrot.lane.b32.xlu1 %v2466_v20, %s2719_s1 }
 0x38b   :  { %v3628_v52 = vld.sshfl [vmem:[#allocation1] sm:$0xff pattern:$0x75316420]  ;;  %v3630_v34 = vld.sshfl [vmem:[#allocation1 + $0x8] sm:$0xff pattern:$0x75316420] }
 0x38c   :  { %1557 = vst [vmem:[#allocation1 + $0x1] ss:$2 sm:$0xff] %v3210_v45 }
 0x393   :  { %v1558_v35 = vld.sshfl [vmem:[#allocation1] sm:$0xff pattern:$0x75316420]  ;;  %v1559_v47 = vld.sshfl [vmem:[#allocation1 + $0x8] sm:$0xff pattern:$0x75316420] }
 0x394   :  { %v2471_v24 = vpack.i.bf16 %v1559_v47, %v1558_v35  ;;  %1578 = vst [vmem:[#allocation1] ss:$2 sm:$0xff] %v3210_v45 }
 0x396   :  { %2472 = vrot.lane.b32.xlu0 %v2471_v24, %s2719_s1 }
 0x39b   :  { %v3635_v7 = vld.sshfl [vmem:[#allocation1] sm:$0xff pattern:$0x75316420]  ;;  %v3637_v14 = vld.sshfl [vmem:[#allocation1 + $0x8] sm:$0xff pattern:$0x75316420] }
 0x39c   :  { %1584 = vst [vmem:[#allocation1 + $0x1] ss:$2 sm:$0xff] %v3210_v45 }
 0x3a3   :  { %v1585_v2 = vld.sshfl [vmem:[#allocation1] sm:$0xff pattern:$0x75316420]  ;;  %v1586_v27 = vld.sshfl [vmem:[#allocation1 + $0x8] sm:$0xff pattern:$0x75316420] }
 0x3a4   :  { %1605 = vst [vmem:[#allocation1] ss:$2 sm:$0xff] %v3210_v45  ;;  %v2476_v43 = vpack.i.bf16 %v1586_v27, %v1585_v2  ;;  %v4038_v27 = vld [vmem:[#allocation17_spill] sm:$0xff] }
 0x3a6   :  { %2477 = vrot.lane.b32.xlu2 %v2476_v43, %s2719_s1 }
 0x3ab   :  { %v3641_v41 = vld.sshfl [vmem:[#allocation1] sm:$0xff pattern:$0x75316420]  ;;  %v3643_v10 = vld.sshfl [vmem:[#allocation1 + $0x8] sm:$0xff pattern:$0x75316420] }
 0x3ac   :  { %1611 = vst [vmem:[#allocation1 + $0x1] ss:$2 sm:$0xff] %v3210_v45 }
 0x3b3   :  { %v1612_v38 = vld.sshfl [vmem:[#allocation1] sm:$0xff pattern:$0x75316420]  ;;  %v1613_v16 = vld.sshfl [vmem:[#allocation1 + $0x8] sm:$0xff pattern:$0x75316420] }
 0x3b4   :  { %v2481_v54 = vpack.i.bf16 %v1613_v16, %v1612_v38  ;;  %1632 = vst [vmem:[#allocation1] ss:$2 sm:$0xff] %v3210_v45  ;;  %v4039_v38 = vld [vmem:[#allocation21_spill] sm:$0xff] }
 0x3b6   :  { %2482 = vrot.lane.b32.xlu1 %v2481_v54, %s2719_s1 }
 0x3bb   :  { %v3649_v61 = vld.sshfl [vmem:[#allocation1] sm:$0xff pattern:$0x75316420]  ;;  %v3651_v60 = vld.sshfl [vmem:[#allocation1 + $0x8] sm:$0xff pattern:$0x75316420] }
 0x3bc   :  { %1638 = vst [vmem:[#allocation1 + $0x1] ss:$2 sm:$0xff] %v3210_v45 }
 0x3c3   :  { %v1639_v28 = vld.sshfl [vmem:[#allocation1] sm:$0xff pattern:$0x75316420]  ;;  %v1640_v22 = vld.sshfl [vmem:[#allocation1 + $0x8] sm:$0xff pattern:$0x75316420] }
 0x3c4   :  { %v2486_v6 = vpack.i.bf16 %v1640_v22, %v1639_v28  ;;  %1659 = vst [vmem:[#allocation1] ss:$2 sm:$0xff] %v3210_v45 }
 0x3c6   :  { %2487 = vrot.lane.b32.xlu0 %v2486_v6, %s2719_s1 }
 0x3cb   :  { %v3657_v62 = vld.sshfl [vmem:[#allocation1] sm:$0xff pattern:$0x75316420]  ;;  %v3659_v9 = vld.sshfl [vmem:[#allocation1 + $0x8] sm:$0xff pattern:$0x75316420] }
 0x3cc   :  { %1665 = vst [vmem:[#allocation1 + $0x1] ss:$2 sm:$0xff] %v3210_v45 }
 0x3d3   :  { %v1666_v0 = vld.sshfl [vmem:[#allocation1] sm:$0xff pattern:$0x75316420]  ;;  %v1667_v21 = vld.sshfl [vmem:[#allocation1 + $0x8] sm:$0xff pattern:$0x75316420] }
 0x3d4   :  { %1686 = vst [vmem:[#allocation1] ss:$2 sm:$0xff] %v3210_v45  ;;  %v2491_v20 = vpack.i.bf16 %v1667_v21, %v1666_v0  ;;  %v4040_v0 = vld [vmem:[#allocation20_spill] sm:$0xff] }
 0x3d6   :  { %2492 = vrot.lane.b32.xlu2 %v2491_v20, %s2719_s1  ;;  %v2531_v20 = vpack.i.bf16 %v3582_v37, %v3580_v32  ;;  %v3701_v32 = vpop.permute.xlu1 %2422 }
 0x3d7   :  { %4042 = vst [vmem:[#allocation12_spill] sm:$0xff] %v3701_v32 }
 0x3db   :  { %v3664_v35 = vld.sshfl [vmem:[#allocation1] sm:$0xff pattern:$0x75316420]  ;;  %v3666_v47 = vld.sshfl [vmem:[#allocation1 + $0x8] sm:$0xff pattern:$0x75316420] }
 0x3dc   :  { %1692 = vst [vmem:[#allocation1 + $0x1] ss:$2 sm:$0xff] %v3210_v45 }
 0x3e3   :  { %v1694_v24 = vld.sshfl [vmem:[#allocation1 + $0x8] sm:$0xff pattern:$0x75316420]  ;;  %v1693_v2 = vld.sshfl [vmem:[#allocation1] sm:$0xff pattern:$0x75316420] }
 0x3e4   :  { %v2501_v18 = vpack.i.bf16 %v4038_v27, %v1694_v24  ;;  %v2496_v16 = vpack.i.bf16 %v1693_v2, %v4039_v38  ;;  %1713 = vst [vmem:[#allocation1] ss:$2 sm:$0xff] %v3210_v45  ;;  %v2546_v38 = vpack.i.bf16 %v3533_v51, %v3531_v12  ;;  %v2443_v12 = vpop.permute.xlu1 %2442  ;;  %v2536_v51 = vpack.i.bf16 %v3566_v31, %v3564_v36 }
 0x3e5   :  { %v2445_v32 = vunpack.i.h.bf16 %v2443_v12 }
 0x3e6   :  { %2502 = vrot.lane.b32.xlu1 %v2501_v18, %s2719_s1  ;;  %2497 = vrot.lane.b32.xlu0 %v2496_v16, %s2719_s1 }
 0x3eb   :  { %v3674_v54 = vld.sshfl [vmem:[#allocation1] sm:$0xff pattern:$0x75316420]  ;;  %v3676_v28 = vld.sshfl [vmem:[#allocation1 + $0x8] sm:$0xff pattern:$0x75316420] }
 0x3ec   :  { %1719 = vst [vmem:[#allocation1 + $0x1] ss:$2 sm:$0xff] %v3210_v45 }
 0x3f3   :  { %v1720_v22 = vld.sshfl [vmem:[#allocation1] sm:$0xff pattern:$0x75316420]  ;;  %v1721_v6 = vld.sshfl [vmem:[#allocation1 + $0x8] sm:$0xff pattern:$0x75316420] }
 0x3f4   :  { %v2506_v43 = vpack.i.bf16 %v1720_v22, %v3424_v17  ;;  %v2511_v21 = vpack.i.bf16 %v4040_v0, %v1721_v6  ;;  %1740 = vst [vmem:[#allocation1] ss:$2 sm:$0xff] %v3210_v45  ;;  %v3692_v17 = vpop.permute.xlu0 %2412  ;;  %v2526_v6 = vpack.i.bf16 %v3604_v4, %v3602_v55 }
 0x3f5   :  { %4041 = vst [vmem:[#allocation11_spill] sm:$0xff] %v3692_v17 }
 0x3f6   :  { %2507 = vrot.lane.b32.xlu1 %v2506_v43, %s2719_s1  ;;  %2512 = vrot.lane.b32.xlu2 %v2511_v21, %s2719_s1  ;;  %v2444_v43 = vunpack.i.l.bf16 %v2443_v12  ;;  %v3714_v21 = vpop.permute.xlu2 %2417 }
 0x3f7   :  { %4044 = vst [vmem:[#allocation17_spill] sm:$0xff] %v3714_v21 }
 0x3fb   :  { %v3686_v24 = vld.sshfl [vmem:[#allocation1] sm:$0xff pattern:$0x75316420]  ;;  %v3688_v2 = vld.sshfl [vmem:[#allocation1 + $0x8] sm:$0xff pattern:$0x75316420] }
 0x3fc   :  { %1746 = vst [vmem:[#allocation1 + $0x1] ss:$2 sm:$0xff] %v3210_v45  ;;  %v3703_v37 = vpop.permute.xlu0 %2427 }
 0x3fd   :  { %4043 = vst [vmem:[#allocation13_spill] sm:$0xff] %v3703_v37 }
 0x3fe   :  { %2532 = vrot.lane.b32.xlu1 %v2531_v20, %s2719_s1  ;;  %v3722_v36 = vpop.permute.xlu2 %2432 }
 0x403   :  { %v1748_v27 = vld.sshfl [vmem:[#allocation1 + $0x8] sm:$0xff pattern:$0x75316420]  ;;  %v1747_v18 = vld.sshfl [vmem:[#allocation1] sm:$0xff pattern:$0x75316420] }
 0x404   :  { %v2521_v16 = vpack.i.bf16 %v3422_v59, %v1748_v27  ;;  %v2516_v22 = vpack.i.bf16 %v1747_v18, %v3486_v57  ;;  %v2541_v59 = vpack.i.bf16 %v3546_v44, %v3544_v1  ;;  %v2438_v57 = vpop.permute.xlu0 %2437  ;;  %v1325_v1 = vsel %vm44_vm1, %v3507_v48, %v2444_v43 }
 0x405   :  { %v2440_v0 = vunpack.i.h.bf16 %v2438_v57  ;;  %v2551_v27 = vpack.i.bf16 %v3523_v25, %v3521_v33 }
 0x406   :  { %2522 = vrot.lane.b32.xlu0 %v2521_v16, %s2719_s1  ;;  %2517 = vrot.lane.b32.xlu2 %v2516_v22, %s2719_s1  ;;  %v3724_v31 = vpop.permute.xlu2 %2457 }
 0x407   :  { %2547 = vrot.lane.b32.xlu1 %v2546_v38, %s2719_s1  ;;  %v1321_v55 = vsel %vm41_vm0, %v2440_v0, %v2444_v43  ;;  %v3735_v38 = vpop.permute.xlu1 %2447 }
 0x408   :  { %v1324_v4 = vsel %vm44_vm1, %v3505_v15, %v1321_v55 }
 0x409   :  { %v2556_v44 = vpack.i.bf16 %v1325_v1, %v1324_v4  ;;  %v4045_v1 = vld [vmem:[#allocation19_spill] sm:$0xff] }
 0x40c   :  { %v3731_v18 = vpop.permute.xlu0 %2452 }
 0x40e   :  { %2527 = vrot.lane.b32.xlu0 %v2526_v6, %s2719_s1  ;;  %2537 = vrot.lane.b32.xlu2 %v2536_v51, %s2719_s1  ;;  %v3726_v20 = vpop.permute.xlu2 %2462 }
 0x40f   :  { %v3739_v22 = vpop.permute.xlu1 %2467 }
 0x414   :  { %v3737_v48 = vpop.permute.xlu0 %2472 }
 0x416   :  { %2542 = vrot.lane.b32.xlu0 %v2541_v59, %s2719_s1  ;;  %2552 = vrot.lane.b32.xlu2 %v2551_v27, %s2719_s1  ;;  %v3733_v15 = vpop.permute.xlu2 %2477  ;;  %v4046_v27 = vld [vmem:[#allocation18_spill] sm:$0xff]  ;;  %s4051_s1 = smov 86  }
 0x41e   :  { %2557 = vrot.lane.b32.xlu0 %v2556_v44, %s2733_s7  ;;  %s2754_s7 = smov 8  }
 0x428   :  { %v2483_v51 = vpop.permute.xlu1 %2482 }
 0x430   :  { %v2493_v16 = vpop.permute.xlu2 %2492 }
 0x431   :  { %v2495_v33 = vunpack.i.h.bf16 %v2493_v16  ;;  %v2494_v25 = vunpack.i.l.bf16 %v2493_v16 }
 0x433   :  { %v1672_v5 = vsel %vm41_vm0, %v2494_v25, %v2495_v33 }
 0x434   :  { %v1675_v16 = vsel %vm44_vm1, %v3657_v62, %v1672_v5 }
 0x438   :  { %v3741_v6 = vpop.permute.xlu0 %2487 }
 0x450   :  { %v2513_v59 = vpop.permute.xlu2 %2512 }
 0x451   :  { %v2515_v43 = vunpack.i.h.bf16 %v2513_v59 }
 0x458   :  { %v3743_v0 = vpop.permute.xlu0 %2497  ;;  %v3753_v17 = vpop.permute.xlu1 %2502 }
 0x459   :  { %v2499_v55 = vunpack.i.l.bf16 %v3743_v0 }
 0x45b   :  { %v1240_v4 = vsel %vm41_vm0, %v2515_v43, %v2499_v55  ;;  %v1244_v44 = vsel %vm44_vm1, %v4045_v1, %v2499_v55  ;;  %v1676_v43 = vsel %vm44_vm1, %v3659_v9, %v2495_v33  ;;  %v2505_v55 = vunpack.i.h.bf16 %v3753_v17  ;;  %v4047_v9 = vld [vmem:[#allocation15_spill] sm:$0xff] }
 0x45c   :  { %v1243_v45 = vsel %vm44_vm1, %v4046_v27, %v1240_v4  ;;  %v2586_v25 = vpack.i.bf16 %v1676_v43, %v1675_v16  ;;  %v2439_v1 = vunpack.i.l.bf16 %v2438_v57  ;;  %v2485_v43 = vunpack.i.h.bf16 %v2483_v51 }
 0x45d   :  { %v2571_v30 = vpack.i.bf16 %v1244_v44, %v1243_v45 }
 0x45e   :  { %v1213_v5 = vsel %vm41_vm0, %v2439_v1, %v2505_v55  ;;  %v2479_v1 = vunpack.i.l.bf16 %v3733_v15 }
 0x45f   :  { %2572 = vrot.lane.b32.xlu2 %v2571_v30, %s2729_s30  ;;  %v1216_v12 = vsel %vm44_vm1, %v4047_v9, %v1213_v5 }
 0x460   :  { %v2518_v21 = vpop.permute.xlu2 %2517 }
 0x461   :  { %v2519_v37 = vunpack.i.l.bf16 %v2518_v21 }
 0x463   :  { %v1294_v4 = vsel %vm41_vm0, %v2445_v32, %v2519_v37  ;;  %v1298_v45 = vsel %vm44_vm1, %v3459_v29, %v2519_v37  ;;  %v4048_v32 = vld [vmem:[#allocation16_spill] sm:$0xff]  ;;  %v2514_v29 = vunpack.i.l.bf16 %v2513_v59  ;;  %v2480_v59 = vunpack.i.h.bf16 %v3733_v15 }
 0x464   :  { %v1297_v30 = vsel %vm44_vm1, %v3457_v49, %v1294_v4  ;;  %v1217_v33 = vsel %vm44_vm1, %v4048_v32, %v2505_v55  ;;  %v2484_v4 = vunpack.i.l.bf16 %v2483_v51 }
 0x465   :  { %v2561_v44 = vpack.i.bf16 %v1298_v45, %v1297_v30  ;;  %v2576_v27 = vpack.i.bf16 %v1217_v33, %v1216_v12  ;;  %v1730_v16 = vsel %vm44_vm1, %v3676_v28, %v2514_v29  ;;  %v2489_v28 = vunpack.i.l.bf16 %v3741_v6  ;;  %v4049_v12 = vld [vmem:[#allocation23_spill] sm:$0xff] }
 0x466   :  { %v1618_v30 = vsel %vm41_vm0, %v2484_v4, %v2485_v43  ;;  %v1591_v4 = vsel %vm41_vm0, %v2479_v1, %v2480_v59 }
 0x467   :  { %2562 = vrot.lane.b32.xlu1 %v2561_v44, %s2734_s8  ;;  %2587 = vrot.lane.b32.xlu2 %v2586_v25, %s2747_s18  ;;  %v2520_v44 = vunpack.i.h.bf16 %v2518_v21  ;;  %v1622_v21 = vsel %vm44_vm1, %v3643_v10, %v2485_v43  ;;  %v1594_v43 = vsel %vm44_vm1, %v3635_v7, %v1591_v4 }
 0x468   :  { %v2508_v62 = vpop.permute.xlu1 %2507 }
 0x469   :  { %v2510_v37 = vunpack.i.h.bf16 %v2508_v62  ;;  %v2509_v25 = vunpack.i.l.bf16 %v2508_v62  ;;  %v1621_v62 = vsel %vm44_vm1, %v3641_v41, %v1618_v30 }
 0x46b   :  { %v1726_v49 = vsel %vm41_vm0, %v2510_v37, %v2514_v29  ;;  %v1271_v51 = vsel %vm44_vm1, %v4049_v12, %v2509_v25  ;;  %v2470_v29 = vunpack.i.h.bf16 %v3739_v22  ;;  %v4050_v37 = vld [vmem:[#allocation22_spill] sm:$0xff] }
 0x46c   :  { %v1729_v57 = vsel %vm44_vm1, %v3674_v54, %v1726_v49  ;;  %v2490_v54 = vunpack.i.h.bf16 %v3741_v6  ;;  %v2469_v6 = vunpack.i.l.bf16 %v3739_v22  ;;  %v2465_v22 = vunpack.i.h.bf16 %v3726_v20 }
 0x46d   :  { %v2596_v45 = vpack.i.bf16 %v1730_v16, %v1729_v57  ;;  %v1541_v7 = vsel %vm44_vm1, %v3618_v46, %v2470_v29 }
 0x46e   :  { %v1537_v10 = vsel %vm41_vm0, %v2469_v6, %v2470_v29  ;;  %v1514_v46 = vsel %vm44_vm1, %v3611_v11, %v2465_v22 }
 0x46f   :  { %2577 = vrot.lane.b32.xlu1 %v2576_v27, %s2730_s4 }
 0x470   :  { %v2533_v16 = vpop.permute.xlu1 %2532 }
 0x471   :  { %v2535_v1 = vunpack.i.h.bf16 %v2533_v16 }
 0x477   :  { %2597 = vrot.lane.b32.xlu1 %v2596_v45, %s2749_s9  ;;  %v2601_v45 = vpack.i.bf16 %v1622_v21, %v1621_v62 }
 0x478   :  { %v2523_v55 = vpop.permute.xlu0 %2522 }
 0x479   :  { %v2525_v5 = vunpack.i.h.bf16 %v2523_v55  ;;  %v2524_v9 = vunpack.i.l.bf16 %v2523_v55  ;;  %v1649_v55 = vsel %vm44_vm1, %v3651_v60, %v2490_v54 }
 0x47b   :  { %v1267_v32 = vsel %vm41_vm0, %v2525_v5, %v2509_v25  ;;  %v1753_v33 = vsel %vm41_vm0, %v2520_v44, %v2524_v9  ;;  %v1757_v15 = vsel %vm44_vm1, %v3688_v2, %v2524_v9  ;;  %v1645_v2 = vsel %vm41_vm0, %v2489_v28, %v2490_v54 }
 0x47c   :  { %v1270_v27 = vsel %vm44_vm1, %v4050_v37, %v1267_v32  ;;  %v1756_v41 = vsel %vm44_vm1, %v3686_v24, %v1753_v33  ;;  %v2464_v24 = vunpack.i.l.bf16 %v3726_v20  ;;  %v1595_v25 = vsel %vm44_vm1, %v3637_v14, %v2480_v59  ;;  %v2538_v37 = vpop.permute.xlu2 %2537 }
 0x47d   :  { %v2566_v49 = vpack.i.bf16 %v1271_v51, %v1270_v27  ;;  %v2606_v57 = vpack.i.bf16 %v1757_v15, %v1756_v41  ;;  %v1648_v30 = vsel %vm44_vm1, %v3649_v61, %v1645_v2  ;;  %v2534_v44 = vunpack.i.l.bf16 %v2533_v16 }
 0x47e   :  { %v2504_v5 = vunpack.i.l.bf16 %v3753_v17  ;;  %v2500_v9 = vunpack.i.h.bf16 %v3743_v0  ;;  %v1540_v20 = vsel %vm44_vm1, %v3616_v58, %v1537_v10  ;;  %v2581_v28 = vpack.i.bf16 %v1649_v55, %v1648_v30  ;;  %v2548_v17 = vpop.permute.xlu1 %2547 }
 0x47f   :  { %2567 = vrot.lane.b32.xlu0 %v2566_v49, %s2732_s6  ;;  %2607 = vrot.lane.b32.xlu2 %v2606_v57, %s2750_s12  ;;  %v2611_v14 = vpack.i.bf16 %v1595_v25, %v1594_v43  ;;  %v1510_v59 = vsel %vm41_vm0, %v2464_v24, %v2465_v22  ;;  %v2621_v61 = vpack.i.bf16 %v1541_v7, %v1540_v20  ;;  %v2550_v32 = vunpack.i.h.bf16 %v2548_v17  ;;  %s2753_s6 = smov 128  }
 0x480   :  { %2602 = vrot.lane.b32.xlu1 %v2601_v45, %s2745_s20  ;;  %v1456_v12 = vsel %vm41_vm0, %v2534_v44, %v2535_v1  ;;  %v1699_v60 = vsel %vm41_vm0, %v2500_v9, %v2504_v5  ;;  %v1513_v58 = vsel %vm44_vm1, %v3609_v42, %v1510_v59  ;;  %v1460_v54 = vsel %vm44_vm1, %v3571_v63, %v2535_v1  ;;  %v2528_v21 = vpop.permute.xlu0 %2527 }
 0x481   :  { %v1459_v0 = vsel %vm44_vm1, %v3569_v50, %v1456_v12  ;;  %v1702_v51 = vsel %vm44_vm1, %v3664_v35, %v1699_v60  ;;  %v1703_v62 = vsel %vm44_vm1, %v3666_v47, %v2504_v5  ;;  %v2549_v33 = vunpack.i.l.bf16 %v2548_v17 }
 0x482   :  { %v2475_v15 = vunpack.i.h.bf16 %v3737_v48  ;;  %v2474_v42 = vunpack.i.l.bf16 %v3737_v48  ;;  %v2636_v11 = vpack.i.bf16 %v1460_v54, %v1459_v0  ;;  %v2591_v29 = vpack.i.bf16 %v1703_v62, %v1702_v51 }
 0x483   :  { %v2626_v6 = vpack.i.bf16 %v1514_v46, %v1513_v58  ;;  %v1375_v50 = vsel %vm41_vm0, %v2549_v33, %v2550_v32  ;;  %v2530_v35 = vunpack.i.h.bf16 %v2528_v21  ;;  %v2529_v47 = vunpack.i.l.bf16 %v2528_v21 }
 0x484   :  { %v1564_v63 = vsel %vm41_vm0, %v2474_v42, %v2475_v15  ;;  %v1378_v48 = vsel %vm44_vm1, %v3526_v19, %v1375_v50  ;;  %v1379_v27 = vsel %vm44_vm1, %v3528_v40, %v2550_v32  ;;  %v2540_v41 = vunpack.i.h.bf16 %v2538_v37 }
 0x485   :  { %v2539_v49 = vunpack.i.l.bf16 %v2538_v37  ;;  %v1567_v57 = vsel %vm44_vm1, %v3628_v52, %v1564_v63  ;;  %v1568_v16 = vsel %vm44_vm1, %v3630_v34, %v2475_v15  ;;  %v2651_v4 = vpack.i.bf16 %v1379_v27, %v1378_v48  ;;  %v2553_v52 = vpop.permute.xlu2 %2552  ;;  %v3891_v48 = vld [vmem:[#allocation3] sm:$0xff] }
 0x486   :  { %v1483_v45 = vsel %vm41_vm0, %v2529_v47, %v2530_v35  ;;  %v2616_v2 = vpack.i.bf16 %v1568_v16, %v1567_v57  ;;  %v1487_v19 = vsel %vm44_vm1, %v3597_v8, %v2530_v35  ;;  %v1433_v43 = vsel %vm44_vm1, %v3557_v23, %v2540_v41  ;;  %1871 = vmatmul.f32.vlgmr.msra.gmra.mxu0 %v3891_v48 }
 0x487   :  { %2582 = vrot.lane.b32.xlu0 %v2581_v28, %s2744_s19  ;;  %2612 = vrot.lane.b32.xlu2 %v2611_v14, %s2746_s17  ;;  %v1429_v22 = vsel %vm41_vm0, %v2539_v49, %v2540_v41  ;;  %v1486_v24 = vsel %vm44_vm1, %v3595_v53, %v1483_v45  ;;  %v2555_v30 = vunpack.i.h.bf16 %v2553_v52  ;;  %v2554_v55 = vunpack.i.l.bf16 %v2553_v52 }
 0x488   :  { %2622 = vrot.lane.b32.xlu1 %v2621_v61, %s2742_s16  ;;  %v2543_v10 = vpop.permute.xlu0 %2542  ;;  %v1432_v34 = vsel %vm44_vm1, %v3555_v56, %v1429_v22  ;;  %v2631_v44 = vpack.i.bf16 %v1487_v19, %v1486_v24  ;;  %v2460_v63 = vunpack.i.h.bf16 %v3724_v31  ;;  %v2459_v35 = vunpack.i.l.bf16 %v3724_v31 }
 0x489   :  { %v2545_v40 = vunpack.i.h.bf16 %v2543_v10  ;;  %v2544_v25 = vunpack.i.l.bf16 %v2543_v10  ;;  %v2641_v1 = vpack.i.bf16 %v1433_v43, %v1432_v34  ;;  %v1348_v53 = vsel %vm41_vm0, %v2554_v55, %v2555_v30  ;;  %v3913_v34 = vld [vmem:[#allocation3 + $0x10] sm:$0xff]  ;;  %v4055_v43 = vld [vmem:[#allocation12_spill] sm:$0xff] }
 0x48a   :  { %v1351_v23 = vsel %vm44_vm1, %v3516_v26, %v1348_v53  ;;  %v1352_v9 = vsel %vm44_vm1, %v3518_v13, %v2555_v30  ;;  %v2455_v27 = vunpack.i.h.bf16 %v3731_v18  ;;  %v2454_v41 = vunpack.i.l.bf16 %v3731_v18 }
 0x48b   :  { %v1402_v8 = vsel %vm41_vm0, %v2544_v25, %v2545_v40  ;;  %v1406_v56 = vsel %vm44_vm1, %v3539_v3, %v2545_v40  ;;  %v2656_v20 = vpack.i.bf16 %v1352_v9, %v1351_v23  ;;  %v2449_v31 = vunpack.i.l.bf16 %v3735_v38  ;;  %v4054_v40 = vld [vmem:[#allocation13_spill] sm:$0xff] }
 0x48c   :  { %v1405_v5 = vsel %vm44_vm1, %v3537_v39, %v1402_v8  ;;  %v1197_v45 = vsel %vm323_vm7, %v2459_v35, %v2460_v63  ;;  %v2435_v18 = vunpack.i.h.bf16 %v3722_v36  ;;  %v2434_v22 = vunpack.i.l.bf16 %v3722_v36  ;;  %v4057_v36 = vld [vmem:[#allocation17_spill] sm:$0xff]  ;;  %v3949_v35 = vld [vmem:[#allocation3 + $0x28] sm:$0xff] }
 0x48d   :  { %v2646_v28 = vpack.i.bf16 %v1406_v56, %v1405_v5  ;;  %v1170_v19 = vsel %vm295_vm8, %v2454_v41, %v2455_v27  ;;  %v2430_v24 = vunpack.i.h.bf16 %v4054_v40  ;;  %v2429_v52 = vunpack.i.l.bf16 %v4054_v40  ;;  %v3922_v5 = vld [vmem:[#allocation3 + $0x18] sm:$0xff] }
 0x48e   :  { %v2425_v25 = vunpack.i.h.bf16 %v4055_v43  ;;  %v2424_v30 = vunpack.i.l.bf16 %v4055_v43  ;;  %1874 = vmatmul.f32.gmra.mxu0 %v3913_v34  ;;  %vm4064_vm7 = vcmask 588800   ;;  %vm4067_vm8 = vcmask 998400  }
 0x48f   :  { %2592 = vrot.lane.b32.xlu0 %v2591_v29, %s2748_s10  ;;  %2627 = vrot.lane.b32.xlu2 %v2626_v6, %s2741_s15 }
 0x490   :  { %2637 = vrot.lane.b32.xlu1 %v2636_v11, %s2739_s13  ;;  %v2558_v7 = vpop.permute.xlu0 %2557 }
 0x491   :  { %v2560_v14 = vunpack.i.h.bf16 %v2558_v7  ;;  %v2559_v59 = vunpack.i.l.bf16 %v2558_v7  ;;  %v4059_v7 = vld [vmem:[#allocation11_spill] sm:$0xff] }
 0x493   :  { %v1332_v61 = vsel %vm463_vm2, %v2559_v59, %v2560_v14  ;;  %vm4056_vm2 = vcmask 932864   ;;  %v2414_v14 = vunpack.i.l.bf16 %v4059_v7 }
 0x494   :  { %1907 = vmatpush.msra.mxu2 %v1332_v61  ;;  %v1116_v55 = vsel %vm4056_vm2, %v2434_v22, %v2435_v18  ;;  %vm4071_vm2 = vcmask 1031168   ;;  %v2751_v18 = vmov 0  }
 0x495   :  { %2662 = vset.pattern.permute.xlu1 %v2751_v18  ;;  %2661 = vset.pattern.permute.xlu0 %v2751_v18 }
 0x496   :  { %2663 = vset.pattern.permute.xlu2 %v2751_v18 }
 0x497   :  { %2617 = vrot.lane.b32.xlu0 %v2616_v2, %s2743_s0  ;;  %2642 = vrot.lane.b32.xlu2 %v2641_v1, %s2740_s14  ;;  %v3902_v2 = vld [vmem:[#allocation3 + $0x8] sm:$0xff]  ;;  %v2420_v1 = vunpack.i.h.bf16 %v4057_v36 }
 0x498   :  { %2652 = vrot.lane.b32.xlu1 %v2651_v4, %s2737_s11  ;;  %v2450_v4 = vunpack.i.h.bf16 %v3735_v38  ;;  %1897 = vmatmul.f32.vlgmr.msra.gmra.mxu1 %v3902_v2 }
 0x49a   :  { %v1143_v38 = vsel %vm267_vm9, %v2449_v31, %v2450_v4  ;;  %vm4068_vm9 = vcmask 605184  }
 0x49f   :  { %2632 = vrot.lane.b32.xlu0 %v2631_v44, %s4051_s1  ;;  %2657 = vrot.lane.b32.xlu2 %v2656_v20, %s4052_s21  ;;  %v2419_v44 = vunpack.i.l.bf16 %v4057_v36 }
 0x4a0   :  { %1900 = vmatmul.f32.gmra.mxu1 %v3922_v5 }
 0x4a7   :  { %2647 = vrot.lane.b32.xlu0 %v2646_v28, %s4053_s22  ;;  %v2415_v28 = vunpack.i.h.bf16 %v4059_v7 }
 0x4a8   :  { %1903 = vmatmul.f32.gmra.mxu1 %v3949_v35 }
 0x4b9   :  { %v2573_v39 = vpop.permute.xlu2 %2572 }
 0x4ba   :  { %v2575_v42 = vunpack.i.h.bf16 %v2573_v39  ;;  %v2574_v21 = vunpack.i.l.bf16 %v2573_v39 }
 0x4bc   :  { %v1251_v47 = vsel %vm379_vm5, %v2574_v21, %v2575_v42  ;;  %vm4061_vm5 = vcmask 572416  }
 0x4c1   :  { %v3882_v3 = vpop.permute.xlu2 %2587 }
 0x4c2   :  { %v2590_v56 = vunpack.i.h.bf16 %v3882_v3  ;;  %v2589_v23 = vunpack.i.l.bf16 %v3882_v3 }
 0x4d9   :  { %v2608_v12 = vpop.permute.xlu2 %2607  ;;  %v2563_v26 = vpop.permute.xlu1 %2562 }
 0x4da   :  { %v2610_v60 = vunpack.i.h.bf16 %v2608_v12  ;;  %v2609_v17 = vunpack.i.l.bf16 %v2608_v12  ;;  %v2565_v13 = vunpack.i.h.bf16 %v2563_v26  ;;  %v2564_v58 = vunpack.i.l.bf16 %v2563_v26 }
 0x4dc   :  { %v1305_v46 = vsel %vm435_vm3, %v2564_v58, %v2565_v13  ;;  %v1764_v0 = vsel %vm911_vm12, %v2609_v17, %v2610_v60  ;;  %vm4058_vm3 = vcmask 949248   ;;  %v4062_v60 = vld [vmem:[#allocation10_spill] sm:$0xff]  ;;  %v3933_v58 = vld [vmem:[#allocation3 + $0x20] sm:$0xff]  ;;  %vm4069_vm12 = vcmask 1014784  }
 0x4dd   :  { %1908 = vmatpush.msra.mxu2 %v1305_v46  ;;  %1933 = vmatpush.msra.mxu3 %v1764_v0  ;;  %v1089_v53 = vsel %vm4058_vm3, %v2429_v52, %v2430_v24  ;;  %v2405_v17 = vunpack.i.h.bf16 %v4062_v60  ;;  %v2404_v3 = vunpack.i.l.bf16 %v4062_v60  ;;  %vm4072_vm3 = vcmask 637952   ;;  %v1837_v24 = vld [vmem:[%s3987_s2] sm:$0xff]  ;;  %v4073_v52 = vld [vmem:[#allocation9_spill] sm:$0xff] }
 0x4de   :  { %1877 = vmatmul.f32.gmra.mxu0 %v3933_v58  ;;  %1842 = vperm.xlu0 %2661, %v1837_v24  }
 0x4df   :  { %v981_v63 = vsel %vm4069_vm12, %v2404_v3, %v2405_v17 }
 0x4e1   :  { %v2578_v54 = vpop.permute.xlu1 %2577  ;;  %v3904_v10 = vpop.permute.xlu2 %2612 }
 0x4e2   :  { %v2580_v6 = vunpack.i.h.bf16 %v2578_v54  ;;  %v2579_v50 = vunpack.i.l.bf16 %v2578_v54 }
 0x4e4   :  { %v1224_v49 = vsel %vm351_vm6, %v2579_v50, %v2580_v6  ;;  %vm4063_vm6 = vcmask 982016   ;;  %v1008_v6 = vsel %vm4067_vm8, %v2414_v14, %v2415_v28 }
 0x4e5   :  { %v1035_v54 = vsel %vm4063_vm6, %v2419_v44, %v2420_v1  ;;  %vm4078_vm6 = vcmask 736256  }
 0x4e9   :  { %v2598_v51 = vpop.permute.xlu1 %2597  ;;  %v2628_v13 = vpop.permute.xlu2 %2627 }
 0x4ea   :  { %v2600_v62 = vunpack.i.h.bf16 %v2598_v51  ;;  %v2599_v32 = vunpack.i.l.bf16 %v2598_v51  ;;  %v1683_v51 = vsel %vm4064_vm7, %v2589_v23, %v2590_v56  ;;  %v2630_v22 = vunpack.i.h.bf16 %v2628_v13  ;;  %v1839_v23 = vld [vmem:[%s3987_s2 + $0x10] sm:$0xff] }
 0x4eb   :  { %1852 = vperm.xlu2 %2663, %v1839_v23  }
 0x4ec   :  { %v1737_v33 = vsel %vm883_vm15, %v2599_v32, %v2600_v62  ;;  %v4065_v62 = vld [vmem:[#allocation14_spill] sm:$0xff]  ;;  %vm4070_vm15 = vcmask 621568  }
 0x4ed   :  { %1934 = vmatpush.msra.mxu3 %v1737_v33  ;;  %v2315_v32 = vunpack.i.h.bf16 %v4065_v62  ;;  %v2314_v33 = vunpack.i.l.bf16 %v4065_v62 }
 0x4f1   :  { %v2568_v15 = vpop.permute.xlu0 %2567  ;;  %v2643_v40 = vpop.permute.xlu2 %2642 }
 0x4f2   :  { %v2570_v11 = vunpack.i.h.bf16 %v2568_v15  ;;  %v2569_v29 = vunpack.i.l.bf16 %v2568_v15  ;;  %v3897_v57 = vpop.permute.xlu1 %2602  ;;  %v4066_v15 = vld [vmem:[#allocation24_spill] sm:$0xff]  ;;  %v2644_v56 = vunpack.i.l.bf16 %v2643_v40 }
 0x4f3   :  { %v2605_v46 = vunpack.i.h.bf16 %v3897_v57  ;;  %v2604_v0 = vunpack.i.l.bf16 %v3897_v57  ;;  %v2395_v42 = vunpack.i.h.bf16 %v4066_v15  ;;  %v2394_v21 = vunpack.i.l.bf16 %v4066_v15 }
 0x4f4   :  { %v1278_v37 = vsel %vm407_vm4, %v2569_v29, %v2570_v11  ;;  %vm4060_vm4 = vcmask 965632   ;;  %v2615_v11 = vunpack.i.h.bf16 %v3904_v10  ;;  %v2614_v29 = vunpack.i.l.bf16 %v3904_v10 }
 0x4f5   :  { %1909 = vmatpush.msra.mxu2 %v1278_v37  ;;  %v1062_v12 = vsel %vm4060_vm4, %v2424_v30, %v2425_v25  ;;  %v1629_v41 = vsel %vm4070_vm15, %v2604_v0, %v2605_v46  ;;  %vm4075_vm4 = vcmask 670720  }
 0x4f6   :  { %v1602_v10 = vsel %vm4072_vm3, %v2614_v29, %v2615_v11 }
 0x4f7   :  { %1910 = vmatpush.msra.mxu2 %v1251_v47 }
 0x4f9   :  { %v2583_v16 = vpop.permute.xlu0 %2582  ;;  %1911 = vmatpush.msra.mxu2 %v1224_v49  ;;  %v926_v49 = vsel %vm41_vm0, %v2314_v33, %v2315_v32  ;;  %vm4074_vm0 = vcmask 654336   ;;  %v2658_v28 = vpop.permute.xlu2 %2657 }
 0x4fa   :  { %v2623_v59 = vpop.permute.xlu1 %2622  ;;  %v2585_v61 = vunpack.i.h.bf16 %v2583_v16  ;;  %v2584_v39 = vunpack.i.l.bf16 %v2583_v16  ;;  %v1838_v16 = vld [vmem:[%s3987_s2 + $0x8] sm:$0xff]  ;;  %v2659_v60 = vunpack.i.l.bf16 %v2658_v28  ;;  %s2752_s2 = smov [#allocation6]  }
 0x4fb   :  { %1912 = vmatpush.msra.mxu2 %v1197_v45  ;;  %v2625_v4 = vunpack.i.h.bf16 %v2623_v59  ;;  %v2624_v31 = vunpack.i.l.bf16 %v2623_v59  ;;  %v954_v45 = vsel %vm4071_vm2, %v2394_v21, %v2395_v42  ;;  %1847 = vperm.xlu1 %2662, %v1838_v16   ;;  %s1976_s29 = sshll.u32 %s2752_s2, 4  ;;  %s1977_s29 = int_to_ptr.vmem [resolvable:$true] %s1976_s29 }
 0x4fc   :  { %v1656_v50 = vsel %vm4068_vm9, %v2584_v39, %v2585_v61 }
 0x4fd   :  { %1913 = vmatpush.msra.mxu2 %v1170_v19  ;;  %v2629_v19 = vunpack.i.l.bf16 %v2628_v13  ;;  %v1548_v25 = vsel %vm4075_vm4, %v2624_v31, %v2625_v4 }
 0x4ff   :  { %1914 = vmatpush.msra.mxu2 %v1143_v38  ;;  %v928_v38 = vsel %vm44_vm1, %v4073_v52, %v926_v49  ;;  %vm4077_vm1 = vcmask 703488  }
 0x501   :  { %v2593_v8 = vpop.permute.xlu0 %2592  ;;  %1915 = vmatpush.msra.mxu2 %v1116_v55 }
 0x502   :  { %v2595_v9 = vunpack.i.h.bf16 %v2593_v8  ;;  %v2594_v20 = vunpack.i.l.bf16 %v2593_v8  ;;  %v2638_v57 = vpop.permute.xlu1 %2637 }
 0x503   :  { %1916 = vmatpush.msra.mxu2 %v1089_v53  ;;  %v2640_v30 = vunpack.i.h.bf16 %v2638_v57  ;;  %v2639_v55 = vunpack.i.l.bf16 %v2638_v57  ;;  %v2645_v53 = vunpack.i.h.bf16 %v2643_v40 }
 0x504   :  { %v1710_v26 = vsel %vm4061_vm5, %v2594_v20, %v2595_v9  ;;  %vm4076_vm5 = vcmask 687104  }
 0x505   :  { %1917 = vmatpush.msra.mxu2 %v1062_v12  ;;  %1935 = vmatpush.msra.mxu3 %v1710_v26  ;;  %v1521_v1 = vsel %vm4076_vm5, %v2629_v19, %v2630_v22  ;;  %v1440_v7 = vsel %vm4078_vm6, %v2644_v56, %v2645_v53  ;;  %v2660_v26 = vunpack.i.h.bf16 %v2658_v28 }
 0x507   :  { %1918 = vmatpush.msra.mxu2 %v1035_v54  ;;  %1936 = vmatpush.msra.mxu3 %v1683_v51  ;;  %v1359_v13 = vsel %vm491_vm10, %v2659_v60, %v2660_v26 }
 0x509   :  { %v2618_v37 = vpop.permute.xlu0 %2617  ;;  %1919 = vmatpush.msra.mxu2 %v1008_v6  ;;  %1937 = vmatpush.msra.mxu3 %v1656_v50 }
 0x50a   :  { %v2620_v47 = vunpack.i.h.bf16 %v2618_v37  ;;  %v2619_v27 = vunpack.i.l.bf16 %v2618_v37  ;;  %v2653_v20 = vpop.permute.xlu1 %2652 }
 0x50b   :  { %1920 = vmatpush.msra.mxu2 %v981_v63  ;;  %1938 = vmatpush.msra.mxu3 %v1629_v41  ;;  %v2655_v14 = vunpack.i.h.bf16 %v2653_v20  ;;  %v2654_v59 = vunpack.i.l.bf16 %v2653_v20 }
 0x50c   :  { %v1575_v43 = vsel %vm4074_vm0, %v2619_v27, %v2620_v47 }
 0x50d   :  { %1921 = vmatpush.msra.mxu2 %v954_v45  ;;  %1939 = vmatpush.msra.mxu3 %v1602_v10  ;;  %v1386_v3 = vsel %vm519_vm13, %v2654_v59, %v2655_v14 }
 0x50f   :  { %1922 = vmatpush.msra.mxu2 %v928_v38  ;;  %1940 = vmatpush.msra.mxu3 %v1575_v43 }
 0x510   :  { %1923 = vmatmul.f32.vlgmr.msra.gmra.mxu2 %v3891_v48  ;;  %v1467_v48 = vsel %vm603_vm11, %v2639_v55, %v2640_v30 }
 0x511   :  { %v2633_v36 = vpop.permute.xlu0 %2632  ;;  %1941 = vmatpush.msra.mxu3 %v1548_v25 }
 0x512   :  { %v2635_v44 = vunpack.i.h.bf16 %v2633_v36  ;;  %v2634_v8 = vunpack.i.l.bf16 %v2633_v36 }
 0x513   :  { %1942 = vmatpush.msra.mxu3 %v1521_v1 }
 0x514   :  { %v1494_v9 = vsel %vm4077_vm1, %v2634_v8, %v2635_v44 }
 0x515   :  { %1943 = vmatpush.msra.mxu3 %v1494_v9  ;;  %v1898_v46 = vpop.f32.mrf.mxu1 }
 0x517   :  { %1944 = vmatpush.msra.mxu3 %v1467_v48 }
 0x518   :  { %1926 = vmatmul.f32.gmra.mxu2 %v3913_v34  ;;  %v1872_v34 = vpop.f32.mrf.mxu0 }
 0x519   :  { %v2648_v61 = vpop.permute.xlu0 %2647  ;;  %1945 = vmatpush.msra.mxu3 %v1440_v7 }
 0x51a   :  { %v2650_v39 = vunpack.i.h.bf16 %v2648_v61  ;;  %v2649_v12 = vunpack.i.l.bf16 %v2648_v61 }
 0x51c   :  { %v1413_v17 = vsel %vm547_vm14, %v2649_v12, %v2650_v39 }
 0x51d   :  { %1946 = vmatpush.msra.mxu3 %v1413_v17  ;;  %v1901_v54 = vpop.f32.mrf.mxu1 }
 0x51f   :  { %1947 = vmatpush.msra.mxu3 %v1386_v3 }
 0x520   :  { %1929 = vmatmul.f32.gmra.mxu2 %v3933_v58  ;;  %v1875_v0 = vpop.f32.mrf.mxu0 }
 0x521   :  { %1948 = vmatpush.msra.mxu3 %v1359_v13 }
 0x522   :  { %1949 = vmatmul.f32.vlgmr.msra.gmra.mxu3 %v3902_v2 }
 0x525   :  { %v1904_v2 = vpop.f32.mrf.mxu1 }
 0x52a   :  { %1952 = vmatmul.f32.gmra.mxu3 %v3922_v5 }
 0x532   :  { %1955 = vmatmul.f32.gmra.mxu3 %v3949_v35 }
 0x545   :  { %v1853_v42 = vpop.permute.xlu2 %1852 }
 0x550   :  { %v1843_v32 = vpop.permute.xlu0 %1842 }
 0x551   :  { %v1873_v33 = vadd.f32 %v1872_v34, %v1843_v32 }
 0x553   :  { %v1899_v21 = vadd.f32 %v1898_v46, %v1873_v33 }
 0x555   :  { %v1959_v6 = vmax.f32 %v1899_v21, 0.0 }
 0x55b   :  { %v1878_v11 = vpop.f32.mrf.mxu0 }
 0x55c   :  { %v1879_v29 = vadd.f32 %v1878_v11, %v1853_v42 }
 0x55e   :  { %v1905_v50 = vadd.f32 %v1904_v2, %v1879_v29 }
 0x560   :  { %v1963_v37 = vmax.f32 %v1905_v50, 0.0 }
 0x56d   :  { %v1848_v51 = vpop.permute.xlu1 %1847 }
 0x56e   :  { %v1876_v62 = vadd.f32 %v1875_v0, %v1848_v51 }
 0x570   :  { %v1902_v15 = vadd.f32 %v1901_v54, %v1876_v62 }
 0x572   :  { %v1961_v58 = vmax.f32 %v1902_v15, 0.0 }
 0x574   :  { %v1965_v5 = vadd.f32 %v1961_v58, %v1959_v6 }
 0x576   :  { %v1967_v63 = vadd.f32 %v1965_v5, %v1963_v37 }
 0x578   :  { %1969 = vst [vmem:[#allocation6] sm:$0xff] %v1967_v63 }
 0x593   :  { %v1924_v35 = vpop.f32.mrf.mxu2 }
 0x594   :  { %v1925_v57 = vadd.f32 %v1924_v35, %v1843_v32 }
 0x59b   :  { %v1927_v27 = vpop.f32.mrf.mxu2 }
 0x59c   :  { %v1928_v41 = vadd.f32 %v1927_v27, %v1848_v51 }
 0x5a3   :  { %v1930_v16 = vpop.f32.mrf.mxu2 }
 0x5a4   :  { %v1931_v45 = vadd.f32 %v1930_v16, %v1853_v42 }
 0x5a5   :  { %v1950_v47 = vpop.f32.mrf.mxu3 }
 0x5a6   :  { %v1951_v31 = vadd.f32 %v1950_v47, %v1925_v57 }
 0x5a8   :  { %v1960_v22 = vmax.f32 %v1951_v31, 0.0 }
 0x5ad   :  { %v1953_v49 = vpop.f32.mrf.mxu3 }
 0x5ae   :  { %v1954_v4 = vadd.f32 %v1953_v49, %v1928_v41 }
 0x5b0   :  { %v1962_v10 = vmax.f32 %v1954_v4, 0.0 }
 0x5b2   :  { %v1966_v40 = vadd.f32 %v1962_v10, %v1960_v22 }
 0x5b5   :  { %v1956_v18 = vpop.f32.mrf.mxu3 }
 0x5b6   :  { %v1957_v19 = vadd.f32 %v1956_v18, %v1931_v45 }
 0x5b8   :  { %v1964_v24 = vmax.f32 %v1957_v19, 0.0 }
 0x5ba   :  { %v1968_v52 = vadd.f32 %v1966_v40, %v1964_v24 }
 0x5bc   :  { %1971 = vst [vmem:[#allocation6 + $0x8] sm:$0xff] %v1968_v52 }
 0x5bd   :  { %1984 = dma.vmem_to_hbm [thread:$0]  %s1977_s29, 256, %s1979_s5, [#allocation5], %s2753_s6, %s2753_s6, %s2754_s7  }
 0x5be   :  { %2714 = dma.done.wait [#allocation5], 256  }
 0x5bf   :  { %2715 = vsyncadd [#allocation5], 4294967040 }
 0x5c0   :  { %1989 = vsyncpa [#allocation4], 1 }
 0x5c1   :  { %1990 = vsyncpa [#allocation5], 1 }

</bundles_post_ra>
